<compile_context>
chip_gen: v7x
topology: tpu7x:2x2x1
jax: 0.10.0
libtpu: 0.0.40
codegen_flags: <defaults>
</compile_context>

<pallas_src>
import functools

import jax
import jax.numpy as jnp
from jax.experimental import pallas as pl
from jax.experimental.pallas import tpu as pltpu


# ---------------------------------------------------------------------------
# Pallas kernels
# ---------------------------------------------------------------------------
def _conv_bn_lrelu_pool_kernel(x_ref, w_ref, b_ref, o_ref, *, slope):
    """Fused conv(SAME, im2col) + folded-BN + LeakyReLU + 2x2 max-pool.

    x_ref : (4, M, K)  bf16 -- pool-grouped im2col patches; group g is one of
                               the four (dh, dw) offsets of each 2x2 pooling
                               window, M = Nb*Ho*Wo pooled output positions,
                               K = KH*KW*Cin contraction (zero lane-padded).
    w_ref : (K, Cout)  bf16 -- conv weights with the BN scale folded in.
    b_ref : (1, Cout)  f32  -- folded BN bias.
    o_ref : (M, Cout)  bf16 -- pooled block output, rows ordered (n, ho, wo).
    """
    w = w_ref[...]
    # One large MXU dot per pool offset; progressive element-wise max == MaxPool2d(2).
    m = jnp.dot(x_ref[0], w, preferred_element_type=jnp.float32)
    for g in range(1, x_ref.shape[0]):
        m = jnp.maximum(m, jnp.dot(x_ref[g], w, preferred_element_type=jnp.float32))
    # max commutes with the per-channel bias add and the monotone LeakyReLU (the
    # BN scale is already inside the max via the folded weights), so pooling
    # first is exactly conv -> BN -> LReLU -> pool.  Single vectorized epilogue.
    y = m + b_ref[...]
    o_ref[...] = jnp.where(y >= 0.0, y, slope * y).astype(o_ref.dtype)


def _fc_head_kernel(x_ref, w1_ref, b1_ref, w2_ref, b2_ref, o_ref):
    """flatten -> FC1 -> LeakyReLU(0.1) -> Dropout(eval: identity) -> FC2 (128-lane padded)."""
    h = jnp.dot(x_ref[...], w1_ref[...], preferred_element_type=jnp.float32)
    h = h + b1_ref[...]
    h = jnp.where(h >= 0.0, h, 0.1 * h)
    # TODO(synk): training-mode Dropout(0.5) (random mask + 2x scale) not implemented (eval mode).
    logits = jnp.dot(h.astype(w2_ref.dtype), w2_ref[...],
                     preferred_element_type=jnp.float32) + b2_ref[...]
    o_ref[...] = logits                                      # (N, 128) f32, lane-dense store


# ---------------------------------------------------------------------------
# Wrappers
# ---------------------------------------------------------------------------
def _batch_tiles(n, target=16):
    """(images per grid step, padded batch). Nb is a multiple of 8 whenever grid > 1 step."""
    if n <= target:
        return n, n
    nb = target
    return nb, ((n + nb - 1) // nb) * nb


def _pool_grouped_im2col(x_nhwc, KH, KW):
    """(N,H,W,Cin) -> ((4, N*Ho*Wo, KH*KW*Cin), Ho, Wo).

    Full im2col with both kernel taps folded into the contraction dim and the
    2x2-pool window offset (dh, dw) as the leading group axis; rows within a
    group are ordered (n, ho, wo) over the *pooled* output positions.
    """
    N, H, W, Cin = x_nhwc.shape
    pad = (KH - 1) // 2
    Ho, Wo = H // 2, W // 2
    xpad = jnp.pad(x_nhwc, ((0, 0), (pad, pad), (pad, pad), (0, 0)))
    groups = []
    for dh in range(2):
        for dw in range(2):
            taps = [
                xpad[:, dh + kh: dh + kh + 2 * (Ho - 1) + 1: 2,
                        dw + kw: dw + kw + 2 * (Wo - 1) + 1: 2, :]
                for kh in range(KH) for kw in range(KW)
            ]
            g = jnp.concatenate(taps, axis=-1)               # (N, Ho, Wo, KH*KW*Cin)
            groups.append(g.reshape(N * Ho * Wo, KH * KW * Cin))
    return jnp.stack(groups, axis=0), Ho, Wo


def conv_block_pallas(x_nhwc, p, KH, KW, Nb):
    """One conv+BN+LReLU+pool block. (N,H,W,Cin) bf16 -> (N,H//2,W//2,Cout) bf16."""
    N, H, W, Cin = x_nhwc.shape
    Kp, Cout = p["w"].shape
    xcol, Ho, Wo = _pool_grouped_im2col(x_nhwc, KH, KW)
    K0 = KH * KW * Cin
    if Kp > K0:                                              # block 1: K 25 -> 128 zero pad
        xcol = jnp.pad(xcol, ((0, 0), (0, 0), (0, Kp - K0)))
    M, Mb = N * Ho * Wo, Nb * Ho * Wo

    out = pl.pallas_call(
        functools.partial(_conv_bn_lrelu_pool_kernel, slope=0.1),
        out_shape=jax.ShapeDtypeStruct((M, Cout), jnp.bfloat16),
        grid=(N // Nb,),
        in_specs=[
            pl.BlockSpec((4, Mb, Kp), lambda i: (0, i, 0)),
            pl.BlockSpec((Kp, Cout), lambda i: (0, 0)),      # grid-resident weights
            pl.BlockSpec((1, Cout), lambda i: (0, 0)),       # grid-resident bias
        ],
        out_specs=pl.BlockSpec((Mb, Cout), lambda i: (i, 0)),
        compiler_params=pltpu.CompilerParams(
            dimension_semantics=("parallel",)),              # megacore on v7x when grid > 1
    )(xcol, p["w"], p["b"])
    # Free reinterpretation of the same row-major bytes.
    return out.reshape(N, Ho, Wo, Cout)


def fc_head_pallas(flat_bf16, p):
    """(N, 1152) bf16 -> (N, 128) f32 slab; real logits are columns 0..9."""
    N = flat_bf16.shape[0]
    vmem = pl.BlockSpec(memory_space=pltpu.MemorySpace.VMEM)
    return pl.pallas_call(
        _fc_head_kernel,
        out_shape=jax.ShapeDtypeStruct((N, 128), jnp.float32),
        in_specs=[vmem, vmem, vmem, vmem, vmem],
        out_specs=vmem,
    )(flat_bf16, p["fc1_w"], p["fc1_b"], p["fc2_w"], p["fc2_b"])


# ---------------------------------------------------------------------------
# Parameters (synthetic, deterministic); BN eval-mode folded into weights/bias.
# ---------------------------------------------------------------------------
def init_params(key):
    ks = jax.random.split(key, 8)

    def conv_params(k, KH, KW, Cin, Cout, k_pad_to=None):
        kw_, kb_, kg_, kbeta, kmean, kvar = jax.random.split(k, 6)
        w = 0.05 * jax.random.normal(kw_, (KH, KW, Cin, Cout), jnp.float32)
        b = 0.05 * jax.random.normal(kb_, (Cout,), jnp.float32)
        gamma = 1.0 + 0.1 * jax.random.normal(kg_, (Cout,), jnp.float32)
        beta = 0.1 * jax.random.normal(kbeta, (Cout,), jnp.float32)
        mean = 0.1 * jax.random.normal(kmean, (Cout,), jnp.float32)
        var = jax.random.uniform(kvar, (Cout,), jnp.float32, 0.5, 1.5)
        scale = gamma * jax.lax.rsqrt(var + 1e-5)             # BN eval fold
        w_eff = (w * scale).reshape(KH * KW * Cin, Cout)      # fold scale into weights
        b_eff = (b - mean) * scale + beta
        if k_pad_to is not None and k_pad_to > w_eff.shape[0]:
            w_eff = jnp.pad(w_eff, ((0, k_pad_to - w_eff.shape[0]), (0, 0)))
        return dict(w=w_eff.astype(jnp.bfloat16),
                    b=b_eff.reshape(1, Cout).astype(jnp.float32))

    p = {
        "c1": conv_params(ks[0], 5, 5, 1, 32, k_pad_to=128),  # K 25 -> 128: lane-dense DMA
        "c2": conv_params(ks[1], 3, 3, 32, 64),               # K = 288
        "c3": conv_params(ks[2], 3, 3, 64, 128),              # K = 576
    }

    fc_in = 128 * 3 * 3                                       # = 1152 for 28x28 input
    fc1_w = 0.05 * jax.random.normal(ks[3], (fc_in, 128), jnp.float32)  # torch NCHW-flat rows
    fc1_b = 0.05 * jax.random.normal(ks[4], (128,), jnp.float32)
    fc2_w = 0.05 * jax.random.normal(ks[5], (128, 10), jnp.float32)
    fc2_b = 0.05 * jax.random.normal(ks[6], (10,), jnp.float32)

    # Fold the PyTorch NCHW flatten into fc1_w so the pooled NHWC tensor feeds it
    # directly:  NHWC-flat row (h*3 + w)*128 + c  <-  torch row c*9 + h*3 + w.
    hh, ww, cc = jnp.meshgrid(jnp.arange(3), jnp.arange(3), jnp.arange(128),
                              indexing="ij")
    perm = (cc * 9 + hh * 3 + ww).reshape(-1)
    fc1_w_nhwc = fc1_w[perm, :]

    # Pad FC2 to 128 output lanes (lane-dense store); real logits are cols 0..9.
    fc2_w_pad = jnp.zeros((128, 128), jnp.float32).at[:, :10].set(fc2_w)
    fc2_b_pad = jnp.zeros((1, 128), jnp.float32).at[0, :10].set(fc2_b)

    p["fc1_w"] = fc1_w_nhwc.astype(jnp.bfloat16)
    p["fc1_b"] = fc1_b.reshape(1, 128).astype(jnp.float32)
    p["fc2_w"] = fc2_w_pad.astype(jnp.bfloat16)
    p["fc2_b"] = fc2_b_pad
    return p


# ---------------------------------------------------------------------------
# Forward
# ---------------------------------------------------------------------------
def cnn_forward(x_nchw, params, nb_target=16):
    N = x_nchw.shape[0]
    Nb, Npad = _batch_tiles(N, nb_target)
    x = jnp.transpose(x_nchw, (0, 2, 3, 1)).astype(jnp.bfloat16)    # NHWC (N,28,28,1)
    if Npad != N:
        x = jnp.pad(x, ((0, Npad - N), (0, 0), (0, 0), (0, 0)))
    y = conv_block_pallas(x, params["c1"], 5, 5, Nb)                 # (Npad,14,14, 32)
    y = conv_block_pallas(y, params["c2"], 3, 3, Nb)                 # (Npad, 7, 7, 64)
    y = conv_block_pallas(y, params["c3"], 3, 3, Nb)                 # (Npad, 3, 3,128)
    flat = y.reshape(Npad, -1)                                       # NHWC flatten (fc1_w pre-permuted)
    logits = fc_head_pallas(flat, params)                            # (Npad, 128) f32
    return logits[:N, :10]


if __name__ == "__main__":
    key = jax.random.PRNGKey(0)
    k_x, k_p = jax.random.split(key)
    # 28x28 input is required: the module's fc_input_size (1152) is derived from it.
    x = jax.random.normal(k_x, (2, 1, 28, 28), dtype=jnp.float32)    # NCHW like PyTorch
    params = init_params(k_p)

    out = jax.block_until_ready(jax.jit(cnn_forward)(x, params))
    assert out.shape == (2, 10) and out.dtype == jnp.float32
    print("KERNEL_OK")
</pallas_src>

<mosaic_0001>
module attributes {stable_mosaic.version = 11 : i64} {
  func.func @_conv_bn_lrelu_pool_kernel(%arg0: i32, %arg1: memref<4x392x128xbf16, #tpu.memory_space<vmem>>, %arg2: memref<128x32xbf16, #tpu.memory_space<vmem>>, %arg3: memref<1x32xf32, #tpu.memory_space<vmem>>, %arg4: memref<392x32xbf16, #tpu.memory_space<vmem>>) attributes {dimension_semantics = [#tpu.dimension_semantics<parallel>], iteration_bounds = array<i64: 1>, scalar_prefetch = 0 : i64, scratch_operands = 0 : i64, tpu.core_type = #tpu.core_type<tc>, window_params = [{transform_indices = @transform_0, window_bounds = array<i64: 4, 392, 128>}, {pipeline_mode = #tpu.pipeline_mode<synchronous>, transform_indices = @transform_1, window_bounds = array<i64: 128, 32>}, {pipeline_mode = #tpu.pipeline_mode<synchronous>, transform_indices = @transform_2, window_bounds = array<i64: 1, 32>}, {transform_indices = @transform_3, window_bounds = array<i64: 392, 32>}]} {
    %c0 = arith.constant 0 : index
    %c0_0 = arith.constant 0 : index
    %0 = vector.load %arg2[%c0, %c0_0] : memref<128x32xbf16, #tpu.memory_space<vmem>>, vector<128x32xbf16>
    %c0_1 = arith.constant 0 : index
    %c0_2 = arith.constant 0 : index
    %c0_3 = arith.constant 0 : index
    %1 = vector.load %arg1[%c0_1, %c0_2, %c0_3] : memref<4x392x128xbf16, #tpu.memory_space<vmem>>, vector<1x392x128xbf16>
    %2 = vector.shape_cast %1 : vector<1x392x128xbf16> to vector<392x128xbf16>
    %cst = arith.constant dense<0.000000e+00> : vector<392x32xf32>
    %3 = tpu.matmul %2, %0, %cst {dimension_numbers = #tpu.dot_dimension_numbers<[1], [0], [0], [1], [0, 0, 1, 1], [], []>} : vector<392x128xbf16>, vector<128x32xbf16>, vector<392x32xf32> -> vector<392x32xf32>
    %c1 = arith.constant 1 : index
    %c0_4 = arith.constant 0 : index
    %c0_5 = arith.constant 0 : index
    %4 = vector.load %arg1[%c1, %c0_4, %c0_5] : memref<4x392x128xbf16, #tpu.memory_space<vmem>>, vector<1x392x128xbf16>
    %5 = vector.shape_cast %4 : vector<1x392x128xbf16> to vector<392x128xbf16>
    %cst_6 = arith.constant dense<0.000000e+00> : vector<392x32xf32>
    %6 = tpu.matmul %5, %0, %cst_6 {dimension_numbers = #tpu.dot_dimension_numbers<[1], [0], [0], [1], [0, 0, 1, 1], [], []>} : vector<392x128xbf16>, vector<128x32xbf16>, vector<392x32xf32> -> vector<392x32xf32>
    %7 = arith.maximumf %3, %6 : vector<392x32xf32>
    %c2 = arith.constant 2 : index
    %c0_7 = arith.constant 0 : index
    %c0_8 = arith.constant 0 : index
    %8 = vector.load %arg1[%c2, %c0_7, %c0_8] : memref<4x392x128xbf16, #tpu.memory_space<vmem>>, vector<1x392x128xbf16>
    %9 = vector.shape_cast %8 : vector<1x392x128xbf16> to vector<392x128xbf16>
    %cst_9 = arith.constant dense<0.000000e+00> : vector<392x32xf32>
    %10 = tpu.matmul %9, %0, %cst_9 {dimension_numbers = #tpu.dot_dimension_numbers<[1], [0], [0], [1], [0, 0, 1, 1], [], []>} : vector<392x128xbf16>, vector<128x32xbf16>, vector<392x32xf32> -> vector<392x32xf32>
    %11 = arith.maximumf %7, %10 : vector<392x32xf32>
    %c3 = arith.constant 3 : index
    %c0_10 = arith.constant 0 : index
    %c0_11 = arith.constant 0 : index
    %12 = vector.load %arg1[%c3, %c0_10, %c0_11] : memref<4x392x128xbf16, #tpu.memory_space<vmem>>, vector<1x392x128xbf16>
    %13 = vector.shape_cast %12 : vector<1x392x128xbf16> to vector<392x128xbf16>
    %cst_12 = arith.constant dense<0.000000e+00> : vector<392x32xf32>
    %14 = tpu.matmul %13, %0, %cst_12 {dimension_numbers = #tpu.dot_dimension_numbers<[1], [0], [0], [1], [0, 0, 1, 1], [], []>} : vector<392x128xbf16>, vector<128x32xbf16>, vector<392x32xf32> -> vector<392x32xf32>
    %15 = arith.maximumf %11, %14 : vector<392x32xf32>
    %c0_13 = arith.constant 0 : index
    %c0_14 = arith.constant 0 : index
    %16 = vector.load %arg3[%c0_13, %c0_14] : memref<1x32xf32, #tpu.memory_space<vmem>>, vector<1x32xf32>
    %17 = vector.broadcast %16 : vector<1x32xf32> to vector<392x32xf32>
    %18 = arith.addf %15, %17 : vector<392x32xf32>
    %cst_15 = arith.constant 0.000000e+00 : f32
    %19 = vector.broadcast %cst_15 : f32 to vector<392x32xf32>
    %20 = arith.cmpf oge, %18, %19 : vector<392x32xf32>
    %cst_16 = arith.constant 1.000000e-01 : f32
    %21 = vector.broadcast %cst_16 : f32 to vector<392x32xf32>
    %22 = arith.mulf %21, %18 : vector<392x32xf32>
    %23 = arith.select %20, %18, %22 : vector<392x32xi1>, vector<392x32xf32>
    %24 = arith.truncf %23 : vector<392x32xf32> to vector<392x32xbf16>
    %c0_17 = arith.constant 0 : index
    %c0_18 = arith.constant 0 : index
    %25 = vector.load %arg4[%c0_17, %c0_18] : memref<392x32xbf16, #tpu.memory_space<vmem>>, vector<392x32xbf16>
    tpu.vector_store %arg4[%c0_17, %c0_18], %24 {strides = array<i32>} : memref<392x32xbf16, #tpu.memory_space<vmem>>, vector<392x32xbf16>,
    return
  }
  func.func @transform_0(%arg0: i32) -> (i32, i32, i32) {
    %c0_i32 = arith.constant 0 : i32
    %c0_i32_0 = arith.constant 0 : i32
    %c0_i32_1 = arith.constant 0 : i32
    return %c0_i32, %arg0, %c0_i32_0 : i32, i32, i32
  }
  func.func @transform_1(%arg0: i32) -> (i32, i32) {
    %c0_i32 = arith.constant 0 : i32
    %c0_i32_0 = arith.constant 0 : i32
    %c0_i32_1 = arith.constant 0 : i32
    return %c0_i32, %c0_i32_0 : i32, i32
  }
  func.func @transform_2(%arg0: i32) -> (i32, i32) {
    %c0_i32 = arith.constant 0 : i32
    %c0_i32_0 = arith.constant 0 : i32
    %c0_i32_1 = arith.constant 0 : i32
    return %c0_i32, %c0_i32_0 : i32, i32
  }
  func.func @transform_3(%arg0: i32) -> (i32, i32) {
    %c0_i32 = arith.constant 0 : i32
    %c0_i32_0 = arith.constant 0 : i32
    return %arg0, %c0_i32 : i32, i32
  }
}

module attributes {stable_mosaic.version = 11 : i64} {
  func.func @_conv_bn_lrelu_pool_kernel(%arg0: i32, %arg1: memref<4x98x288xbf16, #tpu.memory_space<vmem>>, %arg2: memref<288x64xbf16, #tpu.memory_space<vmem>>, %arg3: memref<1x64xf32, #tpu.memory_space<vmem>>, %arg4: memref<98x64xbf16, #tpu.memory_space<vmem>>) attributes {dimension_semantics = [#tpu.dimension_semantics<parallel>], iteration_bounds = array<i64: 1>, scalar_prefetch = 0 : i64, scratch_operands = 0 : i64, tpu.core_type = #tpu.core_type<tc>, window_params = [{transform_indices = @transform_0, window_bounds = array<i64: 4, 98, 288>}, {pipeline_mode = #tpu.pipeline_mode<synchronous>, transform_indices = @transform_1, window_bounds = array<i64: 288, 64>}, {pipeline_mode = #tpu.pipeline_mode<synchronous>, transform_indices = @transform_2, window_bounds = array<i64: 1, 64>}, {transform_indices = @transform_3, window_bounds = array<i64: 98, 64>}]} {
    %c0 = arith.constant 0 : index
    %c0_0 = arith.constant 0 : index
    %0 = vector.load %arg2[%c0, %c0_0] : memref<288x64xbf16, #tpu.memory_space<vmem>>, vector<288x64xbf16>
    %c0_1 = arith.constant 0 : index
    %c0_2 = arith.constant 0 : index
    %c0_3 = arith.constant 0 : index
    %1 = vector.load %arg1[%c0_1, %c0_2, %c0_3] : memref<4x98x288xbf16, #tpu.memory_space<vmem>>, vector<1x98x288xbf16>
    %2 = vector.shape_cast %1 : vector<1x98x288xbf16> to vector<98x288xbf16>
    %cst = arith.constant dense<0.000000e+00> : vector<98x64xf32>
    %3 = tpu.matmul %2, %0, %cst {dimension_numbers = #tpu.dot_dimension_numbers<[1], [0], [0], [1], [0, 0, 1, 1], [], []>} : vector<98x288xbf16>, vector<288x64xbf16>, vector<98x64xf32> -> vector<98x64xf32>
    %c1 = arith.constant 1 : index
    %c0_4 = arith.constant 0 : index
    %c0_5 = arith.constant 0 : index
    %4 = vector.load %arg1[%c1, %c0_4, %c0_5] : memref<4x98x288xbf16, #tpu.memory_space<vmem>>, vector<1x98x288xbf16>
    %5 = vector.shape_cast %4 : vector<1x98x288xbf16> to vector<98x288xbf16>
    %cst_6 = arith.constant dense<0.000000e+00> : vector<98x64xf32>
    %6 = tpu.matmul %5, %0, %cst_6 {dimension_numbers = #tpu.dot_dimension_numbers<[1], [0], [0], [1], [0, 0, 1, 1], [], []>} : vector<98x288xbf16>, vector<288x64xbf16>, vector<98x64xf32> -> vector<98x64xf32>
    %7 = arith.maximumf %3, %6 : vector<98x64xf32>
    %c2 = arith.constant 2 : index
    %c0_7 = arith.constant 0 : index
    %c0_8 = arith.constant 0 : index
    %8 = vector.load %arg1[%c2, %c0_7, %c0_8] : memref<4x98x288xbf16, #tpu.memory_space<vmem>>, vector<1x98x288xbf16>
    %9 = vector.shape_cast %8 : vector<1x98x288xbf16> to vector<98x288xbf16>
    %cst_9 = arith.constant dense<0.000000e+00> : vector<98x64xf32>
    %10 = tpu.matmul %9, %0, %cst_9 {dimension_numbers = #tpu.dot_dimension_numbers<[1], [0], [0], [1], [0, 0, 1, 1], [], []>} : vector<98x288xbf16>, vector<288x64xbf16>, vector<98x64xf32> -> vector<98x64xf32>
    %11 = arith.maximumf %7, %10 : vector<98x64xf32>
    %c3 = arith.constant 3 : index
    %c0_10 = arith.constant 0 : index
    %c0_11 = arith.constant 0 : index
    %12 = vector.load %arg1[%c3, %c0_10, %c0_11] : memref<4x98x288xbf16, #tpu.memory_space<vmem>>, vector<1x98x288xbf16>
    %13 = vector.shape_cast %12 : vector<1x98x288xbf16> to vector<98x288xbf16>
    %cst_12 = arith.constant dense<0.000000e+00> : vector<98x64xf32>
    %14 = tpu.matmul %13, %0, %cst_12 {dimension_numbers = #tpu.dot_dimension_numbers<[1], [0], [0], [1], [0, 0, 1, 1], [], []>} : vector<98x288xbf16>, vector<288x64xbf16>, vector<98x64xf32> -> vector<98x64xf32>
    %15 = arith.maximumf %11, %14 : vector<98x64xf32>
    %c0_13 = arith.constant 0 : index
    %c0_14 = arith.constant 0 : index
    %16 = vector.load %arg3[%c0_13, %c0_14] : memref<1x64xf32, #tpu.memory_space<vmem>>, vector<1x64xf32>
    %17 = vector.broadcast %16 : vector<1x64xf32> to vector<98x64xf32>
    %18 = arith.addf %15, %17 : vector<98x64xf32>
    %cst_15 = arith.constant 0.000000e+00 : f32
    %19 = vector.broadcast %cst_15 : f32 to vector<98x64xf32>
    %20 = arith.cmpf oge, %18, %19 : vector<98x64xf32>
    %cst_16 = arith.constant 1.000000e-01 : f32
    %21 = vector.broadcast %cst_16 : f32 to vector<98x64xf32>
    %22 = arith.mulf %21, %18 : vector<98x64xf32>
    %23 = arith.select %20, %18, %22 : vector<98x64xi1>, vector<98x64xf32>
    %24 = arith.truncf %23 : vector<98x64xf32> to vector<98x64xbf16>
    %c0_17 = arith.constant 0 : index
    %c0_18 = arith.constant 0 : index
    %25 = vector.load %arg4[%c0_17, %c0_18] : memref<98x64xbf16, #tpu.memory_space<vmem>>, vector<98x64xbf16>
    tpu.vector_store %arg4[%c0_17, %c0_18], %24 {strides = array<i32>} : memref<98x64xbf16, #tpu.memory_space<vmem>>, vector<98x64xbf16>,
    return
  }
  func.func @transform_0(%arg0: i32) -> (i32, i32, i32) {
    %c0_i32 = arith.constant 0 : i32
    %c0_i32_0 = arith.constant 0 : i32
    %c0_i32_1 = arith.constant 0 : i32
    return %c0_i32, %arg0, %c0_i32_0 : i32, i32, i32
  }
  func.func @transform_1(%arg0: i32) -> (i32, i32) {
    %c0_i32 = arith.constant 0 : i32
    %c0_i32_0 = arith.constant 0 : i32
    %c0_i32_1 = arith.constant 0 : i32
    return %c0_i32, %c0_i32_0 : i32, i32
  }
  func.func @transform_2(%arg0: i32) -> (i32, i32) {
    %c0_i32 = arith.constant 0 : i32
    %c0_i32_0 = arith.constant 0 : i32
    %c0_i32_1 = arith.constant 0 : i32
    return %c0_i32, %c0_i32_0 : i32, i32
  }
  func.func @transform_3(%arg0: i32) -> (i32, i32) {
    %c0_i32 = arith.constant 0 : i32
    %c0_i32_0 = arith.constant 0 : i32
    return %arg0, %c0_i32 : i32, i32
  }
}

module attributes {stable_mosaic.version = 11 : i64} {
  func.func @_conv_bn_lrelu_pool_kernel(%arg0: i32, %arg1: memref<4x18x576xbf16, #tpu.memory_space<vmem>>, %arg2: memref<576x128xbf16, #tpu.memory_space<vmem>>, %arg3: memref<1x128xf32, #tpu.memory_space<vmem>>, %arg4: memref<18x128xbf16, #tpu.memory_space<vmem>>) attributes {dimension_semantics = [#tpu.dimension_semantics<parallel>], iteration_bounds = array<i64: 1>, scalar_prefetch = 0 : i64, scratch_operands = 0 : i64, tpu.core_type = #tpu.core_type<tc>, window_params = [{transform_indices = @transform_0, window_bounds = array<i64: 4, 18, 576>}, {pipeline_mode = #tpu.pipeline_mode<synchronous>, transform_indices = @transform_1, window_bounds = array<i64: 576, 128>}, {pipeline_mode = #tpu.pipeline_mode<synchronous>, transform_indices = @transform_2, window_bounds = array<i64: 1, 128>}, {transform_indices = @transform_3, window_bounds = array<i64: 18, 128>}]} {
    %c0 = arith.constant 0 : index
    %c0_0 = arith.constant 0 : index
    %0 = vector.load %arg2[%c0, %c0_0] : memref<576x128xbf16, #tpu.memory_space<vmem>>, vector<576x128xbf16>
    %c0_1 = arith.constant 0 : index
    %c0_2 = arith.constant 0 : index
    %c0_3 = arith.constant 0 : index
    %1 = vector.load %arg1[%c0_1, %c0_2, %c0_3] : memref<4x18x576xbf16, #tpu.memory_space<vmem>>, vector<1x18x576xbf16>
    %2 = vector.shape_cast %1 : vector<1x18x576xbf16> to vector<18x576xbf16>
    %cst = arith.constant dense<0.000000e+00> : vector<18x128xf32>
    %3 = tpu.matmul %2, %0, %cst {dimension_numbers = #tpu.dot_dimension_numbers<[1], [0], [0], [1], [0, 0, 1, 1], [], []>} : vector<18x576xbf16>, vector<576x128xbf16>, vector<18x128xf32> -> vector<18x128xf32>
    %c1 = arith.constant 1 : index
    %c0_4 = arith.constant 0 : index
    %c0_5 = arith.constant 0 : index
    %4 = vector.load %arg1[%c1, %c0_4, %c0_5] : memref<4x18x576xbf16, #tpu.memory_space<vmem>>, vector<1x18x576xbf16>
    %5 = vector.shape_cast %4 : vector<1x18x576xbf16> to vector<18x576xbf16>
    %cst_6 = arith.constant dense<0.000000e+00> : vector<18x128xf32>
    %6 = tpu.matmul %5, %0, %cst_6 {dimension_numbers = #tpu.dot_dimension_numbers<[1], [0], [0], [1], [0, 0, 1, 1], [], []>} : vector<18x576xbf16>, vector<576x128xbf16>, vector<18x128xf32> -> vector<18x128xf32>
    %7 = arith.maximumf %3, %6 : vector<18x128xf32>
    %c2 = arith.constant 2 : index
    %c0_7 = arith.constant 0 : index
    %c0_8 = arith.constant 0 : index
    %8 = vector.load %arg1[%c2, %c0_7, %c0_8] : memref<4x18x576xbf16, #tpu.memory_space<vmem>>, vector<1x18x576xbf16>
    %9 = vector.shape_cast %8 : vector<1x18x576xbf16> to vector<18x576xbf16>
    %cst_9 = arith.constant dense<0.000000e+00> : vector<18x128xf32>
    %10 = tpu.matmul %9, %0, %cst_9 {dimension_numbers = #tpu.dot_dimension_numbers<[1], [0], [0], [1], [0, 0, 1, 1], [], []>} : vector<18x576xbf16>, vector<576x128xbf16>, vector<18x128xf32> -> vector<18x128xf32>
    %11 = arith.maximumf %7, %10 : vector<18x128xf32>
    %c3 = arith.constant 3 : index
    %c0_10 = arith.constant 0 : index
    %c0_11 = arith.constant 0 : index
    %12 = vector.load %arg1[%c3, %c0_10, %c0_11] : memref<4x18x576xbf16, #tpu.memory_space<vmem>>, vector<1x18x576xbf16>
    %13 = vector.shape_cast %12 : vector<1x18x576xbf16> to vector<18x576xbf16>
    %cst_12 = arith.constant dense<0.000000e+00> : vector<18x128xf32>
    %14 = tpu.matmul %13, %0, %cst_12 {dimension_numbers = #tpu.dot_dimension_numbers<[1], [0], [0], [1], [0, 0, 1, 1], [], []>} : vector<18x576xbf16>, vector<576x128xbf16>, vector<18x128xf32> -> vector<18x128xf32>
    %15 = arith.maximumf %11, %14 : vector<18x128xf32>
    %c0_13 = arith.constant 0 : index
    %c0_14 = arith.constant 0 : index
    %16 = vector.load %arg3[%c0_13, %c0_14] : memref<1x128xf32, #tpu.memory_space<vmem>>, vector<1x128xf32>
    %17 = vector.broadcast %16 : vector<1x128xf32> to vector<18x128xf32>
    %18 = arith.addf %15, %17 : vector<18x128xf32>
    %cst_15 = arith.constant 0.000000e+00 : f32
    %19 = vector.broadcast %cst_15 : f32 to vector<18x128xf32>
    %20 = arith.cmpf oge, %18, %19 : vector<18x128xf32>
    %cst_16 = arith.constant 1.000000e-01 : f32
    %21 = vector.broadcast %cst_16 : f32 to vector<18x128xf32>
    %22 = arith.mulf %21, %18 : vector<18x128xf32>
    %23 = arith.select %20, %18, %22 : vector<18x128xi1>, vector<18x128xf32>
    %24 = arith.truncf %23 : vector<18x128xf32> to vector<18x128xbf16>
    %c0_17 = arith.constant 0 : index
    %c0_18 = arith.constant 0 : index
    %25 = vector.load %arg4[%c0_17, %c0_18] : memref<18x128xbf16, #tpu.memory_space<vmem>>, vector<18x128xbf16>
    tpu.vector_store %arg4[%c0_17, %c0_18], %24 {strides = array<i32>} : memref<18x128xbf16, #tpu.memory_space<vmem>>, vector<18x128xbf16>,
    return
  }
  func.func @transform_0(%arg0: i32) -> (i32, i32, i32) {
    %c0_i32 = arith.constant 0 : i32
    %c0_i32_0 = arith.constant 0 : i32
    %c0_i32_1 = arith.constant 0 : i32
    return %c0_i32, %arg0, %c0_i32_0 : i32, i32, i32
  }
  func.func @transform_1(%arg0: i32) -> (i32, i32) {
    %c0_i32 = arith.constant 0 : i32
    %c0_i32_0 = arith.constant 0 : i32
    %c0_i32_1 = arith.constant 0 : i32
    return %c0_i32, %c0_i32_0 : i32, i32
  }
  func.func @transform_2(%arg0: i32) -> (i32, i32) {
    %c0_i32 = arith.constant 0 : i32
    %c0_i32_0 = arith.constant 0 : i32
    %c0_i32_1 = arith.constant 0 : i32
    return %c0_i32, %c0_i32_0 : i32, i32
  }
  func.func @transform_3(%arg0: i32) -> (i32, i32) {
    %c0_i32 = arith.constant 0 : i32
    %c0_i32_0 = arith.constant 0 : i32
    return %arg0, %c0_i32 : i32, i32
  }
}

module attributes {stable_mosaic.version = 11 : i64} {
  func.func @_fc_head_kernel(%arg0: memref<2x1152xbf16, #tpu.memory_space<vmem>>, %arg1: memref<1152x128xbf16, #tpu.memory_space<vmem>>, %arg2: memref<1x128xf32, #tpu.memory_space<vmem>>, %arg3: memref<128x128xbf16, #tpu.memory_space<vmem>>, %arg4: memref<1x128xf32, #tpu.memory_space<vmem>>, %arg5: memref<2x128xf32, #tpu.memory_space<vmem>>) attributes {dimension_semantics = [], scalar_prefetch = 0 : i64, scratch_operands = 0 : i64, tpu.core_type = #tpu.core_type<tc>} {
    %c0 = arith.constant 0 : index
    %c0_0 = arith.constant 0 : index
    %0 = vector.load %arg0[%c0, %c0_0] : memref<2x1152xbf16, #tpu.memory_space<vmem>>, vector<2x1152xbf16>
    %c0_1 = arith.constant 0 : index
    %c0_2 = arith.constant 0 : index
    %1 = vector.load %arg1[%c0_1, %c0_2] : memref<1152x128xbf16, #tpu.memory_space<vmem>>, vector<1152x128xbf16>
    %cst = arith.constant dense<0.000000e+00> : vector<2x128xf32>
    %2 = tpu.matmul %0, %1, %cst {dimension_numbers = #tpu.dot_dimension_numbers<[1], [0], [0], [1], [0, 0, 1, 1], [], []>} : vector<2x1152xbf16>, vector<1152x128xbf16>, vector<2x128xf32> -> vector<2x128xf32>
    %c0_3 = arith.constant 0 : index
    %c0_4 = arith.constant 0 : index
    %3 = vector.load %arg2[%c0_3, %c0_4] : memref<1x128xf32, #tpu.memory_space<vmem>>, vector<1x128xf32>
    %4 = vector.broadcast %3 : vector<1x128xf32> to vector<2x128xf32>
    %5 = arith.addf %2, %4 : vector<2x128xf32>
    %cst_5 = arith.constant 0.000000e+00 : f32
    %6 = vector.broadcast %cst_5 : f32 to vector<2x128xf32>
    %7 = arith.cmpf oge, %5, %6 : vector<2x128xf32>
    %cst_6 = arith.constant 1.000000e-01 : f32
    %8 = vector.broadcast %cst_6 : f32 to vector<2x128xf32>
    %9 = arith.mulf %8, %5 : vector<2x128xf32>
    %10 = arith.select %7, %5, %9 : vector<2x128xi1>, vector<2x128xf32>
    %11 = arith.truncf %10 : vector<2x128xf32> to vector<2x128xbf16>
    %c0_7 = arith.constant 0 : index
    %c0_8 = arith.constant 0 : index
    %12 = vector.load %arg3[%c0_7, %c0_8] : memref<128x128xbf16, #tpu.memory_space<vmem>>, vector<128x128xbf16>
    %cst_9 = arith.constant dense<0.000000e+00> : vector<2x128xf32>
    %13 = tpu.matmul %11, %12, %cst_9 {dimension_numbers = #tpu.dot_dimension_numbers<[1], [0], [0], [1], [0, 0, 1, 1], [], []>} : vector<2x128xbf16>, vector<128x128xbf16>, vector<2x128xf32> -> vector<2x128xf32>
    %c0_10 = arith.constant 0 : index
    %c0_11 = arith.constant 0 : index
    %14 = vector.load %arg4[%c0_10, %c0_11] : memref<1x128xf32, #tpu.memory_space<vmem>>, vector<1x128xf32>
    %15 = vector.broadcast %14 : vector<1x128xf32> to vector<2x128xf32>
    %16 = arith.addf %13, %15 : vector<2x128xf32>
    %c0_12 = arith.constant 0 : index
    %c0_13 = arith.constant 0 : index
    %17 = vector.load %arg5[%c0_12, %c0_13] : memref<2x128xf32, #tpu.memory_space<vmem>>, vector<2x128xf32>
    tpu.vector_store %arg5[%c0_12, %c0_13], %16 {strides = array<i32>} : memref<2x128xf32, #tpu.memory_space<vmem>>, vector<2x128xf32>,
    return
  }
}

</mosaic_0001>

<bundles_post_ra>
// kernel: cnn_forward.4
= control target key start
LH: loop header
LB: loop body
LE: loop exit
PB: predicated region body
PF: predicated region fallthrough
CT: control target
= control target key end

     0   :  { %v4738_v0 = vmov 0.0   ;;  %vm3461_vm0 = vmmov 0   ;;  %vm2345_vm2 = vcmask 257024   ;;  %s4734_s1 = inlined_call_operand.vmem [shape: bf16[128,32], index: 1, kind: input, shape index: {}]   ;;  %s4735_s0 = inlined_call_operand.vmem [shape: bf16[4,392,128], index: 0, kind: input, shape index: {}]   ;;  %s4736_s2 = inlined_call_operand.vmem [shape: f32[1,32], index: 2, kind: input, shape index: {}]   ;;  %s4737_s3 = inlined_call_operand.vmem [shape: bf16[392,32], index: 3, kind: output, shape index: {}]  }
   0x1   :  { %2885 = vmatprep.subr.bf16.mxu0 %v4738_v0  ;;  %3001 = vmatprep.subr.bf16.mxu1 %v4738_v0  ;;  %v3351_v1 = vld [vmem:[%s4734_s1] sm:$0xff]   ;;  %v3352_v2 = vld [vmem:[%s4734_s1 + $0x8] sm:$0xff]   ;;  %v3353_v3 = vld [vmem:[%s4734_s1 + $0x10] sm:$0xff]  }
   0x2   :  { %2901 = vmatprep.mubr.msk.bf16.mxu0 %vm3461_vm0, %v4738_v0  ;;  %3017 = vmatprep.mubr.msk.bf16.mxu1 %vm3461_vm0, %v4738_v0  ;;  %v3354_v4 = vld [vmem:[%s4734_s1 + $0x18] sm:$0xff]   ;;  %v3355_v5 = vld [vmem:[%s4734_s1 + $0x20] sm:$0xff]   ;;  %v3356_v6 = vld [vmem:[%s4734_s1 + $0x28] sm:$0xff]  }
   0x3   :  { %2886 = vmatpush3.bf16.msra.mxu0 %v3351_v1  ;;  %3002 = vmatpush3.bf16.msra.mxu1 %v3351_v1  ;;  %v3357_v7 = vld [vmem:[%s4734_s1 + $0x30] sm:$0xff]   ;;  %v3358_v8 = vld [vmem:[%s4734_s1 + $0x38] sm:$0xff]   ;;  %v3359_v9 = vld [vmem:[%s4735_s0] sm:$0xff]  }
   0x4   :  { %2887 = vmatprep.subr.bf16.mxu0 %v4738_v0  ;;  %3003 = vmatprep.subr.bf16.mxu1 %v4738_v0  ;;  %v3360_v10 = vld [vmem:[%s4735_s0 + $0xc4] sm:$0xff]   ;;  %v3362_v12 = vld [vmem:[%s4735_s0 + $0xcc] sm:$0xff]   ;;  %v3364_v14 = vld [vmem:[%s4735_s0 + $0xd4] sm:$0xff]  }
   0x5   :  { %v3361_v11 = vld [vmem:[%s4735_s0 + $0x8] sm:$0xff]   ;;  %v3363_v13 = vld [vmem:[%s4735_s0 + $0x10] sm:$0xff]   ;;  %v3365_v15 = vld [vmem:[%s4735_s0 + $0x18] sm:$0xff]  }
   0x6   :  { %v3366_v16 = vld [vmem:[%s4735_s0 + $0xdc] sm:$0xff]   ;;  %v3368_v18 = vld [vmem:[%s4735_s0 + $0xe4] sm:$0xff]   ;;  %v3370_v20 = vld [vmem:[%s4735_s0 + $0xec] sm:$0xff]  }
   0x7   :  { %2888 = vmatpush3.bf16.msra.mxu0 %v3352_v2  ;;  %3004 = vmatpush3.bf16.msra.mxu1 %v3352_v2  ;;  %v3367_v17 = vld [vmem:[%s4735_s0 + $0x20] sm:$0xff]   ;;  %v3369_v19 = vld [vmem:[%s4735_s0 + $0x28] sm:$0xff]   ;;  %v3371_v21 = vld [vmem:[%s4735_s0 + $0x30] sm:$0xff]  }
   0x8   :  { %2889 = vmatprep.subr.bf16.mxu0 %v4738_v0  ;;  %3005 = vmatprep.subr.bf16.mxu1 %v4738_v0  ;;  %v3372_v22 = vld [vmem:[%s4735_s0 + $0xf4] sm:$0xff]   ;;  %v3374_v24 = vld [vmem:[%s4735_s0 + $0xfc] sm:$0xff]   ;;  %v3376_v26 = vld [vmem:[%s4735_s0 + $0x104] sm:$0xff]  }
   0x9   :  { %v3373_v23 = vld [vmem:[%s4735_s0 + $0x38] sm:$0xff]   ;;  %v3375_v25 = vld [vmem:[%s4735_s0 + $0x40] sm:$0xff]   ;;  %v3377_v27 = vld [vmem:[%s4735_s0 + $0x48] sm:$0xff]  }
   0xa   :  { %v3378_v28 = vld [vmem:[%s4735_s0 + $0x10c] sm:$0xff]   ;;  %v3380_v30 = vld [vmem:[%s4735_s0 + $0x114] sm:$0xff]   ;;  %v3382_v32 = vld [vmem:[%s4735_s0 + $0x11c] sm:$0xff]  }
   0xb   :  { %2890 = vmatpush3.bf16.msra.mxu0 %v3353_v3  ;;  %3006 = vmatpush3.bf16.msra.mxu1 %v3353_v3  ;;  %v3379_v29 = vld [vmem:[%s4735_s0 + $0x50] sm:$0xff]   ;;  %v3381_v31 = vld [vmem:[%s4735_s0 + $0x58] sm:$0xff]   ;;  %v3383_v33 = vld [vmem:[%s4735_s0 + $0x60] sm:$0xff]  }
   0xc   :  { %2891 = vmatprep.subr.bf16.mxu0 %v4738_v0  ;;  %3007 = vmatprep.subr.bf16.mxu1 %v4738_v0  ;;  %v3384_v34 = vld [vmem:[%s4735_s0 + $0x124] sm:$0xff]   ;;  %v3386_v36 = vld [vmem:[%s4735_s0 + $0x12c] sm:$0xff]   ;;  %v3388_v38 = vld [vmem:[%s4735_s0 + $0x134] sm:$0xff]  }
   0xd   :  { %v3385_v35 = vld [vmem:[%s4735_s0 + $0x68] sm:$0xff]   ;;  %v3387_v37 = vld [vmem:[%s4735_s0 + $0x70] sm:$0xff]   ;;  %v3389_v39 = vld [vmem:[%s4735_s0 + $0x78] sm:$0xff]  }
   0xe   :  { %v3390_v40 = vld [vmem:[%s4735_s0 + $0x13c] sm:$0xff]   ;;  %v3392_v42 = vld [vmem:[%s4735_s0 + $0x144] sm:$0xff]   ;;  %v3394_v44 = vld [vmem:[%s4735_s0 + $0x14c] sm:$0xff]  }
   0xf   :  { %2892 = vmatpush3.bf16.msra.mxu0 %v3354_v4  ;;  %3008 = vmatpush3.bf16.msra.mxu1 %v3354_v4  ;;  %v3391_v41 = vld [vmem:[%s4735_s0 + $0x80] sm:$0xff]   ;;  %v3393_v43 = vld [vmem:[%s4735_s0 + $0x88] sm:$0xff]   ;;  %v3395_v45 = vld [vmem:[%s4735_s0 + $0x90] sm:$0xff]  }
  0x10   :  { %2893 = vmatprep.subr.bf16.mxu0 %v4738_v0  ;;  %3009 = vmatprep.subr.bf16.mxu1 %v4738_v0  ;;  %v3396_v46 = vld [vmem:[%s4735_s0 + $0x154] sm:$0xff]   ;;  %v3398_v48 = vld [vmem:[%s4735_s0 + $0x15c] sm:$0xff]   ;;  %v3400_v50 = vld [vmem:[%s4735_s0 + $0x164] sm:$0xff]  }
  0x11   :  { %v3397_v47 = vld [vmem:[%s4735_s0 + $0x98] sm:$0xff]   ;;  %v3399_v49 = vld [vmem:[%s4735_s0 + $0xa0] sm:$0xff]   ;;  %v3401_v51 = vld [vmem:[%s4735_s0 + $0xa8] sm:$0xff]  }
  0x12   :  { %v3402_v52 = vld [vmem:[%s4735_s0 + $0x16c] sm:$0xff]   ;;  %v3404_v54 = vld [vmem:[%s4735_s0 + $0x174] sm:$0xff]   ;;  %v3406_v56 = vld [vmem:[%s4735_s0 + $0x17c] sm:$0xff]  }
  0x13   :  { %2894 = vmatpush3.bf16.msra.mxu0 %v3355_v5  ;;  %3010 = vmatpush3.bf16.msra.mxu1 %v3355_v5  ;;  %v3403_v53 = vld [vmem:[%s4735_s0 + $0xb0] sm:$0xff]   ;;  %v3405_v55 = vld [vmem:[%s4735_s0 + $0xb8] sm:$0xff]   ;;  %v3407_v57 = vld [vmem:[%s4735_s0 + $0xc0] ss:$0 sps:$4 sm:$0xff]  }
  0x14   :  { %2895 = vmatprep.subr.bf16.mxu0 %v4738_v0  ;;  %3011 = vmatprep.subr.bf16.mxu1 %v4738_v0  ;;  %v3408_v58 = vld [vmem:[%s4735_s0 + $0x184] ss:$0 sps:$4 sm:$0xff]   ;;  %v3409_v59 = vld [vmem:[%s4735_s0 + $0x188] sm:$0xff]   ;;  %v3411_v61 = vld [vmem:[%s4735_s0 + $0x190] sm:$0xff]  }
  0x15   :  { %v3410_v60 = vld [vmem:[%s4735_s0 + $0x24c] sm:$0xff]   ;;  %v3412_v62 = vld [vmem:[%s4735_s0 + $0x254] sm:$0xff]  }
  0x17   :  { %2896 = vmatpush3.bf16.msra.mxu0 %v3356_v6  ;;  %3012 = vmatpush3.bf16.msra.mxu1 %v3356_v6 }
  0x18   :  { %2897 = vmatprep.subr.bf16.mxu0 %v4738_v0  ;;  %3013 = vmatprep.subr.bf16.mxu1 %v4738_v0 }
  0x1b   :  { %2898 = vmatpush3.bf16.msra.mxu0 %v3357_v7  ;;  %3014 = vmatpush3.bf16.msra.mxu1 %v3357_v7 }
  0x1c   :  { %2899 = vmatprep.subr.bf16.mxu0 %v4738_v0  ;;  %3015 = vmatprep.subr.bf16.mxu1 %v4738_v0 }
  0x1f   :  { %2900 = vmatpush3.bf16.msra.mxu0 %v3358_v8  ;;  %3016 = vmatpush3.bf16.msra.mxu1 %v3358_v8 }
  0x20   :  { %3117 = vmatprep.subr.bf16.mxu0 %v4738_v0  ;;  %3233 = vmatprep.subr.bf16.mxu1 %v4738_v0 }
  0x22   :  { %2902 = vmatmul.mubr.bf16.vlgmr.msra.gmra.mrb[0].mxu0 %v3359_v9  ;;  %3018 = vmatmul.mubr.bf16.vlgmr.msra.gmra.mrb[0].mxu1 %v3360_v10 }
  0x23   :  { %3118 = vmatpush3.bf16.msra.mxu0 %v3351_v1  ;;  %3234 = vmatpush3.bf16.msra.mxu1 %v3351_v1 }
  0x24   :  { %2905 = vmatprep.mubr.msk.bf16.mxu0 %vm3461_vm0, %v4738_v0  ;;  %3021 = vmatprep.mubr.msk.bf16.mxu1 %vm3461_vm0, %v4738_v0 }
  0x25   :  { %3119 = vmatprep.subr.bf16.mxu0 %v4738_v0  ;;  %3235 = vmatprep.subr.bf16.mxu1 %v4738_v0 }
  0x27   :  { %3120 = vmatpush3.bf16.msra.mxu0 %v3352_v2  ;;  %3236 = vmatpush3.bf16.msra.mxu1 %v3352_v2 }
  0x28   :  { %3121 = vmatprep.subr.bf16.mxu0 %v4738_v0  ;;  %3237 = vmatprep.subr.bf16.mxu1 %v4738_v0 }
  0x2a   :  { %2906 = vmatmul.mubr.bf16.gmra.mrb[4].mxu0 %v3361_v11  ;;  %3022 = vmatmul.mubr.bf16.gmra.mrb[4].mxu1 %v3362_v12 }
  0x2b   :  { %2909 = vmatprep.mubr.msk.bf16.mxu0 %vm3461_vm0, %v4738_v0  ;;  %3025 = vmatprep.mubr.msk.bf16.mxu1 %vm3461_vm0, %v4738_v0 }
  0x2c   :  { %3122 = vmatpush3.bf16.msra.mxu0 %v3353_v3  ;;  %3238 = vmatpush3.bf16.msra.mxu1 %v3353_v3 }
  0x2d   :  { %3123 = vmatprep.subr.bf16.mxu0 %v4738_v0  ;;  %3239 = vmatprep.subr.bf16.mxu1 %v4738_v0 }
  0x30   :  { %3124 = vmatpush3.bf16.msra.mxu0 %v3354_v4  ;;  %3240 = vmatpush3.bf16.msra.mxu1 %v3354_v4 }
  0x31   :  { %3125 = vmatprep.subr.bf16.mxu0 %v4738_v0  ;;  %3241 = vmatprep.subr.bf16.mxu1 %v4738_v0 }
  0x32   :  { %2910 = vmatmul.mubr.bf16.gmra.mrb[8].mxu0 %v3363_v13  ;;  %3026 = vmatmul.mubr.bf16.gmra.mrb[8].mxu1 %v3364_v14 }
  0x33   :  { %2913 = vmatprep.mubr.msk.bf16.mxu0 %vm3461_vm0, %v4738_v0  ;;  %3029 = vmatprep.mubr.msk.bf16.mxu1 %vm3461_vm0, %v4738_v0 }
  0x34   :  { %3126 = vmatpush3.bf16.msra.mxu0 %v3355_v5  ;;  %3242 = vmatpush3.bf16.msra.mxu1 %v3355_v5  ;;  %v3413_v5 = vld [vmem:[%s4735_s0 + $0x198] sm:$0xff]  }
  0x35   :  { %3127 = vmatprep.subr.bf16.mxu0 %v4738_v0  ;;  %3243 = vmatprep.subr.bf16.mxu1 %v4738_v0 }
  0x38   :  { %3128 = vmatpush3.bf16.msra.mxu0 %v3356_v6  ;;  %3244 = vmatpush3.bf16.msra.mxu1 %v3356_v6  ;;  %v3414_v6 = vld [vmem:[%s4735_s0 + $0x25c] sm:$0xff]  }
  0x39   :  { %3129 = vmatprep.subr.bf16.mxu0 %v4738_v0  ;;  %3245 = vmatprep.subr.bf16.mxu1 %v4738_v0 }
  0x3a   :  { %2914 = vmatmul.mubr.bf16.gmra.mrb[12].mxu0 %v3365_v15  ;;  %3030 = vmatmul.mubr.bf16.gmra.mrb[12].mxu1 %v3366_v16 }
  0x3b   :  { %2917 = vmatprep.mubr.msk.bf16.mxu0 %vm3461_vm0, %v4738_v0  ;;  %3033 = vmatprep.mubr.msk.bf16.mxu1 %vm3461_vm0, %v4738_v0 }
  0x3c   :  { %3130 = vmatpush3.bf16.msra.mxu0 %v3357_v7  ;;  %3246 = vmatpush3.bf16.msra.mxu1 %v3357_v7 }
  0x3d   :  { %3131 = vmatprep.subr.bf16.mxu0 %v4738_v0  ;;  %3247 = vmatprep.subr.bf16.mxu1 %v4738_v0 }
  0x40   :  { %3132 = vmatpush3.bf16.msra.mxu0 %v3358_v8  ;;  %3248 = vmatpush3.bf16.msra.mxu1 %v3358_v8 }
  0x42   :  { %2918 = vmatmul.mubr.bf16.gmra.mrb[16].mxu0 %v3367_v17  ;;  %3034 = vmatmul.mubr.bf16.gmra.mrb[16].mxu1 %v3368_v18  ;;  %v3415_v17 = vld [vmem:[%s4735_s0 + $0x1a0] sm:$0xff]  }
  0x43   :  { %2921 = vmatprep.mubr.msk.bf16.mxu0 %vm3461_vm0, %v4738_v0  ;;  %3037 = vmatprep.mubr.msk.bf16.mxu1 %vm3461_vm0, %v4738_v0  ;;  %v3416_v18 = vld [vmem:[%s4735_s0 + $0x264] sm:$0xff]  }
  0x4a   :  { %2922 = vmatmul.mubr.bf16.gmra.mrb[20].mxu0 %v3369_v19  ;;  %3038 = vmatmul.mubr.bf16.gmra.mrb[20].mxu1 %v3370_v20 }
  0x4b   :  { %2925 = vmatprep.mubr.msk.bf16.mxu0 %vm3461_vm0, %v4738_v0  ;;  %3041 = vmatprep.mubr.msk.bf16.mxu1 %vm3461_vm0, %v4738_v0 }
  0x52   :  { %2926 = vmatmul.mubr.bf16.gmra.mrb[24].mxu0 %v3371_v21  ;;  %3042 = vmatmul.mubr.bf16.gmra.mrb[24].mxu1 %v3372_v22 }
  0x53   :  { %2929 = vmatprep.mubr.msk.bf16.mxu0 %vm3461_vm0, %v4738_v0  ;;  %3045 = vmatprep.mubr.msk.bf16.mxu1 %vm3461_vm0, %v4738_v0 }
  0x5a   :  { %2930 = vmatmul.mubr.bf16.gmra.mrb[28].mxu0 %v3373_v23  ;;  %3046 = vmatmul.mubr.bf16.gmra.mrb[28].mxu1 %v3374_v24 }
  0x5b   :  { %2933 = vmatprep.mubr.msk.bf16.mxu0 %vm3461_vm0, %v4738_v0  ;;  %3049 = vmatprep.mubr.msk.bf16.mxu1 %vm3461_vm0, %v4738_v0 }
  0x62   :  { %2934 = vmatmul.mubr.bf16.gmra.mrb[32].mxu0 %v3375_v25  ;;  %3050 = vmatmul.mubr.bf16.gmra.mrb[32].mxu1 %v3376_v26 }
  0x63   :  { %2937 = vmatprep.mubr.msk.bf16.mxu0 %vm3461_vm0, %v4738_v0  ;;  %3053 = vmatprep.mubr.msk.bf16.mxu1 %vm3461_vm0, %v4738_v0 }
  0x6a   :  { %2938 = vmatmul.mubr.bf16.gmra.mrb[36].mxu0 %v3377_v27  ;;  %3054 = vmatmul.mubr.bf16.gmra.mrb[36].mxu1 %v3378_v28 }
  0x6b   :  { %2941 = vmatprep.mubr.msk.bf16.mxu0 %vm3461_vm0, %v4738_v0  ;;  %3057 = vmatprep.mubr.msk.bf16.mxu1 %vm3461_vm0, %v4738_v0 }
  0x72   :  { %2942 = vmatmul.mubr.bf16.gmra.mrb[40].mxu0 %v3379_v29  ;;  %3058 = vmatmul.mubr.bf16.gmra.mrb[40].mxu1 %v3380_v30  ;;  %v3417_v29 = vld [vmem:[%s4735_s0 + $0x1a8] sm:$0xff]  }
  0x73   :  { %2945 = vmatprep.mubr.msk.bf16.mxu0 %vm3461_vm0, %v4738_v0  ;;  %3061 = vmatprep.mubr.msk.bf16.mxu1 %vm3461_vm0, %v4738_v0  ;;  %v3418_v30 = vld [vmem:[%s4735_s0 + $0x26c] sm:$0xff]  }
  0x7a   :  { %2946 = vmatmul.mubr.bf16.gmra.mrb[44].mxu0 %v3381_v31  ;;  %3062 = vmatmul.mubr.bf16.gmra.mrb[44].mxu1 %v3382_v32 }
  0x7b   :  { %2949 = vmatprep.mubr.msk.bf16.mxu0 %vm3461_vm0, %v4738_v0  ;;  %3065 = vmatprep.mubr.msk.bf16.mxu1 %vm3461_vm0, %v4738_v0 }
  0x82   :  { %2950 = vmatmul.mubr.bf16.gmra.mrb[48].mxu0 %v3383_v33  ;;  %3066 = vmatmul.mubr.bf16.gmra.mrb[48].mxu1 %v3384_v34 }
  0x83   :  { %2953 = vmatprep.mubr.msk.bf16.mxu0 %vm3461_vm0, %v4738_v0  ;;  %3069 = vmatprep.mubr.msk.bf16.mxu1 %vm3461_vm0, %v4738_v0 }
  0x8a   :  { %2954 = vmatmul.mubr.bf16.gmra.mrb[52].mxu0 %v3385_v35  ;;  %3070 = vmatmul.mubr.bf16.gmra.mrb[52].mxu1 %v3386_v36 }
  0x8b   :  { %2957 = vmatprep.mubr.msk.bf16.mxu0 %vm3461_vm0, %v4738_v0  ;;  %3073 = vmatprep.mubr.msk.bf16.mxu1 %vm3461_vm0, %v4738_v0 }
  0x92   :  { %2958 = vmatmul.mubr.bf16.gmra.mrb[56].mxu0 %v3387_v37  ;;  %3074 = vmatmul.mubr.bf16.gmra.mrb[56].mxu1 %v3388_v38 }
  0x93   :  { %2961 = vmatprep.mubr.msk.bf16.mxu0 %vm3461_vm0, %v4738_v0  ;;  %3077 = vmatprep.mubr.msk.bf16.mxu1 %vm3461_vm0, %v4738_v0 }
  0x9a   :  { %2962 = vmatmul.mubr.bf16.gmra.mrb[60].mxu0 %v3389_v39  ;;  %3078 = vmatmul.mubr.bf16.gmra.mrb[60].mxu1 %v3390_v40 }
  0x9b   :  { %2965 = vmatprep.mubr.msk.bf16.mxu0 %vm3461_vm0, %v4738_v0  ;;  %3081 = vmatprep.mubr.msk.bf16.mxu1 %vm3461_vm0, %v4738_v0 }
  0xa2   :  { %2966 = vmatmul.mubr.bf16.gmra.mrb[64].mxu0 %v3391_v41  ;;  %3082 = vmatmul.mubr.bf16.gmra.mrb[64].mxu1 %v3392_v42  ;;  %v3419_v41 = vld [vmem:[%s4735_s0 + $0x1b0] sm:$0xff]  }
  0xa3   :  { %2969 = vmatprep.mubr.msk.bf16.mxu0 %vm3461_vm0, %v4738_v0  ;;  %3085 = vmatprep.mubr.msk.bf16.mxu1 %vm3461_vm0, %v4738_v0  ;;  %v3420_v42 = vld [vmem:[%s4735_s0 + $0x274] sm:$0xff]  }
  0xaa   :  { %2970 = vmatmul.mubr.bf16.gmra.mrb[68].mxu0 %v3393_v43  ;;  %3086 = vmatmul.mubr.bf16.gmra.mrb[68].mxu1 %v3394_v44 }
  0xab   :  { %2973 = vmatprep.mubr.msk.bf16.mxu0 %vm3461_vm0, %v4738_v0  ;;  %3089 = vmatprep.mubr.msk.bf16.mxu1 %vm3461_vm0, %v4738_v0 }
  0xb2   :  { %2974 = vmatmul.mubr.bf16.gmra.mrb[72].mxu0 %v3395_v45  ;;  %3090 = vmatmul.mubr.bf16.gmra.mrb[72].mxu1 %v3396_v46 }
  0xb3   :  { %2977 = vmatprep.mubr.msk.bf16.mxu0 %vm3461_vm0, %v4738_v0  ;;  %3093 = vmatprep.mubr.msk.bf16.mxu1 %vm3461_vm0, %v4738_v0 }
  0xba   :  { %2978 = vmatmul.mubr.bf16.gmra.mrb[76].mxu0 %v3397_v47  ;;  %3094 = vmatmul.mubr.bf16.gmra.mrb[76].mxu1 %v3398_v48 }
  0xbb   :  { %2981 = vmatprep.mubr.msk.bf16.mxu0 %vm3461_vm0, %v4738_v0  ;;  %3097 = vmatprep.mubr.msk.bf16.mxu1 %vm3461_vm0, %v4738_v0 }
  0xc2   :  { %2982 = vmatmul.mubr.bf16.gmra.mrb[80].mxu0 %v3399_v49  ;;  %3098 = vmatmul.mubr.bf16.gmra.mrb[80].mxu1 %v3400_v50 }
  0xc3   :  { %2985 = vmatprep.mubr.msk.bf16.mxu0 %vm3461_vm0, %v4738_v0  ;;  %3101 = vmatprep.mubr.msk.bf16.mxu1 %vm3461_vm0, %v4738_v0 }
  0xca   :  { %2986 = vmatmul.mubr.bf16.gmra.mrb[84].mxu0 %v3401_v51  ;;  %3102 = vmatmul.mubr.bf16.gmra.mrb[84].mxu1 %v3402_v52 }
  0xcb   :  { %2989 = vmatprep.mubr.msk.bf16.mxu0 %vm3461_vm0, %v4738_v0  ;;  %3105 = vmatprep.mubr.msk.bf16.mxu1 %vm3461_vm0, %v4738_v0 }
  0xd2   :  { %2990 = vmatmul.mubr.bf16.gmra.mrb[88].mxu0 %v3403_v53  ;;  %3106 = vmatmul.mubr.bf16.gmra.mrb[88].mxu1 %v3404_v54  ;;  %v3421_v53 = vld [vmem:[%s4735_s0 + $0x1b8] sm:$0xff]  }
  0xd3   :  { %2993 = vmatprep.mubr.msk.bf16.mxu0 %vm3461_vm0, %v4738_v0  ;;  %3109 = vmatprep.mubr.msk.bf16.mxu1 %vm3461_vm0, %v4738_v0  ;;  %v3422_v54 = vld [vmem:[%s4735_s0 + $0x27c] sm:$0xff]  }
  0xda   :  { %2994 = vmatmul.mubr.bf16.gmra.mrb[92].mxu0 %v3405_v55  ;;  %3110 = vmatmul.mubr.bf16.gmra.mrb[92].mxu1 %v3406_v56 }
  0xdb   :  { %2997 = vmatprep.mubr.msk.bf16.mxu0 %vm3461_vm0, %v4738_v0  ;;  %3113 = vmatprep.mubr.msk.bf16.mxu1 %vm3461_vm0, %v4738_v0 }
  0xe2   :  { %2998 = vmatmul.mubr.bf16.gmra.mrb[96].mxu0 %v3407_v57  ;;  %3114 = vmatmul.mubr.bf16.gmra.mrb[96].mxu1 %v3408_v58 }
  0xe3   :  { %3133 = vmatprep.mubr.msk.bf16.mxu0 %vm3461_vm0, %v4738_v0  ;;  %3249 = vmatprep.mubr.msk.bf16.mxu1 %vm3461_vm0, %v4738_v0 }
  0xea   :  { %3134 = vmatmul.mubr.bf16.vlgmr.msra.gmra.mrb[100].mxu0 %v3409_v59  ;;  %3250 = vmatmul.mubr.bf16.vlgmr.msra.gmra.mrb[100].mxu1 %v3410_v60 }
  0xeb   :  { %3137 = vmatprep.mubr.msk.bf16.mxu0 %vm3461_vm0, %v4738_v0  ;;  %3253 = vmatprep.mubr.msk.bf16.mxu1 %vm3461_vm0, %v4738_v0 }
  0xf2   :  { %3138 = vmatmul.mubr.bf16.gmra.mrb[104].mxu0 %v3411_v61  ;;  %3254 = vmatmul.mubr.bf16.gmra.mrb[104].mxu1 %v3412_v62 }
  0xf3   :  { %3141 = vmatprep.mubr.msk.bf16.mxu0 %vm3461_vm0, %v4738_v0  ;;  %3257 = vmatprep.mubr.msk.bf16.mxu1 %vm3461_vm0, %v4738_v0 }
  0xf5   :  { %v3812_v63 = vpop.f32.mrb[0].mxu0  ;;  %v3814_v1 = vpop.f32.mrb[0].mxu1 }
  0xf6   :  { %v2903_v3 = vpop.f32.mrb[1].mxu0  ;;  %v3019_v4 = vpop.f32.mrb[1].mxu1 }
  0xf7   :  { %v3824_v7 = vpop.f32.mrb[2].mxu0  ;;  %v3826_v8 = vpop.f32.mrb[2].mxu1 }
  0xf8   :  { %v2904_v10 = vpop.f32.mrb[3].mxu0  ;;  %v3020_v11 = vpop.f32.mrb[3].mxu1 }
  0xfa   :  { %3142 = vmatmul.mubr.bf16.gmra.mrb[108].mxu0 %v3413_v5  ;;  %3258 = vmatmul.mubr.bf16.gmra.mrb[108].mxu1 %v3414_v6  ;;  %v3423_v5 = vld [vmem:[%s4735_s0 + $0x1c0] sm:$0xff]  }
  0xfb   :  { %3145 = vmatprep.mubr.msk.bf16.mxu0 %vm3461_vm0, %v4738_v0  ;;  %3261 = vmatprep.mubr.msk.bf16.mxu1 %vm3461_vm0, %v4738_v0  ;;  %v3424_v6 = vld [vmem:[%s4735_s0 + $0x284] sm:$0xff]  }
  0xfd   :  { %v3834_v12 = vpop.f32.mrb[4].mxu0  ;;  %v3836_v13 = vpop.f32.mrb[4].mxu1 }
  0xfe   :  { %v2907_v15 = vpop.f32.mrb[5].mxu0  ;;  %v3023_v16 = vpop.f32.mrb[5].mxu1 }
  0xff   :  { %v3846_v19 = vpop.f32.mrb[6].mxu0  ;;  %v3848_v20 = vpop.f32.mrb[6].mxu1 }
 0x100   :  { %v2908_v22 = vpop.f32.mrb[7].mxu0  ;;  %v3024_v23 = vpop.f32.mrb[7].mxu1 }
 0x102   :  { %3146 = vmatmul.mubr.bf16.gmra.mrb[112].mxu0 %v3415_v17  ;;  %3262 = vmatmul.mubr.bf16.gmra.mrb[112].mxu1 %v3416_v18 }
 0x103   :  { %3149 = vmatprep.mubr.msk.bf16.mxu0 %vm3461_vm0, %v4738_v0  ;;  %3265 = vmatprep.mubr.msk.bf16.mxu1 %vm3461_vm0, %v4738_v0 }
 0x105   :  { %v3856_v24 = vpop.f32.mrb[8].mxu0  ;;  %v3858_v25 = vpop.f32.mrb[8].mxu1 }
 0x106   :  { %v2911_v27 = vpop.f32.mrb[9].mxu0  ;;  %v3027_v28 = vpop.f32.mrb[9].mxu1 }
 0x107   :  { %v3868_v31 = vpop.f32.mrb[10].mxu0  ;;  %v3870_v32 = vpop.f32.mrb[10].mxu1 }
 0x108   :  { %v2912_v34 = vpop.f32.mrb[11].mxu0  ;;  %v3028_v35 = vpop.f32.mrb[11].mxu1 }
 0x10a   :  { %3150 = vmatmul.mubr.bf16.gmra.mrb[116].mxu0 %v3417_v29  ;;  %3266 = vmatmul.mubr.bf16.gmra.mrb[116].mxu1 %v3418_v30  ;;  %v3425_v29 = vld [vmem:[%s4735_s0 + $0x1c8] sm:$0xff]  }
 0x10b   :  { %3153 = vmatprep.mubr.msk.bf16.mxu0 %vm3461_vm0, %v4738_v0  ;;  %3269 = vmatprep.mubr.msk.bf16.mxu1 %vm3461_vm0, %v4738_v0  ;;  %v3426_v30 = vld [vmem:[%s4735_s0 + $0x28c] sm:$0xff]  }
 0x10d   :  { %v3878_v36 = vpop.f32.mrb[12].mxu0  ;;  %v3880_v37 = vpop.f32.mrb[12].mxu1 }
 0x10e   :  { %v2915_v39 = vpop.f32.mrb[13].mxu0  ;;  %v3031_v40 = vpop.f32.mrb[13].mxu1 }
 0x10f   :  { %v3890_v43 = vpop.f32.mrb[14].mxu0  ;;  %v3892_v44 = vpop.f32.mrb[14].mxu1 }
 0x110   :  { %v2916_v46 = vpop.f32.mrb[15].mxu0  ;;  %v3032_v47 = vpop.f32.mrb[15].mxu1 }
 0x112   :  { %3154 = vmatmul.mubr.bf16.gmra.mrb[120].mxu0 %v3419_v41  ;;  %3270 = vmatmul.mubr.bf16.gmra.mrb[120].mxu1 %v3420_v42 }
 0x113   :  { %3157 = vmatprep.mubr.msk.bf16.mxu0 %vm3461_vm0, %v4738_v0  ;;  %3273 = vmatprep.mubr.msk.bf16.mxu1 %vm3461_vm0, %v4738_v0 }
 0x115   :  { %v3900_v48 = vpop.f32.mrb[16].mxu0  ;;  %v3902_v49 = vpop.f32.mrb[16].mxu1 }
 0x116   :  { %v2919_v51 = vpop.f32.mrb[17].mxu0  ;;  %v3035_v52 = vpop.f32.mrb[17].mxu1 }
 0x117   :  { %v3912_v55 = vpop.f32.mrb[18].mxu0  ;;  %v3914_v56 = vpop.f32.mrb[18].mxu1 }
 0x118   :  { %v2920_v58 = vpop.f32.mrb[19].mxu0  ;;  %v3036_v59 = vpop.f32.mrb[19].mxu1 }
 0x11a   :  { %3158 = vmatmul.mubr.bf16.gmra.mrb[124].mxu0 %v3421_v53  ;;  %3274 = vmatmul.mubr.bf16.gmra.mrb[124].mxu1 %v3422_v54  ;;  %v3427_v53 = vld [vmem:[%s4735_s0 + $0x1d0] sm:$0xff]  }
 0x11b   :  { %3161 = vmatprep.mubr.msk.bf16.mxu0 %vm3461_vm0, %v4738_v0  ;;  %3277 = vmatprep.mubr.msk.bf16.mxu1 %vm3461_vm0, %v4738_v0  ;;  %v3428_v54 = vld [vmem:[%s4735_s0 + $0x294] sm:$0xff]  }
 0x11d   :  { %v3922_v60 = vpop.f32.mrb[20].mxu0  ;;  %v3924_v61 = vpop.f32.mrb[20].mxu1 }
 0x11e   :  { %v2923_v3 = vpop.f32.mrb[21].mxu0  ;;  %v3039_v4 = vpop.f32.mrb[21].mxu1 }
 0x11f   :  { %v3934_v10 = vpop.f32.mrb[22].mxu0  ;;  %v3936_v11 = vpop.f32.mrb[22].mxu1 }
 0x120   :  { %v2924_v16 = vpop.f32.mrb[23].mxu0  ;;  %v3040_v17 = vpop.f32.mrb[23].mxu1 }
 0x122   :  { %3162 = vmatmul.mubr.bf16.gmra.mrb[128].mxu0 %v3423_v5  ;;  %3278 = vmatmul.mubr.bf16.gmra.mrb[128].mxu1 %v3424_v6 }
 0x123   :  { %3165 = vmatprep.mubr.msk.bf16.mxu0 %vm3461_vm0, %v4738_v0  ;;  %3281 = vmatprep.mubr.msk.bf16.mxu1 %vm3461_vm0, %v4738_v0 }
 0x125   :  { %v3944_v18 = vpop.f32.mrb[24].mxu0  ;;  %v3946_v22 = vpop.f32.mrb[24].mxu1 }
 0x126   :  { %v2927_v27 = vpop.f32.mrb[25].mxu0  ;;  %v3043_v28 = vpop.f32.mrb[25].mxu1 }
 0x127   :  { %v3956_v34 = vpop.f32.mrb[26].mxu0  ;;  %v3958_v35 = vpop.f32.mrb[26].mxu1 }
 0x128   :  { %v2928_v40 = vpop.f32.mrb[27].mxu0  ;;  %v3044_v41 = vpop.f32.mrb[27].mxu1 }
 0x12a   :  { %3166 = vmatmul.mubr.bf16.gmra.mrb[132].mxu0 %v3425_v29  ;;  %3282 = vmatmul.mubr.bf16.gmra.mrb[132].mxu1 %v3426_v30  ;;  %v3429_v29 = vld [vmem:[%s4735_s0 + $0x1d8] sm:$0xff]  }
 0x12b   :  { %3169 = vmatprep.mubr.msk.bf16.mxu0 %vm3461_vm0, %v4738_v0  ;;  %3285 = vmatprep.mubr.msk.bf16.mxu1 %vm3461_vm0, %v4738_v0  ;;  %v3430_v30 = vld [vmem:[%s4735_s0 + $0x29c] sm:$0xff]  }
 0x12d   :  { %v3966_v42 = vpop.f32.mrb[28].mxu0  ;;  %v3968_v46 = vpop.f32.mrb[28].mxu1 }
 0x12e   :  { %v2931_v51 = vpop.f32.mrb[29].mxu0  ;;  %v3047_v52 = vpop.f32.mrb[29].mxu1 }
 0x12f   :  { %v3978_v58 = vpop.f32.mrb[30].mxu0  ;;  %v3980_v59 = vpop.f32.mrb[30].mxu1 }
 0x130   :  { %v2932_v4 = vpop.f32.mrb[31].mxu0  ;;  %v3048_v5 = vpop.f32.mrb[31].mxu1 }
 0x132   :  { %3170 = vmatmul.mubr.bf16.gmra.mrb[136].mxu0 %v3427_v53  ;;  %3286 = vmatmul.mubr.bf16.gmra.mrb[136].mxu1 %v3428_v54 }
 0x133   :  { %3173 = vmatprep.mubr.msk.bf16.mxu0 %vm3461_vm0, %v4738_v0  ;;  %3289 = vmatprep.mubr.msk.bf16.mxu1 %vm3461_vm0, %v4738_v0 }
 0x135   :  { %v3988_v6 = vpop.f32.mrb[32].mxu0  ;;  %v3990_v16 = vpop.f32.mrb[32].mxu1 }
 0x136   :  { %v2935_v27 = vpop.f32.mrb[33].mxu0  ;;  %v3051_v28 = vpop.f32.mrb[33].mxu1 }
 0x137   :  { %v4000_v40 = vpop.f32.mrb[34].mxu0  ;;  %v4002_v41 = vpop.f32.mrb[34].mxu1 }
 0x138   :  { %v2936_v52 = vpop.f32.mrb[35].mxu0  ;;  %v3052_v53 = vpop.f32.mrb[35].mxu1 }
 0x13a   :  { %3174 = vmatmul.mubr.bf16.gmra.mrb[140].mxu0 %v3429_v29  ;;  %3290 = vmatmul.mubr.bf16.gmra.mrb[140].mxu1 %v3430_v30  ;;  %v3431_v29 = vld [vmem:[%s4735_s0 + $0x1e0] sm:$0xff]  }
 0x13b   :  { %3177 = vmatprep.mubr.msk.bf16.mxu0 %vm3461_vm0, %v4738_v0  ;;  %3293 = vmatprep.mubr.msk.bf16.mxu1 %vm3461_vm0, %v4738_v0  ;;  %v3432_v30 = vld [vmem:[%s4735_s0 + $0x2a4] sm:$0xff]  }
 0x13d   :  { %v4010_v54 = vpop.f32.mrb[36].mxu0  ;;  %v4012_v4 = vpop.f32.mrb[36].mxu1 }
 0x13e   :  { %v2939_v27 = vpop.f32.mrb[37].mxu0  ;;  %v3055_v28 = vpop.f32.mrb[37].mxu1 }
 0x13f   :  { %v4022_v52 = vpop.f32.mrb[38].mxu0  ;;  %v4024_v53 = vpop.f32.mrb[38].mxu1 }
 0x140   :  { %v2940_v17 = vpop.f32.mrb[39].mxu0  ;;  %v3056_v3 = vpop.f32.mrb[39].mxu1 }
 0x141   :  { %v3433_v3 = vld [vmem:[%s4735_s0 + $0x1e8] sm:$0xff]  }
 0x142   :  { %3178 = vmatmul.mubr.bf16.gmra.mrb[144].mxu0 %v3431_v29  ;;  %3294 = vmatmul.mubr.bf16.gmra.mrb[144].mxu1 %v3432_v30  ;;  %v3434_v17 = vld [vmem:[%s4735_s0 + $0x2ac] sm:$0xff]  }
 0x143   :  { %3181 = vmatprep.mubr.msk.bf16.mxu0 %vm3461_vm0, %v4738_v0  ;;  %3297 = vmatprep.mubr.msk.bf16.mxu1 %vm3461_vm0, %v4738_v0 }
 0x145   :  { %v4032_v27 = vpop.f32.mrb[40].mxu0  ;;  %v4034_v28 = vpop.f32.mrb[40].mxu1 }
 0x146   :  { %v2943_v47 = vpop.f32.mrb[41].mxu0  ;;  %v3059_v39 = vpop.f32.mrb[41].mxu1 }
 0x147   :  { %v4044_v29 = vpop.f32.mrb[42].mxu0  ;;  %v4046_v30 = vpop.f32.mrb[42].mxu1 }
 0x148   :  { %v2944_v23 = vpop.f32.mrb[43].mxu0  ;;  %v3060_v15 = vpop.f32.mrb[43].mxu1 }
 0x149   :  { %v3435_v15 = vld [vmem:[%s4735_s0 + $0x1f0] sm:$0xff]  }
 0x14a   :  { %3182 = vmatmul.mubr.bf16.gmra.mrb[148].mxu0 %v3433_v3  ;;  %3298 = vmatmul.mubr.bf16.gmra.mrb[148].mxu1 %v3434_v17  ;;  %v3436_v23 = vld [vmem:[%s4735_s0 + $0x2b4] sm:$0xff]  }
 0x14b   :  { %3185 = vmatprep.mubr.msk.bf16.mxu0 %vm3461_vm0, %v4738_v0  ;;  %3301 = vmatprep.mubr.msk.bf16.mxu1 %vm3461_vm0, %v4738_v0 }
 0x14d   :  { %v4054_v39 = vpop.f32.mrb[44].mxu0  ;;  %v4056_v47 = vpop.f32.mrb[44].mxu1 }
 0x14e   :  { %v2947_v62 = vpop.f32.mrb[45].mxu0  ;;  %v3063_v57 = vpop.f32.mrb[45].mxu1 }
 0x14f   :  { %v4066_v3 = vpop.f32.mrb[46].mxu0  ;;  %v4068_v17 = vpop.f32.mrb[46].mxu1 }
 0x150   :  { %4791 = vst [vmem:[#allocation2_spill] sm:$0xff] %v4068_v17  ;;  %v2948_v50 = vpop.f32.mrb[47].mxu0  ;;  %v3064_v45 = vpop.f32.mrb[47].mxu1 }
 0x151   :  { %v3437_v45 = vld [vmem:[%s4735_s0 + $0x1f8] sm:$0xff]  }
 0x152   :  { %3186 = vmatmul.mubr.bf16.gmra.mrb[152].mxu0 %v3435_v15  ;;  %3302 = vmatmul.mubr.bf16.gmra.mrb[152].mxu1 %v3436_v23  ;;  %v3438_v50 = vld [vmem:[%s4735_s0 + $0x2bc] sm:$0xff]  }
 0x153   :  { %3189 = vmatprep.mubr.msk.bf16.mxu0 %vm3461_vm0, %v4738_v0  ;;  %3305 = vmatprep.mubr.msk.bf16.mxu1 %vm3461_vm0, %v4738_v0 }
 0x155   :  { %v4076_v57 = vpop.f32.mrb[48].mxu0  ;;  %v4078_v62 = vpop.f32.mrb[48].mxu1 }
 0x156   :  { %4792 = vst [vmem:[#allocation3_spill] sm:$0xff] %v4076_v57  ;;  %4793 = vst [vmem:[#allocation4_spill] sm:$0xff] %v4078_v62  ;;  %v2951_v38 = vpop.f32.mrb[49].mxu0  ;;  %v3067_v33 = vpop.f32.mrb[49].mxu1 }
 0x157   :  { %v4088_v15 = vpop.f32.mrb[50].mxu0  ;;  %v4090_v23 = vpop.f32.mrb[50].mxu1 }
 0x158   :  { %4794 = vst [vmem:[#allocation5_spill] sm:$0xff] %v4088_v15  ;;  %4795 = vst [vmem:[#allocation6_spill] sm:$0xff] %v4090_v23  ;;  %v2952_v26 = vpop.f32.mrb[51].mxu0  ;;  %v3068_v21 = vpop.f32.mrb[51].mxu1 }
 0x159   :  { %v3439_v21 = vld [vmem:[%s4735_s0 + $0x200] sm:$0xff]  }
 0x15a   :  { %3190 = vmatmul.mubr.bf16.gmra.mrb[156].mxu0 %v3437_v45  ;;  %3306 = vmatmul.mubr.bf16.gmra.mrb[156].mxu1 %v3438_v50  ;;  %v3440_v26 = vld [vmem:[%s4735_s0 + $0x2c4] sm:$0xff]  }
 0x15b   :  { %3193 = vmatprep.mubr.msk.bf16.mxu0 %vm3461_vm0, %v4738_v0  ;;  %3309 = vmatprep.mubr.msk.bf16.mxu1 %vm3461_vm0, %v4738_v0 }
 0x15d   :  { %v4098_v33 = vpop.f32.mrb[52].mxu0  ;;  %v4100_v38 = vpop.f32.mrb[52].mxu1 }
 0x15e   :  { %4796 = vst [vmem:[#allocation7_spill] sm:$0xff] %v4098_v33  ;;  %4797 = vst [vmem:[#allocation8_spill] sm:$0xff] %v4100_v38  ;;  %v2955_v14 = vpop.f32.mrb[53].mxu0  ;;  %v3071_v9 = vpop.f32.mrb[53].mxu1 }
 0x15f   :  { %v4110_v45 = vpop.f32.mrb[54].mxu0  ;;  %v4112_v50 = vpop.f32.mrb[54].mxu1  ;;  %v4800_v9 = vmov 0.0  }
 0x160   :  { %4798 = vst [vmem:[#allocation9_spill] sm:$0xff] %v4110_v45  ;;  %4799 = vst [vmem:[#allocation10_spill] sm:$0xff] %v4112_v50  ;;  %v2956_v2 = vpop.f32.mrb[55].mxu0  ;;  %v3072_v0 = vpop.f32.mrb[55].mxu1 }
 0x161   :  { %v3441_v0 = vld [vmem:[%s4735_s0 + $0x208] sm:$0xff]  }
 0x162   :  { %3194 = vmatmul.mubr.bf16.gmra.mrb[160].mxu0 %v3439_v21  ;;  %3310 = vmatmul.mubr.bf16.gmra.mrb[160].mxu1 %v3440_v26  ;;  %v3442_v2 = vld [vmem:[%s4735_s0 + $0x2cc] sm:$0xff]  }
 0x163   :  { %3197 = vmatprep.mubr.msk.bf16.mxu0 %vm3461_vm0, %v4800_v9  ;;  %3313 = vmatprep.mubr.msk.bf16.mxu1 %vm3461_vm0, %v4800_v9 }
 0x165   :  { %v4120_v14 = vpop.f32.mrb[56].mxu0  ;;  %v4122_v5 = vpop.f32.mrb[56].mxu1 }
 0x166   :  { %4801 = vst [vmem:[#allocation11_spill] sm:$0xff] %v4120_v14  ;;  %4802 = vst [vmem:[#allocation12_spill] sm:$0xff] %v4122_v5  ;;  %v2959_v33 = vpop.f32.mrb[57].mxu0  ;;  %v3075_v23 = vpop.f32.mrb[57].mxu1 }
 0x167   :  { %v4132_v21 = vpop.f32.mrb[58].mxu0  ;;  %v4134_v26 = vpop.f32.mrb[58].mxu1 }
 0x168   :  { %4803 = vst [vmem:[#allocation13_spill] sm:$0xff] %v4132_v21  ;;  %4804 = vst [vmem:[#allocation14_spill] sm:$0xff] %v4134_v26  ;;  %v2960_v50 = vpop.f32.mrb[59].mxu0  ;;  %v3076_v45 = vpop.f32.mrb[59].mxu1 }
 0x169   :  { %v3443_v45 = vld [vmem:[%s4735_s0 + $0x210] sm:$0xff]  }
 0x16a   :  { %3198 = vmatmul.mubr.bf16.gmra.mrb[164].mxu0 %v3441_v0  ;;  %3314 = vmatmul.mubr.bf16.gmra.mrb[164].mxu1 %v3442_v2  ;;  %v3444_v50 = vld [vmem:[%s4735_s0 + $0x2d4] sm:$0xff]  }
 0x16b   :  { %3201 = vmatprep.mubr.msk.bf16.mxu0 %vm3461_vm0, %v4800_v9  ;;  %3317 = vmatprep.mubr.msk.bf16.mxu1 %vm3461_vm0, %v4800_v9 }
 0x16d   :  { %v4142_v23 = vpop.f32.mrb[60].mxu0  ;;  %v4144_v33 = vpop.f32.mrb[60].mxu1 }
 0x16e   :  { %4805 = vst [vmem:[#allocation15_spill] sm:$0xff] %v4142_v23  ;;  %4806 = vst [vmem:[#allocation16_spill] sm:$0xff] %v4144_v33  ;;  %v2963_v5 = vpop.f32.mrb[61].mxu0  ;;  %v3079_v14 = vpop.f32.mrb[61].mxu1 }
 0x16f   :  { %v4154_v0 = vpop.f32.mrb[62].mxu0  ;;  %v4156_v2 = vpop.f32.mrb[62].mxu1 }
 0x170   :  { %4807 = vst [vmem:[#allocation17_spill] sm:$0xff] %v4154_v0  ;;  %4808 = vst [vmem:[#allocation18_spill] sm:$0xff] %v4156_v2  ;;  %v2964_v26 = vpop.f32.mrb[63].mxu0  ;;  %v3080_v21 = vpop.f32.mrb[63].mxu1 }
 0x171   :  { %v3445_v21 = vld [vmem:[%s4735_s0 + $0x218] sm:$0xff]  }
 0x172   :  { %3202 = vmatmul.mubr.bf16.gmra.mrb[168].mxu0 %v3443_v45  ;;  %3318 = vmatmul.mubr.bf16.gmra.mrb[168].mxu1 %v3444_v50  ;;  %v3446_v26 = vld [vmem:[%s4735_s0 + $0x2dc] sm:$0xff]  }
 0x173   :  { %3205 = vmatprep.mubr.msk.bf16.mxu0 %vm3461_vm0, %v4800_v9  ;;  %3321 = vmatprep.mubr.msk.bf16.mxu1 %vm3461_vm0, %v4800_v9 }
 0x175   :  { %v4164_v5 = vpop.f32.mrb[64].mxu0  ;;  %v4166_v14 = vpop.f32.mrb[64].mxu1 }
 0x176   :  { %4809 = vst [vmem:[#allocation19_spill] sm:$0xff] %v4164_v5  ;;  %4810 = vst [vmem:[#allocation20_spill] sm:$0xff] %v4166_v14  ;;  %v2967_v33 = vpop.f32.mrb[65].mxu0  ;;  %v3083_v23 = vpop.f32.mrb[65].mxu1 }
 0x177   :  { %v4176_v45 = vpop.f32.mrb[66].mxu0  ;;  %v4178_v50 = vpop.f32.mrb[66].mxu1 }
 0x178   :  { %4811 = vst [vmem:[#allocation21_spill] sm:$0xff] %v4176_v45  ;;  %4812 = vst [vmem:[#allocation22_spill] sm:$0xff] %v4178_v50  ;;  %v2968_v2 = vpop.f32.mrb[67].mxu0  ;;  %v3084_v0 = vpop.f32.mrb[67].mxu1 }
 0x179   :  { %v3447_v0 = vld [vmem:[%s4735_s0 + $0x220] sm:$0xff]  }
 0x17a   :  { %3206 = vmatmul.mubr.bf16.gmra.mrb[172].mxu0 %v3445_v21  ;;  %3322 = vmatmul.mubr.bf16.gmra.mrb[172].mxu1 %v3446_v26  ;;  %v3448_v2 = vld [vmem:[%s4735_s0 + $0x2e4] sm:$0xff]  }
 0x17b   :  { %3209 = vmatprep.mubr.msk.bf16.mxu0 %vm3461_vm0, %v4800_v9  ;;  %3325 = vmatprep.mubr.msk.bf16.mxu1 %vm3461_vm0, %v4800_v9 }
 0x17d   :  { %v4186_v23 = vpop.f32.mrb[68].mxu0  ;;  %v4188_v33 = vpop.f32.mrb[68].mxu1 }
 0x17e   :  { %4813 = vst [vmem:[#allocation23_spill] sm:$0xff] %v4186_v23  ;;  %4814 = vst [vmem:[#allocation24_spill] sm:$0xff] %v4188_v33  ;;  %v2971_v14 = vpop.f32.mrb[69].mxu0  ;;  %v3087_v5 = vpop.f32.mrb[69].mxu1 }
 0x17f   :  { %v4198_v21 = vpop.f32.mrb[70].mxu0  ;;  %v4200_v26 = vpop.f32.mrb[70].mxu1 }
 0x180   :  { %4815 = vst [vmem:[#allocation25_spill] sm:$0xff] %v4198_v21  ;;  %4816 = vst [vmem:[#allocation26_spill] sm:$0xff] %v4200_v26  ;;  %v2972_v50 = vpop.f32.mrb[71].mxu0  ;;  %v3088_v45 = vpop.f32.mrb[71].mxu1 }
 0x181   :  { %v3449_v45 = vld [vmem:[%s4735_s0 + $0x228] sm:$0xff]  }
 0x182   :  { %3210 = vmatmul.mubr.bf16.gmra.mrb[176].mxu0 %v3447_v0  ;;  %3326 = vmatmul.mubr.bf16.gmra.mrb[176].mxu1 %v3448_v2  ;;  %v3450_v50 = vld [vmem:[%s4735_s0 + $0x2ec] sm:$0xff]  }
 0x183   :  { %3213 = vmatprep.mubr.msk.bf16.mxu0 %vm3461_vm0, %v4800_v9  ;;  %3329 = vmatprep.mubr.msk.bf16.mxu1 %vm3461_vm0, %v4800_v9 }
 0x185   :  { %v4208_v5 = vpop.f32.mrb[72].mxu0  ;;  %v4210_v14 = vpop.f32.mrb[72].mxu1 }
 0x186   :  { %4817 = vst [vmem:[#allocation27_spill] sm:$0xff] %v4208_v5  ;;  %4818 = vst [vmem:[#allocation28_spill] sm:$0xff] %v4210_v14  ;;  %v2975_v33 = vpop.f32.mrb[73].mxu0  ;;  %v3091_v23 = vpop.f32.mrb[73].mxu1 }
 0x187   :  { %v4220_v0 = vpop.f32.mrb[74].mxu0  ;;  %v4222_v2 = vpop.f32.mrb[74].mxu1 }
 0x188   :  { %4819 = vst [vmem:[#allocation29_spill] sm:$0xff] %v4220_v0  ;;  %4820 = vst [vmem:[#allocation30_spill] sm:$0xff] %v4222_v2  ;;  %v2976_v26 = vpop.f32.mrb[75].mxu0  ;;  %v3092_v21 = vpop.f32.mrb[75].mxu1 }
 0x189   :  { %v3451_v21 = vld [vmem:[%s4735_s0 + $0x230] sm:$0xff]  }
 0x18a   :  { %3214 = vmatmul.mubr.bf16.gmra.mrb[180].mxu0 %v3449_v45  ;;  %3330 = vmatmul.mubr.bf16.gmra.mrb[180].mxu1 %v3450_v50  ;;  %v3452_v26 = vld [vmem:[%s4735_s0 + $0x2f4] sm:$0xff]  }
 0x18b   :  { %3217 = vmatprep.mubr.msk.bf16.mxu0 %vm3461_vm0, %v4800_v9  ;;  %3333 = vmatprep.mubr.msk.bf16.mxu1 %vm3461_vm0, %v4800_v9 }
 0x18d   :  { %v4230_v23 = vpop.f32.mrb[76].mxu0  ;;  %v4232_v33 = vpop.f32.mrb[76].mxu1 }
 0x18e   :  { %4821 = vst [vmem:[#allocation31_spill] sm:$0xff] %v4230_v23  ;;  %4822 = vst [vmem:[#allocation32_spill] sm:$0xff] %v4232_v33  ;;  %v2979_v14 = vpop.f32.mrb[77].mxu0  ;;  %v3095_v5 = vpop.f32.mrb[77].mxu1 }
 0x18f   :  { %v4242_v45 = vpop.f32.mrb[78].mxu0  ;;  %v4244_v50 = vpop.f32.mrb[78].mxu1 }
 0x190   :  { %4823 = vst [vmem:[#allocation33_spill] sm:$0xff] %v4242_v45  ;;  %4824 = vst [vmem:[#allocation34_spill] sm:$0xff] %v4244_v50  ;;  %v2980_v2 = vpop.f32.mrb[79].mxu0  ;;  %v3096_v0 = vpop.f32.mrb[79].mxu1 }
 0x191   :  { %v3453_v0 = vld [vmem:[%s4735_s0 + $0x238] sm:$0xff]  }
 0x192   :  { %3218 = vmatmul.mubr.bf16.gmra.mrb[184].mxu0 %v3451_v21  ;;  %3334 = vmatmul.mubr.bf16.gmra.mrb[184].mxu1 %v3452_v26  ;;  %v3454_v2 = vld [vmem:[%s4735_s0 + $0x2fc] sm:$0xff]  }
 0x193   :  { %3221 = vmatprep.mubr.msk.bf16.mxu0 %vm3461_vm0, %v4800_v9  ;;  %3337 = vmatprep.mubr.msk.bf16.mxu1 %vm3461_vm0, %v4800_v9 }
 0x195   :  { %v4252_v5 = vpop.f32.mrb[80].mxu0  ;;  %v4254_v14 = vpop.f32.mrb[80].mxu1 }
 0x196   :  { %4825 = vst [vmem:[#allocation35_spill] sm:$0xff] %v4252_v5  ;;  %4826 = vst [vmem:[#allocation36_spill] sm:$0xff] %v4254_v14  ;;  %v2983_v33 = vpop.f32.mrb[81].mxu0  ;;  %v3099_v23 = vpop.f32.mrb[81].mxu1 }
 0x197   :  { %v4264_v21 = vpop.f32.mrb[82].mxu0  ;;  %v4266_v26 = vpop.f32.mrb[82].mxu1 }
 0x198   :  { %4827 = vst [vmem:[#allocation37_spill] sm:$0xff] %v4264_v21  ;;  %4828 = vst [vmem:[#allocation38_spill] sm:$0xff] %v4266_v26  ;;  %v2984_v50 = vpop.f32.mrb[83].mxu0  ;;  %v3100_v45 = vpop.f32.mrb[83].mxu1 }
 0x199   :  { %v3455_v45 = vld [vmem:[%s4735_s0 + $0x240] sm:$0xff]  }
 0x19a   :  { %3222 = vmatmul.mubr.bf16.gmra.mrb[188].mxu0 %v3453_v0  ;;  %3338 = vmatmul.mubr.bf16.gmra.mrb[188].mxu1 %v3454_v2  ;;  %v3456_v50 = vld [vmem:[%s4735_s0 + $0x304] sm:$0xff]  }
 0x19b   :  { %3225 = vmatprep.mubr.msk.bf16.mxu0 %vm3461_vm0, %v4800_v9  ;;  %3341 = vmatprep.mubr.msk.bf16.mxu1 %vm3461_vm0, %v4800_v9 }
 0x19d   :  { %v4274_v23 = vpop.f32.mrb[84].mxu0  ;;  %v4276_v33 = vpop.f32.mrb[84].mxu1 }
 0x19e   :  { %4829 = vst [vmem:[#allocation39_spill] sm:$0xff] %v4274_v23  ;;  %4830 = vst [vmem:[#allocation40_spill] sm:$0xff] %v4276_v33  ;;  %v2987_v14 = vpop.f32.mrb[85].mxu0  ;;  %v3103_v5 = vpop.f32.mrb[85].mxu1 }
 0x19f   :  { %v4286_v0 = vpop.f32.mrb[86].mxu0  ;;  %v4288_v2 = vpop.f32.mrb[86].mxu1 }
 0x1a0   :  { %4831 = vst [vmem:[#allocation41_spill] sm:$0xff] %v4286_v0  ;;  %4832 = vst [vmem:[#allocation42_spill] sm:$0xff] %v4288_v2  ;;  %v2988_v26 = vpop.f32.mrb[87].mxu0  ;;  %v3104_v21 = vpop.f32.mrb[87].mxu1 }
 0x1a1   :  { %v3457_v21 = vld [vmem:[%s4735_s0 + $0x248] ss:$0 sps:$4 sm:$0xff]   ;;  %v3458_v26 = vld [vmem:[%s4735_s0 + $0x30c] ss:$0 sps:$4 sm:$0xff]  }
 0x1a2   :  { %3226 = vmatmul.mubr.bf16.gmra.mrb[192].mxu0 %v3455_v45  ;;  %3342 = vmatmul.mubr.bf16.gmra.mrb[192].mxu1 %v3456_v50  ;;  %v4843_v50 = vmax.f32 %v3812_v63, %v3814_v1 }
 0x1a3   :  { %3229 = vmatprep.mubr.msk.bf16.mxu0 %vm3461_vm0, %v4800_v9  ;;  %3345 = vmatprep.mubr.msk.bf16.mxu1 %vm3461_vm0, %v4800_v9 }
 0x1a5   :  { %v4296_v5 = vpop.f32.mrb[88].mxu0  ;;  %v4298_v14 = vpop.f32.mrb[88].mxu1 }
 0x1a6   :  { %4833 = vst [vmem:[#allocation43_spill] sm:$0xff] %v4296_v5  ;;  %4834 = vst [vmem:[#allocation44_spill] sm:$0xff] %v4298_v14  ;;  %v2991_v33 = vpop.f32.mrb[89].mxu0  ;;  %v3107_v23 = vpop.f32.mrb[89].mxu1 }
 0x1a7   :  { %v4308_v45 = vpop.f32.mrb[90].mxu0  ;;  %v4310_v9 = vpop.f32.mrb[90].mxu1 }
 0x1a8   :  { %4835 = vst [vmem:[#allocation45_spill] sm:$0xff] %v4308_v45  ;;  %4836 = vst [vmem:[#allocation46_spill] sm:$0xff] %v4310_v9  ;;  %v2992_v51 = vpop.f32.mrb[91].mxu0  ;;  %v3108_v2 = vpop.f32.mrb[91].mxu1 }
 0x1aa   :  { %3230 = vmatmul.mubr.bf16.gmra.mrb[196].mxu0 %v3457_v21  ;;  %3346 = vmatmul.mubr.bf16.gmra.mrb[196].mxu1 %v3458_v26 }
 0x1ad   :  { %v4314_v23 = vpop.f32.mrb[92].mxu0  ;;  %v4316_v33 = vpop.f32.mrb[92].mxu1 }
 0x1ae   :  { %4837 = vst [vmem:[#allocation47_spill] sm:$0xff] %v4314_v23  ;;  %4838 = vst [vmem:[#allocation48_spill] sm:$0xff] %v4316_v33  ;;  %v2995_v14 = vpop.f32.mrb[93].mxu0  ;;  %v3111_v5 = vpop.f32.mrb[93].mxu1 }
 0x1af   :  { %v4320_v0 = vpop.f32.mrb[94].mxu0  ;;  %v4322_v15 = vpop.f32.mrb[94].mxu1 }
 0x1b0   :  { %4839 = vst [vmem:[#allocation49_spill] sm:$0xff] %v4320_v0  ;;  %4840 = vst [vmem:[#allocation50_spill] sm:$0xff] %v4322_v15  ;;  %v2996_v51 = vpop.f32.mrb[95].mxu0  ;;  %v3112_v2 = vpop.f32.mrb[95].mxu1  ;;  %v4338_v0 = vld [vmem:[%s4736_s2] ss:$0 sm:$0xff] }
 0x1b5   :  { %v4326_v21 = vpop.f32.mrb[96].mxu0  ;;  %v4328_v26 = vpop.f32.mrb[96].mxu1 }
 0x1b6   :  { %4841 = vst [vmem:[#allocation51_spill] sm:$0xff] %v4326_v21  ;;  %4842 = vst [vmem:[#allocation52_spill] sm:$0xff] %v4328_v26  ;;  %v2999_v45 = vpop.f32.mrb[97].mxu0  ;;  %v3115_v38 = vpop.f32.mrb[97].mxu1 }
 0x1b7   :  { %v505_v14 = vpop.f32.mrb[98].mxu0  ;;  %v935_v5 = vpop.f32.mrb[98].mxu1 }
 0x1b8   :  { %v3000_v33 = vpop.f32.mrb[99].mxu0  ;;  %v3116_v23 = vpop.f32.mrb[99].mxu1 }
 0x1b9   :  { %v4844_v33 = vmax.f32 %v3824_v7, %v3826_v8 }
 0x1bd   :  { %v1219_v62 = vpop.f32.mrb[100].mxu0  ;;  %v1698_v57 = vpop.f32.mrb[100].mxu1 }
 0x1be   :  { %v1417_v51 = vmax.f32 %v4843_v50, %v1219_v62  ;;  %v3135_v2 = vpop.f32.mrb[101].mxu0  ;;  %v3251_v15 = vpop.f32.mrb[101].mxu1 }
 0x1bf   :  { %v1222_v9 = vpop.f32.mrb[102].mxu0  ;;  %v1701_v45 = vpop.f32.mrb[102].mxu1 }
 0x1c0   :  { %v1896_v38 = vmax.f32 %v1417_v51, %v1698_v57  ;;  %v1418_v23 = vmax.f32 %v4844_v33, %v1222_v9  ;;  %v3136_v14 = vpop.f32.mrb[103].mxu0  ;;  %v3252_v5 = vpop.f32.mrb[103].mxu1  ;;  %v4845_v57 = vmax.f32 %v3834_v12, %v3836_v13 }
 0x1c1   :  { %v4846_v14 = vmax.f32 %v3846_v19, %v3848_v20 }
 0x1c2   :  { %v1952_v26 = vadd.f32 %v4338_v0, %v1896_v38  ;;  %v1897_v63 = vmax.f32 %v1418_v23, %v1701_v45 }
 0x1c4   :  { %vm2001_vm1 = vcmp.ge.f32.partialorder %v1952_v26, 0.0  ;;  %v2050_v1 = vmul.f32 0.1, %v1952_v26  ;;  %v1953_v62 = vadd.f32 %v4338_v0, %v1897_v63 }
 0x1c5   :  { %v1227_v15 = vpop.f32.mrb[104].mxu0  ;;  %v1706_v50 = vpop.f32.mrb[104].mxu1 }
 0x1c6   :  { %v2099_v2 = vsel %vm2001_vm1, %v1952_v26, %v2050_v1  ;;  %vm2002_vm3 = vcmp.ge.f32.partialorder %v1953_v62, 0.0  ;;  %v2051_v21 = vmul.f32 0.1, %v1953_v62  ;;  %v1419_v7 = vmax.f32 %v4845_v57, %v1227_v15  ;;  %v3139_v8 = vpop.f32.mrb[105].mxu0  ;;  %v3255_v9 = vpop.f32.mrb[105].mxu1 }
 0x1c7   :  { %v2704_v51 = vpack.c.bf16 %v2099_v2, %v2099_v2  ;;  %v1230_v33 = vpop.f32.mrb[106].mxu0  ;;  %v1709_v38 = vpop.f32.mrb[106].mxu1  ;;  %v4847_v15 = vmax.f32 %v3856_v24, %v3858_v25 }
 0x1c8   :  { %v2100_v45 = vsel %vm2002_vm3, %v1953_v62, %v2051_v21  ;;  %v1898_v23 = vmax.f32 %v1419_v7, %v1706_v50  ;;  %v1420_v5 = vmax.f32 %v4846_v14, %v1230_v33  ;;  %v3140_v63 = vpop.f32.mrb[107].mxu0  ;;  %v3256_v17 = vpop.f32.mrb[107].mxu1 }
 0x1c9   :  { %2346 = vst.msk [vmem:[%s4737_s3] sm:$0xf] %vm2345_vm2, %v2704_v51  ;;  %v2705_v12 = vpack.c.bf16 %v2100_v45, %v2100_v45 }
 0x1ca   :  { %v1954_v13 = vadd.f32 %v4338_v0, %v1898_v23  ;;  %v1899_v26 = vmax.f32 %v1420_v5, %v1709_v38  ;;  %v4848_v38 = vmax.f32 %v3868_v31, %v3870_v32 }
 0x1cb   :  { %2347 = vst.msk [vmem:[%s4737_s3 + $0x4] sm:$0xf] %vm2345_vm2, %v2705_v12 }
 0x1cc   :  { %vm2003_vm4 = vcmp.ge.f32.partialorder %v1954_v13, 0.0  ;;  %v2052_v21 = vmul.f32 0.1, %v1954_v13  ;;  %v1955_v19 = vadd.f32 %v4338_v0, %v1899_v26 }
 0x1cd   :  { %v1235_v20 = vpop.f32.mrb[108].mxu0  ;;  %v1714_v17 = vpop.f32.mrb[108].mxu1 }
 0x1ce   :  { %v2101_v1 = vsel %vm2003_vm4, %v1954_v13, %v2052_v21  ;;  %vm2004_vm5 = vcmp.ge.f32.partialorder %v1955_v19, 0.0  ;;  %v2053_v62 = vmul.f32 0.1, %v1955_v19  ;;  %v1421_v50 = vmax.f32 %v4847_v15, %v1235_v20  ;;  %v3143_v2 = vpop.f32.mrb[109].mxu0  ;;  %v3259_v57 = vpop.f32.mrb[109].mxu1 }
 0x1cf   :  { %v2706_v7 = vpack.c.bf16 %v2101_v1, %v2101_v1  ;;  %v1238_v8 = vpop.f32.mrb[110].mxu0  ;;  %v1717_v9 = vpop.f32.mrb[110].mxu1  ;;  %v4849_v21 = vmax.f32 %v3878_v36, %v3880_v37  ;;  %v4850_v57 = vmax.f32 %v3890_v43, %v3892_v44 }
 0x1d0   :  { %v2102_v51 = vsel %vm2004_vm5, %v1955_v19, %v2053_v62  ;;  %v1900_v33 = vmax.f32 %v1421_v50, %v1714_v17  ;;  %v1422_v45 = vmax.f32 %v4848_v38, %v1238_v8  ;;  %v3144_v23 = vpop.f32.mrb[111].mxu0  ;;  %v3260_v14 = vpop.f32.mrb[111].mxu1 }
 0x1d1   :  { %2348 = vst.msk [vmem:[%s4737_s3 + $0x8] sm:$0xf] %vm2345_vm2, %v2706_v7  ;;  %v2707_v24 = vpack.c.bf16 %v2102_v51, %v2102_v51  ;;  %v4851_v14 = vmax.f32 %v3900_v48, %v3902_v49 }
 0x1d2   :  { %v1956_v25 = vadd.f32 %v4338_v0, %v1900_v33  ;;  %v1901_v5 = vmax.f32 %v1422_v45, %v1717_v9 }
 0x1d3   :  { %2349 = vst.msk [vmem:[%s4737_s3 + $0xc] sm:$0xf] %vm2345_vm2, %v2707_v24 }
 0x1d4   :  { %vm2005_vm6 = vcmp.ge.f32.partialorder %v1956_v25, 0.0  ;;  %v2054_v63 = vmul.f32 0.1, %v1956_v25  ;;  %v1957_v31 = vadd.f32 %v4338_v0, %v1901_v5 }
 0x1d5   :  { %v1243_v32 = vpop.f32.mrb[112].mxu0  ;;  %v1722_v12 = vpop.f32.mrb[112].mxu1 }
 0x1d6   :  { %v2103_v13 = vsel %vm2005_vm6, %v1956_v25, %v2054_v63  ;;  %vm2006_vm7 = vcmp.ge.f32.partialorder %v1957_v31, 0.0  ;;  %v2055_v26 = vmul.f32 0.1, %v1957_v31  ;;  %v1423_v19 = vmax.f32 %v4849_v21, %v1243_v32  ;;  %v3147_v20 = vpop.f32.mrb[113].mxu0  ;;  %v3263_v17 = vpop.f32.mrb[113].mxu1 }
 0x1d7   :  { %v2708_v1 = vpack.c.bf16 %v2103_v13, %v2103_v13  ;;  %v1246_v62 = vpop.f32.mrb[114].mxu0  ;;  %v1725_v15 = vpop.f32.mrb[114].mxu1 }
 0x1d8   :  { %v2104_v50 = vsel %vm2006_vm7, %v1957_v31, %v2055_v26  ;;  %v1902_v2 = vmax.f32 %v1423_v19, %v1722_v12  ;;  %v1424_v7 = vmax.f32 %v4850_v57, %v1246_v62  ;;  %v3148_v8 = vpop.f32.mrb[115].mxu0  ;;  %v3264_v9 = vpop.f32.mrb[115].mxu1  ;;  %v4852_v26 = vmax.f32 %v3912_v55, %v3914_v56 }
 0x1d9   :  { %2350 = vst.msk [vmem:[%s4737_s3 + $0x10] sm:$0xf] %vm2345_vm2, %v2708_v1  ;;  %v2709_v36 = vpack.c.bf16 %v2104_v50, %v2104_v50 }
 0x1da   :  { %v1958_v37 = vadd.f32 %v4338_v0, %v1902_v2  ;;  %v1903_v51 = vmax.f32 %v1424_v7, %v1725_v15  ;;  %v4853_v2 = vmax.f32 %v3922_v60, %v3924_v61 }
 0x1db   :  { %2351 = vst.msk [vmem:[%s4737_s3 + $0x14] sm:$0xf] %vm2345_vm2, %v2709_v36 }
 0x1dc   :  { %vm2007_vm8 = vcmp.ge.f32.partialorder %v1958_v37, 0.0  ;;  %v2056_v33 = vmul.f32 0.1, %v1958_v37  ;;  %v1959_v43 = vadd.f32 %v4338_v0, %v1903_v51 }
 0x1dd   :  { %v1251_v44 = vpop.f32.mrb[116].mxu0  ;;  %v1730_v38 = vpop.f32.mrb[116].mxu1 }
 0x1de   :  { %v2105_v45 = vsel %vm2007_vm8, %v1958_v37, %v2056_v33  ;;  %vm2008_vm9 = vcmp.ge.f32.partialorder %v1959_v43, 0.0  ;;  %v2057_v23 = vmul.f32 0.1, %v1959_v43  ;;  %v1425_v24 = vmax.f32 %v4851_v14, %v1251_v44  ;;  %v3151_v25 = vpop.f32.mrb[117].mxu0  ;;  %v3267_v5 = vpop.f32.mrb[117].mxu1 }
 0x1df   :  { %v2710_v63 = vpack.c.bf16 %v2105_v45, %v2105_v45  ;;  %v1254_v31 = vpop.f32.mrb[118].mxu0  ;;  %v1733_v32 = vpop.f32.mrb[118].mxu1 }
 0x1e0   :  { %v2106_v12 = vsel %vm2008_vm9, %v1959_v43, %v2057_v23  ;;  %v1904_v13 = vmax.f32 %v1425_v24, %v1730_v38  ;;  %v1426_v21 = vmax.f32 %v4852_v26, %v1254_v31  ;;  %v3152_v19 = vpop.f32.mrb[119].mxu0  ;;  %v3268_v20 = vpop.f32.mrb[119].mxu1  ;;  %v4854_v43 = vmax.f32 %v3934_v10, %v3936_v11 }
 0x1e1   :  { %2352 = vst.msk [vmem:[%s4737_s3 + $0x18] sm:$0xf] %vm2345_vm2, %v2710_v63  ;;  %v2711_v48 = vpack.c.bf16 %v2106_v12, %v2106_v12  ;;  %v4855_v63 = vmax.f32 %v3944_v18, %v3946_v22 }
 0x1e2   :  { %v1960_v49 = vadd.f32 %v4338_v0, %v1904_v13  ;;  %v1905_v17 = vmax.f32 %v1426_v21, %v1733_v32 }
 0x1e3   :  { %2353 = vst.msk [vmem:[%s4737_s3 + $0x1c] sm:$0xf] %vm2345_vm2, %v2711_v48  ;;  %v4856_v48 = vmax.f32 %v3956_v34, %v3958_v35 }
 0x1e4   :  { %vm2009_vm10 = vcmp.ge.f32.partialorder %v1960_v49, 0.0  ;;  %v2058_v1 = vmul.f32 0.1, %v1960_v49  ;;  %v1961_v55 = vadd.f32 %v4338_v0, %v1905_v17 }
 0x1e5   :  { %v1259_v56 = vpop.f32.mrb[120].mxu0  ;;  %v1738_v62 = vpop.f32.mrb[120].mxu1 }
 0x1e6   :  { %v2107_v15 = vsel %vm2009_vm10, %v1960_v49, %v2058_v1  ;;  %vm2010_vm11 = vcmp.ge.f32.partialorder %v1961_v55, 0.0  ;;  %v2059_v50 = vmul.f32 0.1, %v1961_v55  ;;  %v1427_v57 = vmax.f32 %v4853_v2, %v1259_v56  ;;  %v3155_v7 = vpop.f32.mrb[121].mxu0  ;;  %v3271_v8 = vpop.f32.mrb[121].mxu1 }
 0x1e7   :  { %v2712_v9 = vpack.c.bf16 %v2107_v15, %v2107_v15  ;;  %v1262_v36 = vpop.f32.mrb[122].mxu0  ;;  %v1741_v37 = vpop.f32.mrb[122].mxu1  ;;  %v4857_v2 = vmax.f32 %v3966_v42, %v3968_v46 }
 0x1e8   :  { %v2108_v51 = vsel %vm2010_vm11, %v1961_v55, %v2059_v50  ;;  %v1906_v33 = vmax.f32 %v1427_v57, %v1738_v62  ;;  %v1428_v44 = vmax.f32 %v4854_v43, %v1262_v36  ;;  %v3156_v38 = vpop.f32.mrb[123].mxu0  ;;  %v3272_v45 = vpop.f32.mrb[123].mxu1  ;;  %v4858_v43 = vmax.f32 %v3978_v58, %v3980_v59 }
 0x1e9   :  { %2354 = vst.msk [vmem:[%s4737_s3 + $0x20] sm:$0xf] %vm2345_vm2, %v2712_v9  ;;  %v2713_v60 = vpack.c.bf16 %v2108_v51, %v2108_v51 }
 0x1ea   :  { %v1962_v61 = vadd.f32 %v4338_v0, %v1906_v33  ;;  %v1907_v23 = vmax.f32 %v1428_v44, %v1741_v37 }
 0x1eb   :  { %2355 = vst.msk [vmem:[%s4737_s3 + $0x24] sm:$0xf] %vm2345_vm2, %v2713_v60 }
 0x1ec   :  { %vm2011_vm12 = vcmp.ge.f32.partialorder %v1962_v61, 0.0  ;;  %v2060_v14 = vmul.f32 0.1, %v1962_v61  ;;  %v1963_v10 = vadd.f32 %v4338_v0, %v1907_v23 }
 0x1ed   :  { %v1267_v11 = vpop.f32.mrb[124].mxu0  ;;  %v1746_v24 = vpop.f32.mrb[124].mxu1 }
 0x1ee   :  { %v2109_v25 = vsel %vm2011_vm12, %v1962_v61, %v2060_v14  ;;  %vm2012_vm13 = vcmp.ge.f32.partialorder %v1963_v10, 0.0  ;;  %v2061_v5 = vmul.f32 0.1, %v1963_v10  ;;  %v1429_v31 = vmax.f32 %v4855_v63, %v1267_v11  ;;  %v3159_v32 = vpop.f32.mrb[125].mxu0  ;;  %v3275_v12 = vpop.f32.mrb[125].mxu1 }
 0x1ef   :  { %v2714_v13 = vpack.c.bf16 %v2109_v25, %v2109_v25  ;;  %v1270_v26 = vpop.f32.mrb[126].mxu0  ;;  %v1749_v21 = vpop.f32.mrb[126].mxu1  ;;  %v4859_v11 = vmax.f32 %v3988_v6, %v3990_v16 }
 0x1f0   :  { %v2110_v19 = vsel %vm2012_vm13, %v1963_v10, %v2061_v5  ;;  %v1908_v20 = vmax.f32 %v1429_v31, %v1746_v24  ;;  %v1430_v49 = vmax.f32 %v4856_v48, %v1270_v26  ;;  %v3160_v17 = vpop.f32.mrb[127].mxu0  ;;  %v3276_v1 = vpop.f32.mrb[127].mxu1  ;;  %v4860_v26 = vmax.f32 %v4000_v40, %v4002_v41 }
 0x1f1   :  { %2356 = vst.msk [vmem:[%s4737_s3 + $0x28] sm:$0xf] %vm2345_vm2, %v2714_v13  ;;  %v2715_v18 = vpack.c.bf16 %v2110_v19, %v2110_v19 }
 0x1f2   :  { %v1964_v22 = vadd.f32 %v4338_v0, %v1908_v20  ;;  %v1909_v55 = vmax.f32 %v1430_v49, %v1749_v21 }
 0x1f3   :  { %2357 = vst.msk [vmem:[%s4737_s3 + $0x2c] sm:$0xf] %vm2345_vm2, %v2715_v18 }
 0x1f4   :  { %vm2013_vm14 = vcmp.ge.f32.partialorder %v1964_v22, 0.0  ;;  %v2062_v56 = vmul.f32 0.1, %v1964_v22  ;;  %v1965_v34 = vadd.f32 %v4338_v0, %v1909_v55 }
 0x1f5   :  { %v1275_v35 = vpop.f32.mrb[128].mxu0  ;;  %v1754_v62 = vpop.f32.mrb[128].mxu1 }
 0x1f6   :  { %v2111_v15 = vsel %vm2013_vm14, %v1964_v22, %v2062_v56  ;;  %vm2014_vm15 = vcmp.ge.f32.partialorder %v1965_v34, 0.0  ;;  %v2063_v50 = vmul.f32 0.1, %v1965_v34  ;;  %v1431_v57 = vmax.f32 %v4857_v2, %v1275_v35  ;;  %v3163_v7 = vpop.f32.mrb[129].mxu0  ;;  %v3279_v8 = vpop.f32.mrb[129].mxu1 }
 0x1f7   :  { %v2716_v9 = vpack.c.bf16 %v2111_v15, %v2111_v15  ;;  %v1278_v36 = vpop.f32.mrb[130].mxu0  ;;  %v1757_v37 = vpop.f32.mrb[130].mxu1  ;;  %v4861_v22 = vmax.f32 %v4010_v54, %v4012_v4 }
 0x1f8   :  { %v2112_v51 = vsel %vm2014_vm15, %v1965_v34, %v2063_v50  ;;  %v1910_v33 = vmax.f32 %v1431_v57, %v1754_v62  ;;  %v1432_v44 = vmax.f32 %v4858_v43, %v1278_v36  ;;  %v3164_v38 = vpop.f32.mrb[131].mxu0  ;;  %v3280_v45 = vpop.f32.mrb[131].mxu1  ;;  %v4862_v57 = vmax.f32 %v4022_v52, %v4024_v53 }
 0x1f9   :  { %2358 = vst.msk [vmem:[%s4737_s3 + $0x30] sm:$0xf] %vm2345_vm2, %v2716_v9  ;;  %v2717_v42 = vpack.c.bf16 %v2112_v51, %v2112_v51 }
 0x1fa   :  { %v1966_v46 = vadd.f32 %v4338_v0, %v1910_v33  ;;  %v1911_v60 = vmax.f32 %v1432_v44, %v1757_v37  ;;  %v4863_v44 = vmax.f32 %v4032_v27, %v4034_v28 }
 0x1fb   :  { %2359 = vst.msk [vmem:[%s4737_s3 + $0x34] sm:$0xf] %vm2345_vm2, %v2717_v42 }
 0x1fc   :  { %vm2015_vm0 = vcmp.ge.f32.partialorder %v1966_v46, 0.0  ;;  %v2064_v61 = vmul.f32 0.1, %v1966_v46  ;;  %v1967_v58 = vadd.f32 %v4338_v0, %v1911_v60 }
 0x1fd   :  { %v1283_v59 = vpop.f32.mrb[132].mxu0  ;;  %v1762_v23 = vpop.f32.mrb[132].mxu1 }
 0x1fe   :  { %v2113_v14 = vsel %vm2015_vm0, %v1966_v46, %v2064_v61  ;;  %vm2016_vm1 = vcmp.ge.f32.partialorder %v1967_v58, 0.0  ;;  %v2065_v10 = vmul.f32 0.1, %v1967_v58  ;;  %v1433_v24 = vmax.f32 %v4859_v11, %v1283_v59  ;;  %v3167_v25 = vpop.f32.mrb[133].mxu0  ;;  %v3283_v5 = vpop.f32.mrb[133].mxu1 }
 0x1ff   :  { %v2718_v63 = vpack.c.bf16 %v2113_v14, %v2113_v14  ;;  %v1286_v31 = vpop.f32.mrb[134].mxu0  ;;  %v1765_v32 = vpop.f32.mrb[134].mxu1 }
 0x200   :  { %v2114_v12 = vsel %vm2016_vm1, %v1967_v58, %v2065_v10  ;;  %v1912_v13 = vmax.f32 %v1433_v24, %v1762_v23  ;;  %v1434_v21 = vmax.f32 %v4860_v26, %v1286_v31  ;;  %v3168_v19 = vpop.f32.mrb[135].mxu0  ;;  %v3284_v20 = vpop.f32.mrb[135].mxu1  ;;  %v4864_v23 = vmax.f32 %v4044_v29, %v4046_v30 }
 0x201   :  { %2360 = vst.msk [vmem:[%s4737_s3 + $0x38] sm:$0xf] %vm2345_vm2, %v2718_v63  ;;  %v2719_v6 = vpack.c.bf16 %v2114_v12, %v2114_v12 }
 0x202   :  { %v1968_v16 = vadd.f32 %v4338_v0, %v1912_v13  ;;  %v1913_v48 = vmax.f32 %v1434_v21, %v1765_v32  ;;  %v4865_v32 = vmax.f32 %v4054_v39, %v4056_v47 }
 0x203   :  { %2361 = vst.msk [vmem:[%s4737_s3 + $0x3c] sm:$0xf] %vm2345_vm2, %v2719_v6 }
 0x204   :  { %vm2017_vm3 = vcmp.ge.f32.partialorder %v1968_v16, 0.0  ;;  %v2066_v49 = vmul.f32 0.1, %v1968_v16  ;;  %v1969_v40 = vadd.f32 %v4338_v0, %v1913_v48  ;;  %v4866_v48 = vld [vmem:[#allocation2_spill] sm:$0xff] }
 0x205   :  { %v1291_v41 = vpop.f32.mrb[136].mxu0  ;;  %v1770_v17 = vpop.f32.mrb[136].mxu1 }
 0x206   :  { %v2115_v1 = vsel %vm2017_vm3, %v1968_v16, %v2066_v49  ;;  %vm2018_vm4 = vcmp.ge.f32.partialorder %v1969_v40, 0.0  ;;  %v2067_v18 = vmul.f32 0.1, %v1969_v40  ;;  %v1435_v55 = vmax.f32 %v4861_v22, %v1291_v41  ;;  %v3171_v56 = vpop.f32.mrb[137].mxu0  ;;  %v3287_v34 = vpop.f32.mrb[137].mxu1 }
 0x207   :  { %v2720_v35 = vpack.c.bf16 %v2115_v1, %v2115_v1  ;;  %v1294_v62 = vpop.f32.mrb[138].mxu0  ;;  %v1773_v15 = vpop.f32.mrb[138].mxu1  ;;  %v4867_v49 = vmax.f32 %v4066_v3, %v4866_v48 }
 0x208   :  { %v2116_v50 = vsel %vm2018_vm4, %v1969_v40, %v2067_v18  ;;  %v1914_v2 = vmax.f32 %v1435_v55, %v1770_v17  ;;  %v1436_v7 = vmax.f32 %v4862_v57, %v1294_v62  ;;  %v3172_v8 = vpop.f32.mrb[139].mxu0  ;;  %v3288_v9 = vpop.f32.mrb[139].mxu1  ;;  %v4869_v62 = vld [vmem:[#allocation4_spill] sm:$0xff] }
 0x209   :  { %2362 = vst.msk [vmem:[%s4737_s3 + $0x40] sm:$0xf] %vm2345_vm2, %v2720_v35  ;;  %v2721_v54 = vpack.c.bf16 %v2116_v50, %v2116_v50  ;;  %v4868_v35 = vld [vmem:[#allocation3_spill] sm:$0xff] }
 0x20a   :  { %v1970_v4 = vadd.f32 %v4338_v0, %v1914_v2  ;;  %v1915_v36 = vmax.f32 %v1436_v7, %v1773_v15  ;;  %v4870_v15 = vmax.f32 %v4868_v35, %v4869_v62  ;;  %v4883_v35 = vld [vmem:[#allocation13_spill] sm:$0xff]  ;;  %v4884_v62 = vld [vmem:[#allocation14_spill] sm:$0xff] }
 0x20b   :  { %2363 = vst.msk [vmem:[%s4737_s3 + $0x44] sm:$0xf] %vm2345_vm2, %v2721_v54 }
 0x20c   :  { %vm2019_vm5 = vcmp.ge.f32.partialorder %v1970_v4, 0.0  ;;  %v2068_v37 = vmul.f32 0.1, %v1970_v4  ;;  %v1971_v52 = vadd.f32 %v4338_v0, %v1915_v36  ;;  %v4871_v36 = vld [vmem:[#allocation5_spill] sm:$0xff] }
 0x20d   :  { %v1299_v53 = vpop.f32.mrb[140].mxu0  ;;  %v1778_v51 = vpop.f32.mrb[140].mxu1 }
 0x20e   :  { %v2117_v33 = vsel %vm2019_vm5, %v1970_v4, %v2068_v37  ;;  %vm2020_vm6 = vcmp.ge.f32.partialorder %v1971_v52, 0.0  ;;  %v2069_v43 = vmul.f32 0.1, %v1971_v52  ;;  %v1437_v38 = vmax.f32 %v4863_v44, %v1299_v53  ;;  %v3175_v45 = vpop.f32.mrb[141].mxu0  ;;  %v3291_v42 = vpop.f32.mrb[141].mxu1  ;;  %v4872_v37 = vld [vmem:[#allocation6_spill] sm:$0xff] }
 0x20f   :  { %v2722_v46 = vpack.c.bf16 %v2117_v33, %v2117_v33  ;;  %v1302_v60 = vpop.f32.mrb[142].mxu0  ;;  %v1781_v61 = vpop.f32.mrb[142].mxu1 }
 0x210   :  { %v2118_v58 = vsel %vm2020_vm6, %v1971_v52, %v2069_v43  ;;  %v1916_v59 = vmax.f32 %v1437_v38, %v1778_v51  ;;  %v1438_v14 = vmax.f32 %v4864_v23, %v1302_v60  ;;  %v3176_v10 = vpop.f32.mrb[143].mxu0  ;;  %v3292_v11 = vpop.f32.mrb[143].mxu1  ;;  %v4873_v52 = vmax.f32 %v4871_v36, %v4872_v37  ;;  %v4875_v23 = vld [vmem:[#allocation8_spill] sm:$0xff] }
 0x211   :  { %2364 = vst.msk [vmem:[%s4737_s3 + $0x48] sm:$0xf] %vm2345_vm2, %v2722_v46  ;;  %v2723_v27 = vpack.c.bf16 %v2118_v58, %v2118_v58 }
 0x212   :  { %v1972_v28 = vadd.f32 %v4338_v0, %v1916_v59  ;;  %v1917_v24 = vmax.f32 %v1438_v14, %v1781_v61  ;;  %v4874_v59 = vld [vmem:[#allocation7_spill] sm:$0xff] }
 0x213   :  { %2365 = vst.msk [vmem:[%s4737_s3 + $0x4c] sm:$0xf] %vm2345_vm2, %v2723_v27  ;;  %v4876_v14 = vmax.f32 %v4874_v59, %v4875_v23  ;;  %v4889_v59 = vld [vmem:[#allocation17_spill] sm:$0xff]  ;;  %v4890_v23 = vld [vmem:[#allocation18_spill] sm:$0xff] }
 0x214   :  { %vm2021_vm7 = vcmp.ge.f32.partialorder %v1972_v28, 0.0  ;;  %v2070_v25 = vmul.f32 0.1, %v1972_v28  ;;  %v1973_v29 = vadd.f32 %v4338_v0, %v1917_v24 }
 0x215   :  { %v1307_v30 = vpop.f32.mrb[144].mxu0  ;;  %v1786_v5 = vpop.f32.mrb[144].mxu1 }
 0x216   :  { %v2119_v63 = vsel %vm2021_vm7, %v1972_v28, %v2070_v25  ;;  %vm2022_vm8 = vcmp.ge.f32.partialorder %v1973_v29, 0.0  ;;  %v2071_v31 = vmul.f32 0.1, %v1973_v29  ;;  %v1439_v12 = vmax.f32 %v4865_v32, %v1307_v30  ;;  %v3179_v13 = vpop.f32.mrb[145].mxu0  ;;  %v3295_v26 = vpop.f32.mrb[145].mxu1 }
 0x217   :  { %v2724_v21 = vpack.c.bf16 %v2119_v63, %v2119_v63  ;;  %v1310_v19 = vpop.f32.mrb[146].mxu0  ;;  %v1789_v20 = vpop.f32.mrb[146].mxu1  ;;  %v4878_v63 = vld [vmem:[#allocation10_spill] sm:$0xff] }
 0x218   :  { %v2120_v6 = vsel %vm2022_vm8, %v1973_v29, %v2071_v31  ;;  %v1918_v16 = vmax.f32 %v1439_v12, %v1786_v5  ;;  %v1440_v40 = vmax.f32 %v4867_v49, %v1310_v19  ;;  %v3180_v41 = vpop.f32.mrb[147].mxu0  ;;  %v3296_v17 = vpop.f32.mrb[147].mxu1  ;;  %v4877_v5 = vld [vmem:[#allocation9_spill] sm:$0xff] }
 0x219   :  { %2366 = vst.msk [vmem:[%s4737_s3 + $0x50] sm:$0xf] %vm2345_vm2, %v2724_v21  ;;  %v2725_v39 = vpack.c.bf16 %v2120_v6, %v2120_v6  ;;  %v4879_v31 = vmax.f32 %v4877_v5, %v4878_v63  ;;  %v4880_v41 = vld [vmem:[#allocation11_spill] sm:$0xff]  ;;  %v4881_v17 = vld [vmem:[#allocation12_spill] sm:$0xff] }
 0x21a   :  { %v1974_v47 = vadd.f32 %v4338_v0, %v1918_v16  ;;  %v1919_v1 = vmax.f32 %v1440_v40, %v1789_v20 }
 0x21b   :  { %2367 = vst.msk [vmem:[%s4737_s3 + $0x54] sm:$0xf] %vm2345_vm2, %v2725_v39  ;;  %v4882_v39 = vmax.f32 %v4880_v41, %v4881_v17  ;;  %v4895_v41 = vld [vmem:[#allocation21_spill] sm:$0xff]  ;;  %v4896_v17 = vld [vmem:[#allocation22_spill] sm:$0xff] }
 0x21c   :  { %vm2023_vm9 = vcmp.ge.f32.partialorder %v1974_v47, 0.0  ;;  %v2072_v18 = vmul.f32 0.1, %v1974_v47  ;;  %v1975_v3 = vadd.f32 %v4338_v0, %v1919_v1 }
 0x21d   :  { %v1315_v22 = vpop.f32.mrb[148].mxu0  ;;  %v1794_v55 = vpop.f32.mrb[148].mxu1 }
 0x21e   :  { %v2121_v56 = vsel %vm2023_vm9, %v1974_v47, %v2072_v18  ;;  %vm2024_vm10 = vcmp.ge.f32.partialorder %v1975_v3, 0.0  ;;  %v2073_v34 = vmul.f32 0.1, %v1975_v3  ;;  %v1441_v50 = vmax.f32 %v4870_v15, %v1315_v22  ;;  %v3183_v2 = vpop.f32.mrb[149].mxu0  ;;  %v3299_v57 = vpop.f32.mrb[149].mxu1 }
 0x21f   :  { %v2726_v7 = vpack.c.bf16 %v2121_v56, %v2121_v56  ;;  %v1318_v8 = vpop.f32.mrb[150].mxu0  ;;  %v1797_v9 = vpop.f32.mrb[150].mxu1  ;;  %v4885_v15 = vmax.f32 %v4883_v35, %v4884_v62 }
 0x220   :  { %v2122_v54 = vsel %vm2024_vm10, %v1975_v3, %v2073_v34  ;;  %v1920_v4 = vmax.f32 %v1441_v50, %v1794_v55  ;;  %v1442_v53 = vmax.f32 %v4873_v52, %v1318_v8  ;;  %v3184_v51 = vpop.f32.mrb[151].mxu0  ;;  %v3300_v33 = vpop.f32.mrb[151].mxu1 }
 0x221   :  { %2368 = vst.msk [vmem:[%s4737_s3 + $0x58] sm:$0xf] %vm2345_vm2, %v2726_v7  ;;  %v2727_v43 = vpack.c.bf16 %v2122_v54, %v2122_v54  ;;  %v4886_v51 = vld [vmem:[#allocation15_spill] sm:$0xff]  ;;  %v4887_v33 = vld [vmem:[#allocation16_spill] sm:$0xff] }
 0x222   :  { %v1976_v44 = vadd.f32 %v4338_v0, %v1920_v4  ;;  %v1921_v38 = vmax.f32 %v1442_v53, %v1797_v9 }
 0x223   :  { %2369 = vst.msk [vmem:[%s4737_s3 + $0x5c] sm:$0xf] %vm2345_vm2, %v2727_v43  ;;  %v4888_v43 = vmax.f32 %v4886_v51, %v4887_v33  ;;  %v4901_v51 = vld [vmem:[#allocation25_spill] sm:$0xff]  ;;  %v4902_v33 = vld [vmem:[#allocation26_spill] sm:$0xff] }
 0x224   :  { %vm2025_vm11 = vcmp.ge.f32.partialorder %v1976_v44, 0.0  ;;  %v2074_v45 = vmul.f32 0.1, %v1976_v44  ;;  %v1977_v42 = vadd.f32 %v4338_v0, %v1921_v38 }
 0x225   :  { %v1323_v46 = vpop.f32.mrb[152].mxu0  ;;  %v1802_v60 = vpop.f32.mrb[152].mxu1 }
 0x226   :  { %v2123_v61 = vsel %vm2025_vm11, %v1976_v44, %v2074_v45  ;;  %vm2026_vm12 = vcmp.ge.f32.partialorder %v1977_v42, 0.0  ;;  %v2075_v58 = vmul.f32 0.1, %v1977_v42  ;;  %v1443_v10 = vmax.f32 %v4876_v14, %v1323_v46  ;;  %v3187_v11 = vpop.f32.mrb[153].mxu0  ;;  %v3303_v27 = vpop.f32.mrb[153].mxu1 }
 0x227   :  { %v2728_v28 = vpack.c.bf16 %v2123_v61, %v2123_v61  ;;  %v1326_v24 = vpop.f32.mrb[154].mxu0  ;;  %v1805_v25 = vpop.f32.mrb[154].mxu1  ;;  %v4891_v14 = vmax.f32 %v4889_v59, %v4890_v23 }
 0x228   :  { %v2124_v29 = vsel %vm2026_vm12, %v1977_v42, %v2075_v58  ;;  %v1922_v30 = vmax.f32 %v1443_v10, %v1802_v60  ;;  %v1444_v32 = vmax.f32 %v4879_v31, %v1326_v24  ;;  %v3188_v12 = vpop.f32.mrb[155].mxu0  ;;  %v3304_v13 = vpop.f32.mrb[155].mxu1 }
 0x229   :  { %2370 = vst.msk [vmem:[%s4737_s3 + $0x60] sm:$0xf] %vm2345_vm2, %v2728_v28  ;;  %v2729_v26 = vpack.c.bf16 %v2124_v29, %v2124_v29  ;;  %v4892_v12 = vld [vmem:[#allocation19_spill] sm:$0xff]  ;;  %v4893_v13 = vld [vmem:[#allocation20_spill] sm:$0xff] }
 0x22a   :  { %v1978_v21 = vadd.f32 %v4338_v0, %v1922_v30  ;;  %v1923_v19 = vmax.f32 %v1444_v32, %v1805_v25 }
 0x22b   :  { %2371 = vst.msk [vmem:[%s4737_s3 + $0x64] sm:$0xf] %vm2345_vm2, %v2729_v26  ;;  %v4894_v26 = vmax.f32 %v4892_v12, %v4893_v13  ;;  %v4907_v12 = vld [vmem:[#allocation29_spill] sm:$0xff]  ;;  %v4908_v13 = vld [vmem:[#allocation30_spill] sm:$0xff] }
 0x22c   :  { %vm2027_vm13 = vcmp.ge.f32.partialorder %v1978_v21, 0.0  ;;  %v2076_v20 = vmul.f32 0.1, %v1978_v21  ;;  %v1979_v6 = vadd.f32 %v4338_v0, %v1923_v19 }
 0x22d   :  { %v1331_v16 = vpop.f32.mrb[156].mxu0  ;;  %v1810_v48 = vpop.f32.mrb[156].mxu1 }
 0x22e   :  { %v2125_v49 = vsel %vm2027_vm13, %v1978_v21, %v2076_v20  ;;  %vm2028_vm14 = vcmp.ge.f32.partialorder %v1979_v6, 0.0  ;;  %v2077_v40 = vmul.f32 0.1, %v1979_v6  ;;  %v1445_v47 = vmax.f32 %v4882_v39, %v1331_v16  ;;  %v3191_v1 = vpop.f32.mrb[157].mxu0  ;;  %v3307_v18 = vpop.f32.mrb[157].mxu1 }
 0x22f   :  { %v2730_v3 = vpack.c.bf16 %v2125_v49, %v2125_v49  ;;  %v1334_v22 = vpop.f32.mrb[158].mxu0  ;;  %v1813_v55 = vpop.f32.mrb[158].mxu1  ;;  %v4897_v39 = vmax.f32 %v4895_v41, %v4896_v17 }
 0x230   :  { %v2126_v56 = vsel %vm2028_vm14, %v1979_v6, %v2077_v40  ;;  %v1924_v34 = vmax.f32 %v1445_v47, %v1810_v48  ;;  %v1446_v50 = vmax.f32 %v4885_v15, %v1334_v22  ;;  %v3192_v2 = vpop.f32.mrb[159].mxu0  ;;  %v3308_v57 = vpop.f32.mrb[159].mxu1 }
 0x231   :  { %2372 = vst.msk [vmem:[%s4737_s3 + $0x68] sm:$0xf] %vm2345_vm2, %v2730_v3  ;;  %v2731_v7 = vpack.c.bf16 %v2126_v56, %v2126_v56  ;;  %v4898_v2 = vld [vmem:[#allocation23_spill] sm:$0xff]  ;;  %v4899_v57 = vld [vmem:[#allocation24_spill] sm:$0xff] }
 0x232   :  { %v1980_v8 = vadd.f32 %v4338_v0, %v1924_v34  ;;  %v1925_v9 = vmax.f32 %v1446_v50, %v1813_v55 }
 0x233   :  { %2373 = vst.msk [vmem:[%s4737_s3 + $0x6c] sm:$0xf] %vm2345_vm2, %v2731_v7  ;;  %v4900_v7 = vmax.f32 %v4898_v2, %v4899_v57  ;;  %v4913_v2 = vld [vmem:[#allocation33_spill] sm:$0xff]  ;;  %v4914_v57 = vld [vmem:[#allocation34_spill] sm:$0xff] }
 0x234   :  { %vm2029_vm15 = vcmp.ge.f32.partialorder %v1980_v8, 0.0  ;;  %v2078_v54 = vmul.f32 0.1, %v1980_v8  ;;  %v1981_v4 = vadd.f32 %v4338_v0, %v1925_v9 }
 0x235   :  { %v1339_v36 = vpop.f32.mrb[160].mxu0  ;;  %v1818_v37 = vpop.f32.mrb[160].mxu1 }
 0x236   :  { %v2127_v52 = vsel %vm2029_vm15, %v1980_v8, %v2078_v54  ;;  %vm2030_vm0 = vcmp.ge.f32.partialorder %v1981_v4, 0.0  ;;  %v2079_v53 = vmul.f32 0.1, %v1981_v4  ;;  %v1447_v44 = vmax.f32 %v4888_v43, %v1339_v36  ;;  %v3195_v38 = vpop.f32.mrb[161].mxu0  ;;  %v3311_v45 = vpop.f32.mrb[161].mxu1 }
 0x237   :  { %v2732_v42 = vpack.c.bf16 %v2127_v52, %v2127_v52  ;;  %v1342_v46 = vpop.f32.mrb[162].mxu0  ;;  %v1821_v60 = vpop.f32.mrb[162].mxu1  ;;  %v4903_v43 = vmax.f32 %v4901_v51, %v4902_v33 }
 0x238   :  { %v2128_v61 = vsel %vm2030_vm0, %v1981_v4, %v2079_v53  ;;  %v1926_v58 = vmax.f32 %v1447_v44, %v1818_v37  ;;  %v1448_v10 = vmax.f32 %v4891_v14, %v1342_v46  ;;  %v3196_v11 = vpop.f32.mrb[163].mxu0  ;;  %v3312_v27 = vpop.f32.mrb[163].mxu1 }
 0x239   :  { %2374 = vst.msk [vmem:[%s4737_s3 + $0x70] sm:$0xf] %vm2345_vm2, %v2732_v42  ;;  %v2733_v28 = vpack.c.bf16 %v2128_v61, %v2128_v61  ;;  %v4904_v11 = vld [vmem:[#allocation27_spill] sm:$0xff]  ;;  %v4905_v27 = vld [vmem:[#allocation28_spill] sm:$0xff] }
 0x23a   :  { %v1982_v24 = vadd.f32 %v4338_v0, %v1926_v58  ;;  %v1927_v25 = vmax.f32 %v1448_v10, %v1821_v60 }
 0x23b   :  { %2375 = vst.msk [vmem:[%s4737_s3 + $0x74] sm:$0xf] %vm2345_vm2, %v2733_v28  ;;  %v4906_v28 = vmax.f32 %v4904_v11, %v4905_v27  ;;  %v4919_v11 = vld [vmem:[#allocation37_spill] sm:$0xff]  ;;  %v4920_v27 = vld [vmem:[#allocation38_spill] sm:$0xff] }
 0x23c   :  { %vm2031_vm1 = vcmp.ge.f32.partialorder %v1982_v24, 0.0  ;;  %v2080_v29 = vmul.f32 0.1, %v1982_v24  ;;  %v1983_v30 = vadd.f32 %v4338_v0, %v1927_v25 }
 0x23d   :  { %v1347_v5 = vpop.f32.mrb[164].mxu0  ;;  %v1826_v63 = vpop.f32.mrb[164].mxu1 }
 0x23e   :  { %v2129_v31 = vsel %vm2031_vm1, %v1982_v24, %v2080_v29  ;;  %vm2032_vm3 = vcmp.ge.f32.partialorder %v1983_v30, 0.0  ;;  %v2081_v32 = vmul.f32 0.1, %v1983_v30  ;;  %v1449_v21 = vmax.f32 %v4894_v26, %v1347_v5  ;;  %v3199_v19 = vpop.f32.mrb[165].mxu0  ;;  %v3315_v20 = vpop.f32.mrb[165].mxu1 }
 0x23f   :  { %v2734_v6 = vpack.c.bf16 %v2129_v31, %v2129_v31  ;;  %v1350_v16 = vpop.f32.mrb[166].mxu0  ;;  %v1829_v48 = vpop.f32.mrb[166].mxu1  ;;  %v4909_v26 = vmax.f32 %v4907_v12, %v4908_v13 }
 0x240   :  { %v2130_v49 = vsel %vm2032_vm3, %v1983_v30, %v2081_v32  ;;  %v1928_v40 = vmax.f32 %v1449_v21, %v1826_v63  ;;  %v1450_v47 = vmax.f32 %v4897_v39, %v1350_v16  ;;  %v3200_v1 = vpop.f32.mrb[167].mxu0  ;;  %v3316_v18 = vpop.f32.mrb[167].mxu1 }
 0x241   :  { %2376 = vst.msk [vmem:[%s4737_s3 + $0x78] sm:$0xf] %vm2345_vm2, %v2734_v6  ;;  %v2735_v3 = vpack.c.bf16 %v2130_v49, %v2130_v49  ;;  %v4910_v1 = vld [vmem:[#allocation31_spill] sm:$0xff]  ;;  %v4911_v18 = vld [vmem:[#allocation32_spill] sm:$0xff] }
 0x242   :  { %v1984_v22 = vadd.f32 %v4338_v0, %v1928_v40  ;;  %v1929_v55 = vmax.f32 %v1450_v47, %v1829_v48 }
 0x243   :  { %2377 = vst.msk [vmem:[%s4737_s3 + $0x7c] sm:$0xf] %vm2345_vm2, %v2735_v3  ;;  %v4912_v3 = vmax.f32 %v4910_v1, %v4911_v18  ;;  %v4925_v1 = vld [vmem:[#allocation41_spill] sm:$0xff]  ;;  %v4926_v18 = vld [vmem:[#allocation42_spill] sm:$0xff] }
 0x244   :  { %vm2033_vm4 = vcmp.ge.f32.partialorder %v1984_v22, 0.0  ;;  %v2082_v56 = vmul.f32 0.1, %v1984_v22  ;;  %v1985_v34 = vadd.f32 %v4338_v0, %v1929_v55 }
 0x245   :  { %v1355_v35 = vpop.f32.mrb[168].mxu0  ;;  %v1834_v62 = vpop.f32.mrb[168].mxu1 }
 0x246   :  { %v2131_v15 = vsel %vm2033_vm4, %v1984_v22, %v2082_v56  ;;  %vm2034_vm5 = vcmp.ge.f32.partialorder %v1985_v34, 0.0  ;;  %v2083_v50 = vmul.f32 0.1, %v1985_v34  ;;  %v1451_v8 = vmax.f32 %v4900_v7, %v1355_v35  ;;  %v3203_v9 = vpop.f32.mrb[169].mxu0  ;;  %v3319_v54 = vpop.f32.mrb[169].mxu1 }
 0x247   :  { %v2736_v4 = vpack.c.bf16 %v2131_v15, %v2131_v15  ;;  %v1358_v36 = vpop.f32.mrb[170].mxu0  ;;  %v1837_v37 = vpop.f32.mrb[170].mxu1  ;;  %v4915_v7 = vmax.f32 %v4913_v2, %v4914_v57 }
 0x248   :  { %v2132_v52 = vsel %vm2034_vm5, %v1985_v34, %v2083_v50  ;;  %v1930_v53 = vmax.f32 %v1451_v8, %v1834_v62  ;;  %v1452_v44 = vmax.f32 %v4903_v43, %v1358_v36  ;;  %v3204_v38 = vpop.f32.mrb[171].mxu0  ;;  %v3320_v45 = vpop.f32.mrb[171].mxu1 }
 0x249   :  { %2378 = vst.msk [vmem:[%s4737_s3 + $0x80] sm:$0xf] %vm2345_vm2, %v2736_v4  ;;  %v2737_v42 = vpack.c.bf16 %v2132_v52, %v2132_v52  ;;  %v4916_v38 = vld [vmem:[#allocation35_spill] sm:$0xff]  ;;  %v4917_v45 = vld [vmem:[#allocation36_spill] sm:$0xff] }
 0x24a   :  { %v1986_v46 = vadd.f32 %v4338_v0, %v1930_v53  ;;  %v1931_v60 = vmax.f32 %v1452_v44, %v1837_v37 }
 0x24b   :  { %2379 = vst.msk [vmem:[%s4737_s3 + $0x84] sm:$0xf] %vm2345_vm2, %v2737_v42  ;;  %v4918_v42 = vmax.f32 %v4916_v38, %v4917_v45  ;;  %v4931_v38 = vld [vmem:[#allocation45_spill] sm:$0xff]  ;;  %v4932_v45 = vld [vmem:[#allocation46_spill] sm:$0xff] }
 0x24c   :  { %vm2035_vm6 = vcmp.ge.f32.partialorder %v1986_v46, 0.0  ;;  %v2084_v61 = vmul.f32 0.1, %v1986_v46  ;;  %v1987_v58 = vadd.f32 %v4338_v0, %v1931_v60 }
 0x24d   :  { %v1363_v59 = vpop.f32.mrb[172].mxu0  ;;  %v1842_v23 = vpop.f32.mrb[172].mxu1 }
 0x24e   :  { %v2133_v14 = vsel %vm2035_vm6, %v1986_v46, %v2084_v61  ;;  %vm2036_vm7 = vcmp.ge.f32.partialorder %v1987_v58, 0.0  ;;  %v2085_v10 = vmul.f32 0.1, %v1987_v58  ;;  %v1453_v24 = vmax.f32 %v4906_v28, %v1363_v59  ;;  %v3207_v25 = vpop.f32.mrb[173].mxu0  ;;  %v3323_v29 = vpop.f32.mrb[173].mxu1 }
 0x24f   :  { %v2738_v30 = vpack.c.bf16 %v2133_v14, %v2133_v14  ;;  %v1366_v5 = vpop.f32.mrb[174].mxu0  ;;  %v1845_v63 = vpop.f32.mrb[174].mxu1  ;;  %v4921_v28 = vmax.f32 %v4919_v11, %v4920_v27 }
 0x250   :  { %v2134_v31 = vsel %vm2036_vm7, %v1987_v58, %v2085_v10  ;;  %v1932_v32 = vmax.f32 %v1453_v24, %v1842_v23  ;;  %v1454_v21 = vmax.f32 %v4909_v26, %v1366_v5  ;;  %v3208_v19 = vpop.f32.mrb[175].mxu0  ;;  %v3324_v20 = vpop.f32.mrb[175].mxu1 }
 0x251   :  { %2380 = vst.msk [vmem:[%s4737_s3 + $0x88] sm:$0xf] %vm2345_vm2, %v2738_v30  ;;  %v2739_v6 = vpack.c.bf16 %v2134_v31, %v2134_v31  ;;  %v4922_v19 = vld [vmem:[#allocation39_spill] sm:$0xff]  ;;  %v4923_v20 = vld [vmem:[#allocation40_spill] sm:$0xff] }
 0x252   :  { %v1988_v16 = vadd.f32 %v4338_v0, %v1932_v32  ;;  %v1933_v48 = vmax.f32 %v1454_v21, %v1845_v63 }
 0x253   :  { %2381 = vst.msk [vmem:[%s4737_s3 + $0x8c] sm:$0xf] %vm2345_vm2, %v2739_v6  ;;  %v4924_v6 = vmax.f32 %v4922_v19, %v4923_v20  ;;  %v4937_v19 = vld [vmem:[#allocation49_spill] sm:$0xff]  ;;  %v4938_v20 = vld [vmem:[#allocation50_spill] sm:$0xff] }
 0x254   :  { %vm2037_vm8 = vcmp.ge.f32.partialorder %v1988_v16, 0.0  ;;  %v2086_v49 = vmul.f32 0.1, %v1988_v16  ;;  %v1989_v40 = vadd.f32 %v4338_v0, %v1933_v48 }
 0x255   :  { %v1371_v41 = vpop.f32.mrb[176].mxu0  ;;  %v1850_v17 = vpop.f32.mrb[176].mxu1 }
 0x256   :  { %v2135_v39 = vsel %vm2037_vm8, %v1988_v16, %v2086_v49  ;;  %vm2038_vm9 = vcmp.ge.f32.partialorder %v1989_v40, 0.0  ;;  %v2087_v47 = vmul.f32 0.1, %v1989_v40  ;;  %v1455_v22 = vmax.f32 %v4912_v3, %v1371_v41  ;;  %v3211_v55 = vpop.f32.mrb[177].mxu0  ;;  %v3327_v56 = vpop.f32.mrb[177].mxu1 }
 0x257   :  { %v2740_v34 = vpack.c.bf16 %v2135_v39, %v2135_v39  ;;  %v1374_v35 = vpop.f32.mrb[178].mxu0  ;;  %v1853_v62 = vpop.f32.mrb[178].mxu1  ;;  %v4927_v3 = vmax.f32 %v4925_v1, %v4926_v18 }
 0x258   :  { %v2136_v15 = vsel %vm2038_vm9, %v1989_v40, %v2087_v47  ;;  %v1934_v50 = vmax.f32 %v1455_v22, %v1850_v17  ;;  %v1456_v8 = vmax.f32 %v4915_v7, %v1374_v35  ;;  %v3212_v9 = vpop.f32.mrb[179].mxu0  ;;  %v3328_v54 = vpop.f32.mrb[179].mxu1 }
 0x259   :  { %2382 = vst.msk [vmem:[%s4737_s3 + $0x90] sm:$0xf] %vm2345_vm2, %v2740_v34  ;;  %v2741_v4 = vpack.c.bf16 %v2136_v15, %v2136_v15  ;;  %v4678_v34 = vld [vmem:[%s4736_s2] ss:$0 sm:$0xff]  ;;  %v4928_v9 = vld [vmem:[#allocation43_spill] sm:$0xff]  ;;  %v4929_v54 = vld [vmem:[#allocation44_spill] sm:$0xff] }
 0x25a   :  { %v1990_v36 = vadd.f32 %v4338_v0, %v1934_v50  ;;  %v1935_v37 = vmax.f32 %v1456_v8, %v1853_v62 }
 0x25b   :  { %2383 = vst.msk [vmem:[%s4737_s3 + $0x94] sm:$0xf] %vm2345_vm2, %v2741_v4  ;;  %v4930_v4 = vmax.f32 %v4928_v9, %v4929_v54 }
 0x25c   :  { %vm2039_vm10 = vcmp.ge.f32.partialorder %v1990_v36, 0.0  ;;  %v2088_v52 = vmul.f32 0.1, %v1990_v36  ;;  %v1991_v53 = vadd.f32 %v4338_v0, %v1935_v37 }
 0x25d   :  { %v1379_v51 = vpop.f32.mrb[180].mxu0  ;;  %v1858_v33 = vpop.f32.mrb[180].mxu1 }
 0x25e   :  { %v2137_v43 = vsel %vm2039_vm10, %v1990_v36, %v2088_v52  ;;  %vm2040_vm11 = vcmp.ge.f32.partialorder %v1991_v53, 0.0  ;;  %v2089_v44 = vmul.f32 0.1, %v1991_v53  ;;  %v1457_v46 = vmax.f32 %v4918_v42, %v1379_v51  ;;  %v3215_v60 = vpop.f32.mrb[181].mxu0  ;;  %v3331_v61 = vpop.f32.mrb[181].mxu1 }
 0x25f   :  { %v2742_v58 = vpack.c.bf16 %v2137_v43, %v2137_v43  ;;  %v1382_v59 = vpop.f32.mrb[182].mxu0  ;;  %v1861_v23 = vpop.f32.mrb[182].mxu1  ;;  %v4933_v42 = vmax.f32 %v4931_v38, %v4932_v45 }
 0x260   :  { %v2138_v14 = vsel %vm2040_vm11, %v1991_v53, %v2089_v44  ;;  %v1936_v10 = vmax.f32 %v1457_v46, %v1858_v33  ;;  %v1458_v24 = vmax.f32 %v4921_v28, %v1382_v59  ;;  %v3216_v25 = vpop.f32.mrb[183].mxu0  ;;  %v3332_v29 = vpop.f32.mrb[183].mxu1 }
 0x261   :  { %2384 = vst.msk [vmem:[%s4737_s3 + $0x98] sm:$0xf] %vm2345_vm2, %v2742_v58  ;;  %v2743_v30 = vpack.c.bf16 %v2138_v14, %v2138_v14  ;;  %v4934_v25 = vld [vmem:[#allocation47_spill] sm:$0xff]  ;;  %v4935_v29 = vld [vmem:[#allocation48_spill] sm:$0xff] }
 0x262   :  { %v1992_v5 = vadd.f32 %v4338_v0, %v1936_v10  ;;  %v1937_v63 = vmax.f32 %v1458_v24, %v1861_v23 }
 0x263   :  { %2385 = vst.msk [vmem:[%s4737_s3 + $0x9c] sm:$0xf] %vm2345_vm2, %v2743_v30  ;;  %v4936_v30 = vmax.f32 %v4934_v25, %v4935_v29 }
 0x264   :  { %vm2041_vm12 = vcmp.ge.f32.partialorder %v1992_v5, 0.0  ;;  %v2090_v31 = vmul.f32 0.1, %v1992_v5  ;;  %v1993_v32 = vadd.f32 %v4338_v0, %v1937_v63 }
 0x265   :  { %v1387_v12 = vpop.f32.mrb[184].mxu0  ;;  %v1866_v13 = vpop.f32.mrb[184].mxu1 }
 0x266   :  { %v2139_v26 = vsel %vm2041_vm12, %v1992_v5, %v2090_v31  ;;  %vm2042_vm13 = vcmp.ge.f32.partialorder %v1993_v32, 0.0  ;;  %v2091_v21 = vmul.f32 0.1, %v1993_v32  ;;  %v1459_v16 = vmax.f32 %v4924_v6, %v1387_v12  ;;  %v3219_v48 = vpop.f32.mrb[185].mxu0  ;;  %v3335_v49 = vpop.f32.mrb[185].mxu1 }
 0x267   :  { %v2744_v40 = vpack.c.bf16 %v2139_v26, %v2139_v26  ;;  %v1390_v41 = vpop.f32.mrb[186].mxu0  ;;  %v1869_v17 = vpop.f32.mrb[186].mxu1  ;;  %v4939_v6 = vmax.f32 %v4937_v19, %v4938_v20 }
 0x268   :  { %v2140_v39 = vsel %vm2042_vm13, %v1993_v32, %v2091_v21  ;;  %v1938_v47 = vmax.f32 %v1459_v16, %v1866_v13  ;;  %v1460_v0 = vmax.f32 %v4927_v3, %v1390_v41  ;;  %v3220_v22 = vpop.f32.mrb[187].mxu0  ;;  %v3336_v55 = vpop.f32.mrb[187].mxu1 }
 0x269   :  { %2386 = vst.msk [vmem:[%s4737_s3 + $0xa0] sm:$0xf] %vm2345_vm2, %v2744_v40  ;;  %v2745_v56 = vpack.c.bf16 %v2140_v39, %v2140_v39  ;;  %v4940_v22 = vld [vmem:[#allocation51_spill] sm:$0xff]  ;;  %v4941_v55 = vld [vmem:[#allocation52_spill] sm:$0xff] }
 0x26a   :  { %v1994_v35 = vadd.f32 %v4678_v34, %v1938_v47  ;;  %v1939_v62 = vmax.f32 %v1460_v0, %v1869_v17 }
 0x26b   :  { %2387 = vst.msk [vmem:[%s4737_s3 + $0xa4] sm:$0xf] %vm2345_vm2, %v2745_v56  ;;  %v4942_v56 = vmax.f32 %v4940_v22, %v4941_v55 }
 0x26c   :  { %vm2043_vm14 = vcmp.ge.f32.partialorder %v1994_v35, 0.0  ;;  %v2092_v15 = vmul.f32 0.1, %v1994_v35  ;;  %v1995_v50 = vadd.f32 %v4678_v34, %v1939_v62 }
 0x26d   :  { %v1395_v2 = vpop.f32.mrb[188].mxu0  ;;  %v1874_v57 = vpop.f32.mrb[188].mxu1 }
 0x26e   :  { %v2141_v7 = vsel %vm2043_vm14, %v1994_v35, %v2092_v15  ;;  %vm2044_vm15 = vcmp.ge.f32.partialorder %v1995_v50, 0.0  ;;  %v2093_v8 = vmul.f32 0.1, %v1995_v50  ;;  %v1461_v36 = vmax.f32 %v4930_v4, %v1395_v2  ;;  %v3223_v37 = vpop.f32.mrb[189].mxu0  ;;  %v3339_v52 = vpop.f32.mrb[189].mxu1 }
 0x26f   :  { %v2746_v53 = vpack.c.bf16 %v2141_v7, %v2141_v7  ;;  %v1398_v51 = vpop.f32.mrb[190].mxu0  ;;  %v1877_v33 = vpop.f32.mrb[190].mxu1 }
 0x270   :  { %v2142_v43 = vsel %vm2044_vm15, %v1995_v50, %v2093_v8  ;;  %v1940_v44 = vmax.f32 %v1461_v36, %v1874_v57  ;;  %v1462_v46 = vmax.f32 %v4933_v42, %v1398_v51  ;;  %v3224_v60 = vpop.f32.mrb[191].mxu0  ;;  %v3340_v61 = vpop.f32.mrb[191].mxu1 }
 0x271   :  { %2388 = vst.msk [vmem:[%s4737_s3 + $0xa8] sm:$0xf] %vm2345_vm2, %v2746_v53  ;;  %v2747_v58 = vpack.c.bf16 %v2142_v43, %v2142_v43 }
 0x272   :  { %v1996_v59 = vadd.f32 %v4678_v34, %v1940_v44  ;;  %v1941_v23 = vmax.f32 %v1462_v46, %v1877_v33 }
 0x273   :  { %2389 = vst.msk [vmem:[%s4737_s3 + $0xac] sm:$0xf] %vm2345_vm2, %v2747_v58 }
 0x274   :  { %vm2045_vm0 = vcmp.ge.f32.partialorder %v1996_v59, 0.0  ;;  %v2094_v14 = vmul.f32 0.1, %v1996_v59  ;;  %v1997_v10 = vadd.f32 %v4678_v34, %v1941_v23 }
 0x275   :  { %v1403_v11 = vpop.f32.mrb[192].mxu0  ;;  %v1882_v27 = vpop.f32.mrb[192].mxu1 }
 0x276   :  { %v2143_v28 = vsel %vm2045_vm0, %v1996_v59, %v2094_v14  ;;  %vm2046_vm1 = vcmp.ge.f32.partialorder %v1997_v10, 0.0  ;;  %v2095_v24 = vmul.f32 0.1, %v1997_v10  ;;  %v1463_v5 = vmax.f32 %v4936_v30, %v1403_v11  ;;  %v3227_v63 = vpop.f32.mrb[193].mxu0  ;;  %v3343_v31 = vpop.f32.mrb[193].mxu1 }
 0x277   :  { %v2748_v32 = vpack.c.bf16 %v2143_v28, %v2143_v28  ;;  %v1406_v12 = vpop.f32.mrb[194].mxu0  ;;  %v1885_v13 = vpop.f32.mrb[194].mxu1 }
 0x278   :  { %v2144_v26 = vsel %vm2046_vm1, %v1997_v10, %v2095_v24  ;;  %v1942_v21 = vmax.f32 %v1463_v5, %v1882_v27  ;;  %v1464_v16 = vmax.f32 %v4939_v6, %v1406_v12  ;;  %v3228_v48 = vpop.f32.mrb[195].mxu0  ;;  %v3344_v49 = vpop.f32.mrb[195].mxu1 }
 0x279   :  { %2390 = vst.msk [vmem:[%s4737_s3 + $0xb0] sm:$0xf] %vm2345_vm2, %v2748_v32  ;;  %v2749_v40 = vpack.c.bf16 %v2144_v26, %v2144_v26 }
 0x27a   :  { %v1998_v41 = vadd.f32 %v4678_v34, %v1942_v21  ;;  %v1943_v17 = vmax.f32 %v1464_v16, %v1885_v13 }
 0x27b   :  { %2391 = vst.msk [vmem:[%s4737_s3 + $0xb4] sm:$0xf] %vm2345_vm2, %v2749_v40 }
 0x27c   :  { %vm2047_vm3 = vcmp.ge.f32.partialorder %v1998_v41, 0.0  ;;  %v2096_v39 = vmul.f32 0.1, %v1998_v41  ;;  %v1999_v47 = vadd.f32 %v4678_v34, %v1943_v17 }
 0x27d   :  { %v1411_v1 = vpop.f32.mrb[196].mxu0  ;;  %v1890_v18 = vpop.f32.mrb[196].mxu1 }
 0x27e   :  { %v2145_v3 = vsel %vm2047_vm3, %v1998_v41, %v2096_v39  ;;  %vm2048_vm4 = vcmp.ge.f32.partialorder %v1999_v47, 0.0  ;;  %v2097_v0 = vmul.f32 0.1, %v1999_v47  ;;  %v1465_v35 = vmax.f32 %v4942_v56, %v1411_v1  ;;  %v3231_v62 = vpop.f32.mrb[197].mxu0  ;;  %v3347_v15 = vpop.f32.mrb[197].mxu1 }
 0x27f   :  { %v2750_v50 = vpack.c.bf16 %v2145_v3, %v2145_v3  ;;  %v1414_v2 = vpop.f32.mrb[198].mxu0  ;;  %v1893_v57 = vpop.f32.mrb[198].mxu1 }
 0x280   :  { %v2146_v7 = vsel %vm2048_vm4, %v1999_v47, %v2097_v0  ;;  %v1944_v8 = vmax.f32 %v1465_v35, %v1890_v18  ;;  %v3232_v9 = vpop.f32.mrb[199].mxu0  ;;  %v3348_v54 = vpop.f32.mrb[199].mxu1 }
 0x281   :  { %2392 = vst.msk [vmem:[%s4737_s3 + $0xb8] sm:$0xf] %vm2345_vm2, %v2750_v50  ;;  %v2751_v4 = vpack.c.bf16 %v2146_v7, %v2146_v7 }
 0x282   :  { %v2000_v36 = vadd.f32 %v4678_v34, %v1944_v8 }
 0x283   :  { %2393 = vst.msk [vmem:[%s4737_s3 + $0xbc] sm:$0xf] %vm2345_vm2, %v2751_v4 }
 0x284   :  { %vm2049_vm5 = vcmp.ge.f32.partialorder %v2000_v36, 0.0  ;;  %v2098_v37 = vmul.f32 0.1, %v2000_v36 }
 0x286   :  { %v2147_v52 = vsel %vm2049_vm5, %v2000_v36, %v2098_v37 }
 0x287   :  { %v2752_v53 = vpack.c.bf16 %v2147_v52, %v2147_v52 }
 0x289   :  { %2394 = vst.msk [vmem:[%s4737_s3 + $0xc0] sm:$0xf] %vm2345_vm2, %v2752_v53 }

// kernel: cnn_forward.5
= control target key start
LH: loop header
LB: loop body
LE: loop exit
PB: predicated region body
PF: predicated region fallthrough
CT: control target
= control target key end

     0   :  { %v2388_v0 = vmov 0.0   ;;  %vm2389_vm0 = vmmov 0   ;;  %vm285_vm1 = vcmask 261120   ;;  %vm1606_vm3 = vcmask 519168   ;;  %s3154_s1 = inlined_call_operand.vmem [shape: bf16[288,64], index: 1, kind: input, shape index: {}]   ;;  %s3155_s0 = inlined_call_operand.vmem [shape: bf16[4,98,288], index: 0, kind: input, shape index: {}]   ;;  %s3156_s2 = inlined_call_operand.vmem [shape: f32[1,64], index: 2, kind: input, shape index: {}]   ;;  %s3157_s3 = inlined_call_operand.vmem [shape: bf16[98,64], index: 3, kind: output, shape index: {}]  }
   0x1   :  { %2128 = vmatprep.subr.bf16.mxu1 %v2388_v0  ;;  %v2414_v1 = vld [vmem:[%s3154_s1 + $0x40] sm:$0xff]   ;;  %2132 = vmatprep.mubr.msk.bf16.mxu1 %vm2389_vm0, %v2388_v0  ;;  %v2433_v4 = vld [vmem:[%s3154_s1 + $0x48] sm:$0xff]   ;;  %v2455_v8 = vld [vmem:[%s3154_s1 + $0x50] sm:$0xff]   ;;  %vm1619_vm13 = vcmask 516096  }
   0x2   :  { %v2421_v2 = vld [vmem:[%s3154_s1 + $0x80] sm:$0xff]   ;;  %1860 = vmatprep.subr.bf16.mxu0 %v2414_v1  ;;  %v2440_v5 = vld [vmem:[%s3154_s1 + $0x88] sm:$0xff]   ;;  %v2461_v9 = vld [vmem:[%s3154_s1 + $0x10] sm:$0xff]  }
   0x3   :  { %v2427_v3 = vld [vmem:[%s3154_s1] sm:$0xff]   ;;  %2129 = vmatpush3.bf16.msra.mxu1 %v2421_v2  ;;  %v2446_v6 = vld [vmem:[%s3154_s1 + $0x8] sm:$0xff]   ;;  %v2468_v10 = vld [vmem:[%s3154_s1 + $0x58] sm:$0xff]  }
   0x4   :  { %1861 = vmatpush3.bf16.msra.mxu0 %v2427_v3  ;;  %2130 = vmatprep.subr.bf16.mxu1 %v2388_v0  ;;  %v2268_v7 = vld [vmem:[%s3155_s0 + $0x8] ss:$12 sps:$4 sm:$0xff]   ;;  %v2478_v11 = vld [vmem:[%s3154_s1 + $0x18] sm:$0xff]   ;;  %v2485_v12 = vld [vmem:[%s3154_s1 + $0x60] sm:$0xff]  }
   0x5   :  { %1862 = vmatprep.subr.bf16.mxu0 %v2433_v4  ;;  %v2273_v13 = vld [vmem:[%s3155_s0 + $0x20] ss:$12 sps:$4 sm:$0xff]   ;;  %v2278_v17 = vld [vmem:[%s3155_s0 + $0x38] ss:$12 sps:$4 sm:$0xff]   ;;  %v2522_v18 = vld [vmem:[%s3154_s1 + $0x70] sm:$0xff]  }
   0x6   :  { %v2495_v14 = vld [vmem:[%s3154_s1 + $0x20] sm:$0xff]   ;;  %v2502_v15 = vld [vmem:[%s3154_s1 + $0x68] sm:$0xff]   ;;  %v2532_v20 = vld [vmem:[%s3154_s1 + $0x30] sm:$0xff]  }
   0x7   :  { %2131 = vmatpush3.bf16.msra.mxu1 %v2440_v5  ;;  %v2508_v16 = vld [vmem:[%s3154_s1 + $0x28] sm:$0xff]   ;;  %v2285_v19 = vld [vmem:[%s3155_s0 + $0x4] ss:$12 sps:$4 sm:$0xff]   ;;  %v2538_v21 = vld [vmem:[%s3154_s1 + $0x78] sm:$0xff]  }
   0x8   :  { %1863 = vmatpush3.bf16.msra.mxu0 %v2446_v6  ;;  %1927 = vmatprep.subr.bf16.mxu1 %v2414_v1  ;;  %v2549_v22 = vld [vmem:[%s3154_s1 + $0x38] sm:$0xff]   ;;  %v2283_v24 = vld [vmem:[%s3155_s0] ss:$12 sps:$4 sm:$0xff]   ;;  %v2289_v26 = vld [vmem:[%s3155_s0 + $0x68] ss:$12 sps:$4 sm:$0xff]  }
   0x9   :  { %1864 = vmatprep.subr.bf16.mxu0 %v2455_v8  ;;  %339 = vmatprep.mubr.bf16.mxu0 %v2285_v19  ;;  %v2286_v23 = vld [vmem:[%s3155_s0 + $0x50] ss:$12 sps:$4 sm:$0xff]   ;;  %v2290_v27 = vld [vmem:[%s3155_s0 + $0x18] ss:$12 sps:$4 sm:$0xff]   ;;  %v2291_v28 = vld [vmem:[%s3155_s0 + $0x34] ss:$12 sps:$4 sm:$0xff]  }
   0xa   :  { %2133 = vmatmul.mubr.msk.bf16.vlgmr.msra.gmra.mrb[0].mxu1 %vm285_vm1, %v2268_v7  ;;  %v2287_v25 = vld [vmem:[%s3155_s0 + $0x1c] ss:$12 sps:$4 sm:$0xff]   ;;  %v2293_v29 = vld [vmem:[%s3155_s0 + $0x80] ss:$12 sps:$4 sm:$0xff]   ;;  %v2302_v35 = vld [vmem:[%s3155_s0 + $0x64] ss:$12 sps:$4 sm:$0xff]  }
   0xb   :  { %2136 = vmatprep.mubr.msk.bf16.mxu1 %vm2389_vm0, %v2388_v0  ;;  %1928 = vmatpush3.bf16.msra.mxu1 %v2427_v3  ;;  %v2294_v30 = vld [vmem:[%s3155_s0 + $0x30] ss:$12 sps:$4 sm:$0xff]   ;;  %v2295_v31 = vld [vmem:[%s3155_s0 + $0x4c] ss:$12 sps:$4 sm:$0xff]   ;;  %v2298_v33 = vld [vmem:[%s3155_s0 + $0x48] ss:$12 sps:$4 sm:$0xff]  }
   0xc   :  { %1865 = vmatpush3.bf16.msra.mxu0 %v2461_v9  ;;  %1929 = vmatprep.subr.bf16.mxu1 %v2433_v4  ;;  %v2297_v32 = vld [vmem:[%s3155_s0 + $0x98] ss:$0 sps:$4 sm:$0x11]   ;;  %v2301_v34 = vld [vmem:[%s3155_s0 + $0xa0] ss:$12 sps:$4 sm:$0xff]  }
   0xd   :  { %1866 = vmatprep.subr.bf16.mxu0 %v2468_v10  ;;  %v2299_v36 = vld [vmem:[%s3155_s0 + $0x9c] ss:$12 sps:$4 sm:$0xff]   ;;  %v2304_v37 = vld [vmem:[%s3155_s0 + $0x60] ss:$12 sps:$4 sm:$0xff]   ;;  %v2305_v38 = vld [vmem:[%s3155_s0 + $0xb8] ss:$12 sps:$4 sm:$0xff]  }
   0xe   :  { %v2307_v39 = vld [vmem:[%s3155_s0 + $0x7c] ss:$12 sps:$4 sm:$0xff]   ;;  %v2309_v40 = vld [vmem:[%s3155_s0 + $0xb4] ss:$12 sps:$4 sm:$0xff]   ;;  %v2310_v42 = vld [vmem:[%s3155_s0 + $0x78] ss:$12 sps:$4 sm:$0xff]  }
   0xf   :  { %1930 = vmatpush3.bf16.msra.mxu1 %v2446_v6  ;;  %v75_v41 = vld [vmem:[%s3155_s0 + $0x90] sm:$0x11]  ;;  %v2314_v45 = vld [vmem:[%s3155_s0 + $0xcc] ss:$12 sps:$4 sm:$0xff]   ;;  %v2322_v51 = vld [vmem:[%s3155_s0 + $0xfc] ss:$12 sps:$4 sm:$0xff]  }
  0x10   :  { %1867 = vmatpush3.bf16.msra.mxu0 %v2478_v11  ;;  %1931 = vmatprep.subr.bf16.mxu1 %v2455_v8  ;;  %v2311_v43 = vld [vmem:[%s3155_s0 + $0xd0] ss:$12 sps:$4 sm:$0xff]   ;;  %v1644_v44 = vcombine.high %v75_v41, %v75_v41  ;;  %v1643_v46 = vcombine.low %v75_v41, %v75_v41  ;;  %v2316_v47 = vld [vmem:[%s3155_s0 + $0xe8] ss:$12 sps:$4 sm:$0xff]   ;;  %v2320_v50 = vld [vmem:[%s3155_s0 + $0x100] ss:$12 sps:$4 sm:$0xff]  }
  0x11   :  { %1868 = vmatprep.subr.bf16.mxu0 %v2485_v12  ;;  %v2318_v48 = vld [vmem:[%s3155_s0 + $0xe4] ss:$12 sps:$4 sm:$0xff]   ;;  %v2323_v52 = vld [vmem:[%s3155_s0 + $0xbc] ss:$12 sps:$4 sm:$0xff]   ;;  %v2326_v55 = vld [vmem:[%s3155_s0 + $0x114] ss:$12 sps:$4 sm:$0xff]  }
  0x12   :  { %2137 = vmatmul.mubr.msk.bf16.gmra.mrb[4].mxu1 %vm285_vm1, %v2273_v13  ;;  %v2319_v49 = vld [vmem:[%s3155_s0 + $0xa4] ss:$12 sps:$4 sm:$0xff]   ;;  %v2327_v56 = vld [vmem:[%s3155_s0 + $0xd4] ss:$12 sps:$4 sm:$0xff]   ;;  %v2330_v59 = vld [vmem:[%s3155_s0 + $0xec] ss:$12 sps:$4 sm:$0xff]  }
  0x13   :  { %2140 = vmatprep.mubr.msk.bf16.mxu1 %vm2389_vm0, %v2388_v0  ;;  %1932 = vmatpush3.bf16.msra.mxu1 %v2461_v9  ;;  %v2324_v53 = vld [vmem:[%s3155_s0 + $0x118] ss:$12 sps:$4 sm:$0xff]   ;;  %v1695_v54 = vld [vmem:[%s3155_s0 + $0x12c] sm:$0x11]  ;;  %v2333_v60 = vld [vmem:[%s3155_s0 + $0x13c] ss:$12 sps:$4 sm:$0xff]  }
  0x14   :  { %1869 = vmatpush3.bf16.msra.mxu0 %v2495_v14  ;;  %1933 = vmatprep.subr.bf16.mxu1 %v2468_v10  ;;  %v1716_v57 = vcombine.high %v1695_v54, %v1695_v54  ;;  %v1715_v58 = vcombine.low %v1695_v54, %v1695_v54  ;;  %v2331_v61 = vld [vmem:[%s3155_s0 + $0x138] ss:$12 sps:$4 sm:$0xff]   ;;  %v2335_v63 = vld [vmem:[%s3155_s0 + $0x154] ss:$12 sps:$4 sm:$0xff]   ;;  %v2338_v7 = vld [vmem:[%s3155_s0 + $0x11c] ss:$12 sps:$4 sm:$0xff]  }
  0x15   :  { %1870 = vmatprep.subr.bf16.mxu0 %v2502_v15  ;;  %v2334_v62 = vld [vmem:[%s3155_s0 + $0x104] ss:$12 sps:$4 sm:$0xff]   ;;  %v2339_v13 = vld [vmem:[%s3155_s0 + $0x16c] ss:$12 sps:$4 sm:$0xff]  }
  0x17   :  { %1934 = vmatpush3.bf16.msra.mxu1 %v2478_v11 }
  0x18   :  { %1871 = vmatpush3.bf16.msra.mxu0 %v2508_v16  ;;  %1935 = vmatprep.subr.bf16.mxu1 %v2485_v12 }
  0x19   :  { %1872 = vmatprep.subr.bf16.mxu0 %v2522_v18 }
  0x1a   :  { %2141 = vmatmul.mubr.msk.bf16.gmra.mrb[8].mxu1 %vm285_vm1, %v2278_v17  ;;  %v2354_v17 = vld [vmem:[%s3155_s0 + $0x170] ss:$12 sps:$4 sm:$0xff]  }
  0x1b   :  { %2144 = vmatprep.mubr.msk.bf16.mxu1 %vm2389_vm0, %v2388_v0  ;;  %1936 = vmatpush3.bf16.msra.mxu1 %v2495_v14 }
  0x1c   :  { %1873 = vmatpush3.bf16.msra.mxu0 %v2532_v20  ;;  %1937 = vmatprep.subr.bf16.mxu1 %v2502_v15 }
  0x1d   :  { %1874 = vmatprep.subr.bf16.mxu0 %v2538_v21 }
  0x1f   :  { %1938 = vmatpush3.bf16.msra.mxu1 %v2508_v16 }
  0x20   :  { %1875 = vmatpush3.bf16.msra.mxu0 %v2549_v22  ;;  %1939 = vmatprep.subr.bf16.mxu1 %v2522_v18 }
  0x21   :  { %2160 = vmatprep.subr.bf16.mxu0 %v2388_v0 }
  0x22   :  { %2145 = vmatmul.mubr.msk.bf16.gmra.mrb[12].mxu1 %vm285_vm1, %v2286_v23  ;;  %v2361_v23 = vld [vmem:[%s3155_s0 + $0x1a0] ss:$12 sps:$4 sm:$0xff]  }
  0x23   :  { %340 = vmatmul.mubr.bf16.vlgmr.msra.gmra.mrb[0].mxu0 %v2283_v24  ;;  %2148 = vmatprep.mubr.msk.bf16.mxu1 %vm2389_vm0, %v2388_v0  ;;  %v2362_v24 = vld [vmem:[%s3155_s0 + $0x1f0] ss:$12 sps:$4 sm:$0xff]  }
  0x24   :  { %2161 = vmatpush3.bf16.msra.mxu0 %v2421_v2  ;;  %347 = vmatprep.mubr.bf16.mxu0 %v2287_v25  ;;  %v2364_v25 = vld [vmem:[%s3155_s0 + $0x1ec] ss:$12 sps:$4 sm:$0xff]  }
  0x25   :  { %1940 = vmatpush3.bf16.msra.mxu1 %v2532_v20  ;;  %2162 = vmatprep.subr.bf16.mxu0 %v2388_v0 }
  0x26   :  { %1941 = vmatprep.subr.bf16.mxu1 %v2538_v21 }
  0x28   :  { %2163 = vmatpush3.bf16.msra.mxu0 %v2440_v5 }
  0x29   :  { %1942 = vmatpush3.bf16.msra.mxu1 %v2549_v22  ;;  %2192 = vmatprep.subr.bf16.mxu0 %v2388_v0 }
  0x2a   :  { %2149 = vmatmul.mubr.msk.bf16.gmra.mrb[16].mxu1 %vm285_vm1, %v2289_v26  ;;  %1994 = vmatprep.subr.bf16.mxu1 %v2414_v1  ;;  %v2365_v26 = vld [vmem:[%s3155_s0 + $0x1b8] ss:$12 sps:$4 sm:$0xff]  }
  0x2b   :  { %348 = vmatmul.mubr.bf16.gmra.mrb[4].mxu0 %v2290_v27  ;;  %2152 = vmatprep.mubr.msk.bf16.mxu1 %vm2389_vm0, %v2388_v0  ;;  %v2366_v27 = vld [vmem:[%s3155_s0 + $0x208] ss:$12 sps:$4 sm:$0xff]  }
  0x2c   :  { %355 = vmatprep.mubr.bf16.mxu0 %v2291_v28  ;;  %v2369_v28 = vld [vmem:[%s3155_s0 + $0x1d0] ss:$0 sps:$4 sm:$0x11]  }
  0x32   :  { %2153 = vmatmul.mubr.msk.bf16.gmra.mrb[20].mxu1 %vm285_vm1, %v2293_v29  ;;  %v2370_v29 = vld [vmem:[%s3155_s0 + $0x220] ss:$12 sps:$4 sm:$0xff]  }
  0x33   :  { %356 = vmatmul.mubr.bf16.gmra.mrb[8].mxu0 %v2294_v30  ;;  %2156 = vmatprep.mubr.msk.bf16.mxu1 %vm2389_vm0, %v2388_v0  ;;  %v2373_v30 = vld [vmem:[%s3155_s0 + $0x1dc] ss:$12 sps:$4 sm:$0xff]  }
  0x34   :  { %363 = vmatprep.mubr.bf16.mxu0 %v2295_v31  ;;  %v2374_v31 = vld [vmem:[%s3155_s0 + $0x238] ss:$12 sps:$4 sm:$0xff]  }
  0x3a   :  { %2157 = vmatmul.mubr.msk.bf16.gmra.mrb[24].mxu1 %vm285_vm1, %v2297_v32  ;;  %v2376_v32 = vld [vmem:[%s3155_s0 + $0x234] ss:$12 sps:$4 sm:$0xff]  }
  0x3b   :  { %364 = vmatmul.mubr.bf16.gmra.mrb[12].mxu0 %v2298_v33  ;;  %663 = vmatprep.mubr.bf16.mxu1 %v2301_v34  ;;  %v2377_v33 = vld [vmem:[%s3155_s0 + $0x1f4] ss:$12 sps:$4 sm:$0xff]   ;;  %v2378_v34 = vld [vmem:[%s3155_s0 + $0x250] ss:$12 sps:$4 sm:$0xff]  }
  0x3c   :  { %371 = vmatprep.mubr.bf16.mxu0 %v2302_v35  ;;  %v1803_v35 = vld [vmem:[%s3155_s0 + $0x264] sm:$0x11] }
  0x42   :  { %664 = vmatmul.mubr.bf16.vlgmr.msra.gmra.mrb[28].mxu1 %v2299_v36  ;;  %v2380_v36 = vld [vmem:[%s3155_s0 + $0x24c] ss:$12 sps:$4 sm:$0xff]  }
  0x43   :  { %372 = vmatmul.mubr.bf16.gmra.mrb[16].mxu0 %v2304_v37  ;;  %671 = vmatprep.mubr.bf16.mxu1 %v2305_v38  ;;  %v2381_v37 = vld [vmem:[%s3155_s0 + $0x20c] ss:$12 sps:$4 sm:$0xff]   ;;  %v1824_v38 = vcombine.high %v1803_v35, %v1803_v35 }
  0x44   :  { %379 = vmatprep.mubr.bf16.mxu0 %v2307_v39  ;;  %1995 = vmatpush3.bf16.msra.mxu1 %v2427_v3 }
  0x45   :  { %1996 = vmatprep.subr.bf16.mxu1 %v2433_v4 }
  0x48   :  { %1997 = vmatpush3.bf16.msra.mxu1 %v2446_v6 }
  0x49   :  { %1998 = vmatprep.subr.bf16.mxu1 %v2455_v8 }
  0x4a   :  { %672 = vmatmul.mubr.bf16.gmra.mrb[32].mxu1 %v2309_v40  ;;  %v1823_v40 = vcombine.low %v1803_v35, %v1803_v35 }
  0x4b   :  { %380 = vmatmul.mubr.bf16.gmra.mrb[20].mxu0 %v2310_v42  ;;  %679 = vmatprep.mubr.bf16.mxu1 %v2311_v43  ;;  %v2384_v42 = vld [vmem:[%s3155_s0 + $0x224] ss:$12 sps:$4 sm:$0xff]  }
  0x4c   :  { %387 = vmatprep.mubr.bf16.mxu0 %v1644_v44  ;;  %1999 = vmatpush3.bf16.msra.mxu1 %v2461_v9 }
  0x4d   :  { %2000 = vmatprep.subr.bf16.mxu1 %v2468_v10 }
  0x50   :  { %2001 = vmatpush3.bf16.msra.mxu1 %v2478_v11 }
  0x51   :  { %2002 = vmatprep.subr.bf16.mxu1 %v2485_v12 }
  0x52   :  { %680 = vmatmul.mubr.bf16.gmra.mrb[36].mxu1 %v2314_v45 }
  0x53   :  { %388 = vmatmul.mubr.bf16.gmra.mrb[24].mxu0 %v1643_v46  ;;  %687 = vmatprep.mubr.bf16.mxu1 %v2316_v47  ;;  %v2385_v46 = vld [vmem:[%s3155_s0 + $0x26c] ss:$0 sps:$4 sm:$0x11]  }
  0x54   :  { %2164 = vmatprep.mubr.msk.bf16.mxu0 %vm2389_vm0, %v2388_v0  ;;  %2003 = vmatpush3.bf16.msra.mxu1 %v2495_v14 }
  0x55   :  { %2004 = vmatprep.subr.bf16.mxu1 %v2502_v15 }
  0x58   :  { %2005 = vmatpush3.bf16.msra.mxu1 %v2508_v16 }
  0x59   :  { %2006 = vmatprep.subr.bf16.mxu1 %v2522_v18 }
  0x5a   :  { %688 = vmatmul.mubr.bf16.gmra.mrb[40].mxu1 %v2318_v48  ;;  %v2386_v48 = vld [vmem:[%s3155_s0 + $0x23c] ss:$12 sps:$4 sm:$0xff]  }
  0x5b   :  { %2165 = vmatmul.mubr.msk.bf16.vlgmr.msra.gmra.mrb[28].mxu0 %vm285_vm1, %v2319_v49  ;;  %695 = vmatprep.mubr.bf16.mxu1 %v2320_v50 }
  0x5c   :  { %2193 = vmatpush3.bf16.msra.mxu0 %v2421_v2  ;;  %2168 = vmatprep.mubr.msk.bf16.mxu0 %vm2389_vm0, %v2388_v0 }
  0x5d   :  { %2007 = vmatpush3.bf16.msra.mxu1 %v2532_v20  ;;  %2194 = vmatprep.subr.bf16.mxu0 %v2388_v0 }
  0x5e   :  { %2008 = vmatprep.subr.bf16.mxu1 %v2538_v21 }
  0x60   :  { %2195 = vmatpush3.bf16.msra.mxu0 %v2440_v5 }
  0x61   :  { %2009 = vmatpush3.bf16.msra.mxu1 %v2549_v22  ;;  %2224 = vmatprep.subr.bf16.mxu0 %v2388_v0 }
  0x62   :  { %696 = vmatmul.mubr.bf16.gmra.mrb[44].mxu1 %v2322_v51  ;;  %2061 = vmatprep.subr.bf16.mxu1 %v2414_v1  ;;  %v2337_v1 = vld [vmem:[%s3155_s0 + $0x150] ss:$12 sps:$4 sm:$0xff]  }
  0x63   :  { %2169 = vmatmul.mubr.msk.bf16.gmra.mrb[32].mxu0 %vm285_vm1, %v2323_v52  ;;  %703 = vmatprep.mubr.bf16.mxu1 %v2324_v53  ;;  %v2387_v53 = vld [vmem:[%s3155_s0 + $0x254] ss:$12 sps:$4 sm:$0xff]  }
  0x64   :  { %2172 = vmatprep.mubr.msk.bf16.mxu0 %vm2389_vm0, %v2388_v0 }
  0x6a   :  { %704 = vmatmul.mubr.bf16.gmra.mrb[48].mxu1 %v2326_v55 }
  0x6b   :  { %2173 = vmatmul.mubr.msk.bf16.gmra.mrb[36].mxu0 %vm285_vm1, %v2327_v56  ;;  %711 = vmatprep.mubr.bf16.mxu1 %v1716_v57 }
  0x6c   :  { %2176 = vmatprep.mubr.msk.bf16.mxu0 %vm2389_vm0, %v2388_v0 }
  0x72   :  { %712 = vmatmul.mubr.bf16.gmra.mrb[52].mxu1 %v1715_v58 }
  0x73   :  { %2177 = vmatmul.mubr.msk.bf16.gmra.mrb[40].mxu0 %vm285_vm1, %v2330_v59  ;;  %1000 = vmatprep.mubr.bf16.mxu1 %v2333_v60 }
  0x74   :  { %2180 = vmatprep.mubr.msk.bf16.mxu0 %vm2389_vm0, %v2388_v0 }
  0x7a   :  { %1001 = vmatmul.mubr.bf16.vlgmr.msra.gmra.mrb[56].mxu1 %v2331_v61 }
  0x7b   :  { %2181 = vmatmul.mubr.msk.bf16.gmra.mrb[44].mxu0 %vm285_vm1, %v2334_v62  ;;  %1008 = vmatprep.mubr.bf16.mxu1 %v2335_v63 }
  0x7c   :  { %2184 = vmatprep.mubr.msk.bf16.mxu0 %vm2389_vm0, %v2388_v0  ;;  %2062 = vmatpush3.bf16.msra.mxu1 %v2427_v3  ;;  %v2341_v3 = vld [vmem:[%s3155_s0 + $0x168] ss:$12 sps:$4 sm:$0xff]  }
  0x7d   :  { %2063 = vmatprep.subr.bf16.mxu1 %v2433_v4  ;;  %v2342_v4 = vld [vmem:[%s3155_s0 + $0x134] ss:$0 sps:$4 sm:$0x11]  }
  0x80   :  { %2064 = vmatpush3.bf16.msra.mxu1 %v2446_v6  ;;  %v2343_v6 = vld [vmem:[%s3155_s0 + $0x184] ss:$12 sps:$4 sm:$0xff]  }
  0x81   :  { %2065 = vmatprep.subr.bf16.mxu1 %v2455_v8  ;;  %v2345_v8 = vld [vmem:[%s3155_s0 + $0x180] ss:$12 sps:$4 sm:$0xff]  }
  0x82   :  { %1009 = vmatmul.mubr.bf16.gmra.mrb[60].mxu1 %v2337_v1 }
  0x83   :  { %2185 = vmatmul.mubr.msk.bf16.gmra.mrb[48].mxu0 %vm285_vm1, %v2338_v7  ;;  %1016 = vmatprep.mubr.bf16.mxu1 %v2339_v13 }
  0x84   :  { %2188 = vmatprep.mubr.msk.bf16.mxu0 %vm2389_vm0, %v2388_v0  ;;  %2066 = vmatpush3.bf16.msra.mxu1 %v2461_v9  ;;  %v2346_v9 = vld [vmem:[%s3155_s0 + $0x140] ss:$12 sps:$4 sm:$0xff]  }
  0x85   :  { %2067 = vmatprep.subr.bf16.mxu1 %v2468_v10  ;;  %v2347_v10 = vld [vmem:[%s3155_s0 + $0x19c] ss:$12 sps:$4 sm:$0xff]  }
  0x88   :  { %2068 = vmatpush3.bf16.msra.mxu1 %v2478_v11  ;;  %v2349_v11 = vld [vmem:[%s3155_s0 + $0x198] ss:$12 sps:$4 sm:$0xff]  }
  0x89   :  { %2069 = vmatprep.subr.bf16.mxu1 %v2485_v12  ;;  %v2350_v12 = vld [vmem:[%s3155_s0 + $0x158] ss:$12 sps:$4 sm:$0xff]  }
  0x8a   :  { %1017 = vmatmul.mubr.bf16.gmra.mrb[64].mxu1 %v2341_v3 }
  0x8b   :  { %2189 = vmatmul.mubr.msk.bf16.gmra.mrb[52].mxu0 %vm285_vm1, %v2342_v4  ;;  %1024 = vmatprep.mubr.bf16.mxu1 %v2343_v6 }
  0x8c   :  { %2196 = vmatprep.mubr.msk.bf16.mxu0 %vm2389_vm0, %v2388_v0  ;;  %2070 = vmatpush3.bf16.msra.mxu1 %v2495_v14  ;;  %v2351_v14 = vld [vmem:[%s3155_s0 + $0x1b4] ss:$12 sps:$4 sm:$0xff]  }
  0x8d   :  { %2071 = vmatprep.subr.bf16.mxu1 %v2502_v15  ;;  %v1749_v15 = vld [vmem:[%s3155_s0 + $0x1c8] sm:$0x11] }
  0x8e   :  { %v1769_v19 = vcombine.low %v1749_v15, %v1749_v15 }
  0x90   :  { %2072 = vmatpush3.bf16.msra.mxu1 %v2508_v16  ;;  %v2353_v16 = vld [vmem:[%s3155_s0 + $0x1b0] ss:$12 sps:$4 sm:$0xff]  }
  0x91   :  { %2073 = vmatprep.subr.bf16.mxu1 %v2522_v18  ;;  %v1770_v18 = vcombine.high %v1749_v15, %v1749_v15 }
  0x92   :  { %1025 = vmatmul.mubr.bf16.gmra.mrb[68].mxu1 %v2345_v8 }
  0x93   :  { %2197 = vmatmul.mubr.msk.bf16.vlgmr.msra.gmra.mrb[56].mxu0 %vm285_vm1, %v2346_v9  ;;  %1032 = vmatprep.mubr.bf16.mxu1 %v2347_v10 }
  0x94   :  { %2225 = vmatpush3.bf16.msra.mxu0 %v2421_v2  ;;  %2200 = vmatprep.mubr.msk.bf16.mxu0 %vm2389_vm0, %v2388_v0 }
  0x95   :  { %2074 = vmatpush3.bf16.msra.mxu1 %v2532_v20  ;;  %2226 = vmatprep.subr.bf16.mxu0 %v2388_v0  ;;  %v2357_v20 = vld [vmem:[%s3155_s0 + $0x188] ss:$12 sps:$4 sm:$0xff]  }
  0x96   :  { %2075 = vmatprep.subr.bf16.mxu1 %v2538_v21  ;;  %v2360_v21 = vld [vmem:[%s3155_s0 + $0x1d8] ss:$12 sps:$4 sm:$0xff]  }
  0x98   :  { %2227 = vmatpush3.bf16.msra.mxu0 %v2440_v5 }
  0x99   :  { %2076 = vmatpush3.bf16.msra.mxu1 %v2549_v22  ;;  %v2358_v22 = vld [vmem:[%s3155_s0 + $0x1d4] ss:$12 sps:$4 sm:$0xff]  }
  0x9a   :  { %1033 = vmatmul.mubr.bf16.gmra.mrb[72].mxu1 %v2349_v11  ;;  %2256 = vmatprep.subr.bf16.mxu1 %v2388_v0 }
  0x9b   :  { %2201 = vmatmul.mubr.msk.bf16.gmra.mrb[60].mxu0 %vm285_vm1, %v2350_v12  ;;  %1040 = vmatprep.mubr.bf16.mxu1 %v2351_v14 }
  0x9c   :  { %2204 = vmatprep.mubr.msk.bf16.mxu0 %vm2389_vm0, %v2388_v0 }
  0xa2   :  { %1041 = vmatmul.mubr.bf16.gmra.mrb[76].mxu1 %v2353_v16 }
  0xa3   :  { %2205 = vmatmul.mubr.msk.bf16.gmra.mrb[64].mxu0 %vm285_vm1, %v2354_v17  ;;  %1048 = vmatprep.mubr.bf16.mxu1 %v1770_v18 }
  0xa4   :  { %2208 = vmatprep.mubr.msk.bf16.mxu0 %vm2389_vm0, %v2388_v0 }
  0xaa   :  { %1049 = vmatmul.mubr.bf16.gmra.mrb[80].mxu1 %v1769_v19 }
  0xab   :  { %2209 = vmatmul.mubr.msk.bf16.gmra.mrb[68].mxu0 %vm285_vm1, %v2357_v20  ;;  %1337 = vmatprep.mubr.bf16.mxu1 %v2360_v21 }
  0xac   :  { %2212 = vmatprep.mubr.msk.bf16.mxu0 %vm2389_vm0, %v2388_v0 }
  0xb2   :  { %1338 = vmatmul.mubr.bf16.vlgmr.msra.gmra.mrb[84].mxu1 %v2358_v22 }
  0xb3   :  { %2213 = vmatmul.mubr.msk.bf16.gmra.mrb[72].mxu0 %vm285_vm1, %v2361_v23  ;;  %1345 = vmatprep.mubr.bf16.mxu1 %v2362_v24 }
  0xb4   :  { %2216 = vmatprep.mubr.msk.bf16.mxu0 %vm2389_vm0, %v2388_v0  ;;  %2258 = vmatpush3.bf16.msra.mxu1 %v2421_v2  ;;  %v2368_v2 = vld [vmem:[%s3155_s0 + $0x204] ss:$12 sps:$4 sm:$0xff]  }
  0xb5   :  { %2257 = vmatprep.subr.bf16.mxu1 %v2388_v0 }
  0xb8   :  { %2259 = vmatpush3.bf16.msra.mxu1 %v2440_v5  ;;  %v2372_v5 = vld [vmem:[%s3155_s0 + $0x21c] ss:$12 sps:$4 sm:$0xff]  }
  0xba   :  { %1346 = vmatmul.mubr.bf16.gmra.mrb[88].mxu1 %v2364_v25 }
  0xbb   :  { %2217 = vmatmul.mubr.msk.bf16.gmra.mrb[76].mxu0 %vm285_vm1, %v2365_v26  ;;  %1353 = vmatprep.mubr.bf16.mxu1 %v2366_v27 }
  0xbc   :  { %2220 = vmatprep.mubr.msk.bf16.mxu0 %vm2389_vm0, %v2388_v0 }
  0xc2   :  { %1354 = vmatmul.mubr.bf16.gmra.mrb[92].mxu1 %v2368_v2 }
  0xc3   :  { %2221 = vmatmul.mubr.msk.bf16.gmra.mrb[80].mxu0 %vm285_vm1, %v2369_v28  ;;  %1361 = vmatprep.mubr.bf16.mxu1 %v2370_v29 }
  0xc4   :  { %2228 = vmatprep.mubr.msk.bf16.mxu0 %vm2389_vm0, %v2388_v0 }
  0xca   :  { %1362 = vmatmul.mubr.bf16.gmra.mrb[96].mxu1 %v2372_v5 }
  0xcb   :  { %2229 = vmatmul.mubr.msk.bf16.vlgmr.msra.gmra.mrb[84].mxu0 %vm285_vm1, %v2373_v30  ;;  %1369 = vmatprep.mubr.bf16.mxu1 %v2374_v31 }
  0xcc   :  { %2232 = vmatprep.mubr.msk.bf16.mxu0 %vm2389_vm0, %v2388_v0 }
  0xd2   :  { %1370 = vmatmul.mubr.bf16.gmra.mrb[100].mxu1 %v2376_v32 }
  0xd3   :  { %2233 = vmatmul.mubr.msk.bf16.gmra.mrb[88].mxu0 %vm285_vm1, %v2377_v33  ;;  %1377 = vmatprep.mubr.bf16.mxu1 %v2378_v34 }
  0xd4   :  { %2236 = vmatprep.mubr.msk.bf16.mxu0 %vm2389_vm0, %v2388_v0 }
  0xda   :  { %1378 = vmatmul.mubr.bf16.gmra.mrb[104].mxu1 %v2380_v36 }
  0xdb   :  { %2237 = vmatmul.mubr.msk.bf16.gmra.mrb[92].mxu0 %vm285_vm1, %v2381_v37  ;;  %1385 = vmatprep.mubr.bf16.mxu1 %v1824_v38 }
  0xdc   :  { %2240 = vmatprep.mubr.msk.bf16.mxu0 %vm2389_vm0, %v2388_v0 }
  0xdd   :  { %v429_v39 = vpop.f32.mrb[0].mxu1 }
  0xde   :  { %v2134_v41 = vpop.f32.mrb[1].mxu1 }
  0xdf   :  { %v432_v43 = vpop.f32.mrb[2].mxu1 }
  0xe0   :  { %v2135_v44 = vpop.f32.mrb[3].mxu1 }
  0xe2   :  { %1386 = vmatmul.mubr.bf16.gmra.mrb[108].mxu1 %v1823_v40 }
  0xe3   :  { %2241 = vmatmul.mubr.msk.bf16.gmra.mrb[96].mxu0 %vm285_vm1, %v2384_v42  ;;  %2252 = vmatprep.mubr.msk.bf16.mxu1 %vm2389_vm0, %v2388_v0 }
  0xe4   :  { %2244 = vmatprep.mubr.msk.bf16.mxu0 %vm2389_vm0, %v2388_v0 }
  0xe5   :  { %v437_v45 = vpop.f32.mrb[4].mxu1 }
  0xe6   :  { %v2138_v47 = vpop.f32.mrb[5].mxu1 }
  0xe7   :  { %v440_v49 = vpop.f32.mrb[6].mxu1 }
  0xe8   :  { %v2139_v50 = vpop.f32.mrb[7].mxu1 }
  0xea   :  { %2253 = vmatmul.mubr.msk.bf16.vlgmr.msra.gmra.mrb[112].mxu1 %vm285_vm1, %v2385_v46 }
  0xeb   :  { %2245 = vmatmul.mubr.msk.bf16.gmra.mrb[100].mxu0 %vm285_vm1, %v2386_v48 }
  0xec   :  { %2248 = vmatprep.mubr.msk.bf16.mxu0 %vm2389_vm0, %v2388_v0 }
  0xed   :  { %v445_v51 = vpop.f32.mrb[8].mxu1 }
  0xee   :  { %v2142_v52 = vpop.f32.mrb[9].mxu1 }
  0xef   :  { %v448_v54 = vpop.f32.mrb[10].mxu1 }
  0xf0   :  { %v2143_v55 = vpop.f32.mrb[11].mxu1 }
  0xf3   :  { %2249 = vmatmul.mubr.msk.bf16.gmra.mrb[104].mxu0 %vm285_vm1, %v2387_v53 }
  0xf5   :  { %v453_v56 = vpop.f32.mrb[12].mxu1 }
  0xf6   :  { %v1876_v57 = vpop.f32.mrb[0].mxu0  ;;  %v2146_v58 = vpop.f32.mrb[13].mxu1 }
  0xf7   :  { %v1877_v59 = vpop.f32.mrb[1].mxu0  ;;  %v456_v60 = vpop.f32.mrb[14].mxu1 }
  0xf8   :  { %v1878_v61 = vadd.f32 %v1877_v59, %v1876_v57  ;;  %v1879_v62 = vpop.f32.mrb[2].mxu0  ;;  %v2147_v63 = vpop.f32.mrb[15].mxu1 }
  0xf9   :  { %v1880_v1 = vpop.f32.mrb[3].mxu0 }
  0xfa   :  { %v2908_v0 = vadd.f32 %v1878_v61, %v429_v39  ;;  %v1881_v7 = vadd.f32 %v1880_v1, %v1879_v62 }
  0xfc   :  { %v2910_v13 = vadd.f32 %v1881_v7, %v432_v43 }
  0xfd   :  { %v461_v3 = vpop.f32.mrb[16].mxu1 }
  0xfe   :  { %v1882_v4 = vpop.f32.mrb[4].mxu0  ;;  %v2150_v6 = vpop.f32.mrb[17].mxu1 }
  0xff   :  { %v1883_v8 = vpop.f32.mrb[5].mxu0  ;;  %v464_v9 = vpop.f32.mrb[18].mxu1 }
 0x100   :  { %v1884_v10 = vadd.f32 %v1883_v8, %v1882_v4  ;;  %v1885_v11 = vpop.f32.mrb[6].mxu0  ;;  %v2151_v12 = vpop.f32.mrb[19].mxu1 }
 0x101   :  { %v1886_v14 = vpop.f32.mrb[7].mxu0 }
 0x102   :  { %v2912_v15 = vadd.f32 %v1884_v10, %v437_v45  ;;  %v1887_v16 = vadd.f32 %v1886_v14, %v1885_v11 }
 0x104   :  { %v2914_v17 = vadd.f32 %v1887_v16, %v440_v49 }
 0x105   :  { %v469_v18 = vpop.f32.mrb[20].mxu1 }
 0x106   :  { %v1888_v19 = vpop.f32.mrb[8].mxu0  ;;  %v2154_v20 = vpop.f32.mrb[21].mxu1 }
 0x107   :  { %v1889_v21 = vpop.f32.mrb[9].mxu0  ;;  %v472_v22 = vpop.f32.mrb[22].mxu1 }
 0x108   :  { %v1890_v23 = vadd.f32 %v1889_v21, %v1888_v19  ;;  %v1891_v24 = vpop.f32.mrb[10].mxu0  ;;  %v2155_v25 = vpop.f32.mrb[23].mxu1 }
 0x109   :  { %v1892_v26 = vpop.f32.mrb[11].mxu0 }
 0x10a   :  { %v2916_v27 = vadd.f32 %v1890_v23, %v445_v51  ;;  %v1893_v2 = vadd.f32 %v1892_v26, %v1891_v24 }
 0x10c   :  { %v2918_v28 = vadd.f32 %v1893_v2, %v448_v54 }
 0x10d   :  { %v477_v29 = vpop.f32.mrb[24].mxu1 }
 0x10e   :  { %v1894_v5 = vpop.f32.mrb[12].mxu0  ;;  %v2158_v30 = vpop.f32.mrb[25].mxu1 }
 0x10f   :  { %v1895_v31 = vpop.f32.mrb[13].mxu0  ;;  %v480_v32 = vpop.f32.mrb[26].mxu1 }
 0x110   :  { %v1896_v33 = vadd.f32 %v1895_v31, %v1894_v5  ;;  %v1897_v34 = vpop.f32.mrb[14].mxu0  ;;  %v2159_v35 = vpop.f32.mrb[27].mxu1 }
 0x111   :  { %v1898_v36 = vpop.f32.mrb[15].mxu0 }
 0x112   :  { %v2920_v37 = vadd.f32 %v1896_v33, %v453_v56  ;;  %v1899_v38 = vadd.f32 %v1898_v36, %v1897_v34 }
 0x114   :  { %v2922_v39 = vadd.f32 %v1899_v38, %v456_v60 }
 0x115   :  { %v1943_v40 = vpop.f32.mrb[28].mxu1 }
 0x116   :  { %v1900_v41 = vpop.f32.mrb[16].mxu0  ;;  %v1944_v42 = vpop.f32.mrb[29].mxu1 }
 0x117   :  { %v1901_v43 = vpop.f32.mrb[17].mxu0  ;;  %v1945_v44 = vadd.f32 %v1944_v42, %v1943_v40  ;;  %v1946_v45 = vpop.f32.mrb[30].mxu1 }
 0x118   :  { %v1902_v46 = vadd.f32 %v1901_v43, %v1900_v41  ;;  %v1903_v47 = vpop.f32.mrb[18].mxu0  ;;  %v1947_v48 = vpop.f32.mrb[31].mxu1 }
 0x119   :  { %v1904_v49 = vpop.f32.mrb[19].mxu0  ;;  %v1948_v50 = vadd.f32 %v1947_v48, %v1946_v45 }
 0x11a   :  { %v2924_v51 = vadd.f32 %v1902_v46, %v461_v3  ;;  %v1905_v52 = vadd.f32 %v1904_v49, %v1903_v47 }
 0x11c   :  { %v2926_v53 = vadd.f32 %v1905_v52, %v464_v9 }
 0x11d   :  { %v1949_v54 = vpop.f32.mrb[32].mxu1 }
 0x11e   :  { %v1906_v55 = vpop.f32.mrb[20].mxu0  ;;  %v1950_v56 = vpop.f32.mrb[33].mxu1 }
 0x11f   :  { %v1907_v57 = vpop.f32.mrb[21].mxu0  ;;  %v1951_v58 = vadd.f32 %v1950_v56, %v1949_v54  ;;  %v1952_v59 = vpop.f32.mrb[34].mxu1 }
 0x120   :  { %v1908_v60 = vadd.f32 %v1907_v57, %v1906_v55  ;;  %v1909_v61 = vpop.f32.mrb[22].mxu0  ;;  %v1953_v62 = vpop.f32.mrb[35].mxu1 }
 0x121   :  { %v1910_v63 = vpop.f32.mrb[23].mxu0  ;;  %v1954_v1 = vadd.f32 %v1953_v62, %v1952_v59 }
 0x122   :  { %v2928_v7 = vadd.f32 %v1908_v60, %v469_v18  ;;  %v1911_v4 = vadd.f32 %v1910_v63, %v1909_v61 }
 0x124   :  { %v2930_v6 = vadd.f32 %v1911_v4, %v472_v22 }
 0x125   :  { %v1955_v3 = vpop.f32.mrb[36].mxu1 }
 0x126   :  { %v1912_v8 = vpop.f32.mrb[24].mxu0  ;;  %v1956_v9 = vpop.f32.mrb[37].mxu1 }
 0x127   :  { %v1913_v10 = vpop.f32.mrb[25].mxu0  ;;  %v1957_v11 = vadd.f32 %v1956_v9, %v1955_v3  ;;  %v1958_v12 = vpop.f32.mrb[38].mxu1 }
 0x128   :  { %v1914_v14 = vadd.f32 %v1913_v10, %v1912_v8  ;;  %v1915_v16 = vpop.f32.mrb[26].mxu0  ;;  %v1959_v19 = vpop.f32.mrb[39].mxu1 }
 0x129   :  { %v1916_v20 = vpop.f32.mrb[27].mxu0  ;;  %v1960_v21 = vadd.f32 %v1959_v19, %v1958_v12 }
 0x12a   :  { %v2932_v23 = vadd.f32 %v1914_v14, %v477_v29 }
 0x12d   :  { %v1961_v24 = vpop.f32.mrb[40].mxu1 }
 0x12e   :  { %v753_v25 = vpop.f32.mrb[28].mxu0  ;;  %v1962_v18 = vpop.f32.mrb[41].mxu1 }
 0x12f   :  { %v2934_v26 = vadd.f32 %v1945_v44, %v753_v25  ;;  %v2166_v22 = vpop.f32.mrb[29].mxu0  ;;  %v1963_v2 = vadd.f32 %v1962_v18, %v1961_v24  ;;  %v1964_v5 = vpop.f32.mrb[42].mxu1 }
 0x130   :  { %v756_v30 = vpop.f32.mrb[30].mxu0  ;;  %v1965_v31 = vpop.f32.mrb[43].mxu1 }
 0x131   :  { %v807_v32 = vmax.f32 %v2908_v0, %v2934_v26  ;;  %v2938_v33 = vadd.f32 %v1948_v50, %v756_v30  ;;  %v2167_v34 = vpop.f32.mrb[31].mxu0  ;;  %v1966_v35 = vadd.f32 %v1965_v31, %v1964_v5 }
 0x133   :  { %v808_v29 = vmax.f32 %v2910_v13, %v2938_v33 }
 0x135   :  { %v1967_v36 = vpop.f32.mrb[44].mxu1 }
 0x136   :  { %v761_v38 = vpop.f32.mrb[32].mxu0  ;;  %v1968_v40 = vpop.f32.mrb[45].mxu1 }
 0x137   :  { %v2942_v41 = vadd.f32 %v1951_v58, %v761_v38  ;;  %v2170_v42 = vpop.f32.mrb[33].mxu0  ;;  %v1969_v43 = vadd.f32 %v1968_v40, %v1967_v36  ;;  %v1970_v44 = vpop.f32.mrb[46].mxu1 }
 0x138   :  { %v764_v45 = vpop.f32.mrb[34].mxu0  ;;  %v1971_v46 = vpop.f32.mrb[47].mxu1 }
 0x139   :  { %v809_v47 = vmax.f32 %v2912_v15, %v2942_v41  ;;  %v2946_v48 = vadd.f32 %v1954_v1, %v764_v45  ;;  %v2171_v49 = vpop.f32.mrb[35].mxu0  ;;  %v1972_v50 = vadd.f32 %v1971_v46, %v1970_v44 }
 0x13b   :  { %v810_v52 = vmax.f32 %v2914_v17, %v2946_v48 }
 0x13d   :  { %v1973_v54 = vpop.f32.mrb[48].mxu1 }
 0x13e   :  { %v769_v55 = vpop.f32.mrb[36].mxu0  ;;  %v1974_v56 = vpop.f32.mrb[49].mxu1 }
 0x13f   :  { %v2950_v57 = vadd.f32 %v1957_v11, %v769_v55  ;;  %v2174_v58 = vpop.f32.mrb[37].mxu0  ;;  %v1975_v59 = vadd.f32 %v1974_v56, %v1973_v54  ;;  %v1976_v60 = vpop.f32.mrb[50].mxu1 }
 0x140   :  { %v772_v61 = vpop.f32.mrb[38].mxu0  ;;  %v1977_v62 = vpop.f32.mrb[51].mxu1 }
 0x141   :  { %v811_v63 = vmax.f32 %v2916_v27, %v2950_v57  ;;  %v2954_v1 = vadd.f32 %v1960_v21, %v772_v61  ;;  %v2175_v4 = vpop.f32.mrb[39].mxu0  ;;  %v1978_v3 = vadd.f32 %v1977_v62, %v1976_v60 }
 0x143   :  { %v812_v8 = vmax.f32 %v2918_v28, %v2954_v1 }
 0x145   :  { %v1979_v9 = vpop.f32.mrb[52].mxu1 }
 0x146   :  { %v777_v10 = vpop.f32.mrb[40].mxu0  ;;  %v1980_v12 = vpop.f32.mrb[53].mxu1 }
 0x147   :  { %v2958_v11 = vadd.f32 %v1963_v2, %v777_v10  ;;  %v2178_v14 = vpop.f32.mrb[41].mxu0  ;;  %v1981_v16 = vadd.f32 %v1980_v12, %v1979_v9  ;;  %v1982_v19 = vpop.f32.mrb[54].mxu1 }
 0x148   :  { %v780_v20 = vpop.f32.mrb[42].mxu0  ;;  %v1983_v24 = vpop.f32.mrb[55].mxu1 }
 0x149   :  { %v813_v25 = vmax.f32 %v2920_v37, %v2958_v11  ;;  %v2962_v21 = vadd.f32 %v1966_v35, %v780_v20  ;;  %v2179_v18 = vpop.f32.mrb[43].mxu0 }
 0x14b   :  { %v814_v22 = vmax.f32 %v2922_v39, %v2962_v21 }
 0x14d   :  { %v2010_v5 = vpop.f32.mrb[56].mxu1 }
 0x14e   :  { %v785_v30 = vpop.f32.mrb[44].mxu0  ;;  %v2011_v31 = vpop.f32.mrb[57].mxu1 }
 0x14f   :  { %v2966_v34 = vadd.f32 %v1969_v43, %v785_v30  ;;  %v2182_v2 = vpop.f32.mrb[45].mxu0  ;;  %v2012_v36 = vadd.f32 %v2011_v31, %v2010_v5  ;;  %v2013_v38 = vpop.f32.mrb[58].mxu1 }
 0x150   :  { %v788_v40 = vpop.f32.mrb[46].mxu0  ;;  %v2014_v42 = vpop.f32.mrb[59].mxu1 }
 0x151   :  { %v815_v44 = vmax.f32 %v2924_v51, %v2966_v34  ;;  %v2970_v45 = vadd.f32 %v1972_v50, %v788_v40  ;;  %v2183_v35 = vpop.f32.mrb[47].mxu0  ;;  %v2015_v46 = vadd.f32 %v2014_v42, %v2013_v38 }
 0x153   :  { %v816_v49 = vmax.f32 %v2926_v53, %v2970_v45 }
 0x155   :  { %v2016_v54 = vpop.f32.mrb[60].mxu1 }
 0x156   :  { %v793_v55 = vpop.f32.mrb[48].mxu0  ;;  %v2017_v56 = vpop.f32.mrb[61].mxu1 }
 0x157   :  { %v2974_v43 = vadd.f32 %v1975_v59, %v793_v55  ;;  %v2186_v58 = vpop.f32.mrb[49].mxu0  ;;  %v2018_v60 = vadd.f32 %v2017_v56, %v2016_v54  ;;  %v2019_v61 = vpop.f32.mrb[62].mxu1 }
 0x158   :  { %v796_v62 = vpop.f32.mrb[50].mxu0  ;;  %v2020_v4 = vpop.f32.mrb[63].mxu1 }
 0x159   :  { %v817_v9 = vmax.f32 %v2928_v7, %v2974_v43  ;;  %v2978_v50 = vadd.f32 %v1978_v3, %v796_v62  ;;  %v2187_v10 = vpop.f32.mrb[51].mxu0  ;;  %v2021_v12 = vadd.f32 %v2020_v4, %v2019_v61 }
 0x15b   :  { %v818_v14 = vmax.f32 %v2930_v6, %v2978_v50 }
 0x15d   :  { %v2022_v19 = vpop.f32.mrb[64].mxu1 }
 0x15e   :  { %v801_v20 = vpop.f32.mrb[52].mxu0  ;;  %v2023_v24 = vpop.f32.mrb[65].mxu1 }
 0x15f   :  { %v2982_v59 = vadd.f32 %v1981_v16, %v801_v20  ;;  %v2190_v18 = vpop.f32.mrb[53].mxu0  ;;  %v2024_v5 = vadd.f32 %v2023_v24, %v2022_v19  ;;  %v2025_v30 = vpop.f32.mrb[66].mxu1 }
 0x160   :  { %v804_v31 = vpop.f32.mrb[54].mxu0  ;;  %v2026_v2 = vpop.f32.mrb[67].mxu1 }
 0x161   :  { %v819_v38 = vmax.f32 %v2932_v23, %v2982_v59  ;;  %v2191_v3 = vpop.f32.mrb[55].mxu0  ;;  %v2027_v40 = vadd.f32 %v2026_v2, %v2025_v30 }
 0x165   :  { %v2028_v42 = vpop.f32.mrb[68].mxu1 }
 0x166   :  { %v1090_v35 = vpop.f32.mrb[56].mxu0  ;;  %v2029_v54 = vpop.f32.mrb[69].mxu1 }
 0x167   :  { %v1091_v55 = vadd.f32 %v2012_v36, %v1090_v35  ;;  %v2198_v56 = vpop.f32.mrb[57].mxu0  ;;  %v2030_v58 = vadd.f32 %v2029_v54, %v2028_v42  ;;  %v2031_v61 = vpop.f32.mrb[70].mxu1 }
 0x168   :  { %v1093_v62 = vpop.f32.mrb[58].mxu0  ;;  %v2032_v16 = vpop.f32.mrb[71].mxu1 }
 0x169   :  { %v2989_v4 = vmax.f32 %v807_v32, %v1091_v55  ;;  %v1094_v10 = vadd.f32 %v2015_v46, %v1093_v62  ;;  %v2199_v19 = vpop.f32.mrb[59].mxu0  ;;  %v2033_v20 = vadd.f32 %v2032_v16, %v2031_v61 }
 0x16b   :  { %v2994_v24 = vmax.f32 %v808_v29, %v1094_v10 }
 0x16d   :  { %v2034_v18 = vpop.f32.mrb[72].mxu1 }
 0x16e   :  { %v1098_v36 = vpop.f32.mrb[60].mxu0  ;;  %v2035_v30 = vpop.f32.mrb[73].mxu1 }
 0x16f   :  { %v1099_v31 = vadd.f32 %v2018_v60, %v1098_v36  ;;  %v2202_v2 = vpop.f32.mrb[61].mxu0  ;;  %v2036_v3 = vadd.f32 %v2035_v30, %v2034_v18  ;;  %v2037_v42 = vpop.f32.mrb[74].mxu1 }
 0x170   :  { %v1101_v35 = vpop.f32.mrb[62].mxu0  ;;  %v2038_v54 = vpop.f32.mrb[75].mxu1 }
 0x171   :  { %v2999_v0 = vmax.f32 %v809_v47, %v1099_v31  ;;  %v1102_v26 = vadd.f32 %v2021_v12, %v1101_v35  ;;  %v2203_v32 = vpop.f32.mrb[63].mxu0  ;;  %v2039_v46 = vadd.f32 %v2038_v54, %v2037_v42 }
 0x173   :  { %v3004_v13 = vmax.f32 %v810_v52, %v1102_v26 }
 0x175   :  { %v2040_v33 = vpop.f32.mrb[76].mxu1 }
 0x176   :  { %v1106_v29 = vpop.f32.mrb[64].mxu0  ;;  %v2041_v60 = vpop.f32.mrb[77].mxu1 }
 0x177   :  { %v1107_v55 = vadd.f32 %v2024_v5, %v1106_v29  ;;  %v2206_v56 = vpop.f32.mrb[65].mxu0  ;;  %v2042_v61 = vadd.f32 %v2041_v60, %v2040_v33  ;;  %v2043_v62 = vpop.f32.mrb[78].mxu1 }
 0x178   :  { %v1109_v16 = vpop.f32.mrb[66].mxu0  ;;  %v2044_v10 = vpop.f32.mrb[79].mxu1 }
 0x179   :  { %v3009_v15 = vmax.f32 %v811_v63, %v1107_v55  ;;  %v1110_v41 = vadd.f32 %v2027_v40, %v1109_v16  ;;  %v2207_v47 = vpop.f32.mrb[67].mxu0  ;;  %v2045_v12 = vadd.f32 %v2044_v10, %v2043_v62 }
 0x17b   :  { %v3014_v17 = vmax.f32 %v812_v8, %v1110_v41 }
 0x17d   :  { %v2046_v48 = vpop.f32.mrb[80].mxu1 }
 0x17e   :  { %v1114_v52 = vpop.f32.mrb[68].mxu0  ;;  %v2047_v5 = vpop.f32.mrb[81].mxu1 }
 0x17f   :  { %v1115_v19 = vadd.f32 %v2030_v58, %v1114_v52  ;;  %v2210_v18 = vpop.f32.mrb[69].mxu0  ;;  %v2048_v36 = vadd.f32 %v2047_v5, %v2046_v48  ;;  %v2049_v30 = vpop.f32.mrb[82].mxu1 }
 0x180   :  { %v1117_v31 = vpop.f32.mrb[70].mxu0  ;;  %v2050_v2 = vpop.f32.mrb[83].mxu1 }
 0x181   :  { %v3019_v27 = vmax.f32 %v813_v25, %v1115_v19  ;;  %v1118_v57 = vadd.f32 %v2033_v20, %v1117_v31  ;;  %v2211_v63 = vpop.f32.mrb[71].mxu0 }
 0x183   :  { %v3024_v28 = vmax.f32 %v814_v22, %v1118_v57 }
 0x185   :  { %v2077_v1 = vpop.f32.mrb[84].mxu1 }
 0x186   :  { %v1122_v8 = vpop.f32.mrb[72].mxu0  ;;  %v2078_v40 = vpop.f32.mrb[85].mxu1 }
 0x187   :  { %v1123_v58 = vadd.f32 %v2036_v3, %v1122_v8  ;;  %v2214_v42 = vpop.f32.mrb[73].mxu0  ;;  %v2079_v35 = vadd.f32 %v2078_v40, %v2077_v1  ;;  %v2080_v54 = vpop.f32.mrb[86].mxu1 }
 0x188   :  { %v1125_v26 = vpop.f32.mrb[74].mxu0  ;;  %v2081_v32 = vpop.f32.mrb[87].mxu1 }
 0x189   :  { %v3029_v37 = vmax.f32 %v815_v44, %v1123_v58  ;;  %v1126_v11 = vadd.f32 %v2039_v46, %v1125_v26  ;;  %v2215_v25 = vpop.f32.mrb[75].mxu0  ;;  %v2082_v20 = vadd.f32 %v2081_v32, %v2080_v54 }
 0x18b   :  { %v3034_v39 = vmax.f32 %v816_v49, %v1126_v11 }
 0x18d   :  { %v2083_v21 = vpop.f32.mrb[88].mxu1 }
 0x18e   :  { %v1130_v22 = vpop.f32.mrb[76].mxu0  ;;  %v2084_v3 = vpop.f32.mrb[89].mxu1 }
 0x18f   :  { %v1131_v33 = vadd.f32 %v2042_v61, %v1130_v22  ;;  %v2218_v29 = vpop.f32.mrb[77].mxu0  ;;  %v2085_v60 = vadd.f32 %v2084_v3, %v2083_v21  ;;  %v2086_v55 = vpop.f32.mrb[90].mxu1 }
 0x190   :  { %v1133_v56 = vpop.f32.mrb[78].mxu0  ;;  %v2087_v62 = vpop.f32.mrb[91].mxu1 }
 0x191   :  { %v3039_v51 = vmax.f32 %v817_v9, %v1131_v33  ;;  %v1134_v34 = vadd.f32 %v2045_v12, %v1133_v56  ;;  %v2219_v44 = vpop.f32.mrb[79].mxu0  ;;  %v2088_v46 = vadd.f32 %v2087_v62, %v2086_v55 }
 0x193   :  { %v3044_v53 = vmax.f32 %v818_v14, %v1134_v34 }
 0x195   :  { %v2089_v45 = vpop.f32.mrb[92].mxu1 }
 0x196   :  { %v1138_v49 = vpop.f32.mrb[80].mxu0  ;;  %v2090_v61 = vpop.f32.mrb[93].mxu1 }
 0x197   :  { %v1139_v16 = vadd.f32 %v2048_v36, %v1138_v49  ;;  %v2222_v10 = vpop.f32.mrb[81].mxu0  ;;  %v2091_v41 = vadd.f32 %v2090_v61, %v2089_v45  ;;  %v2092_v47 = vpop.f32.mrb[94].mxu1  ;;  %v3058_v36 = vld [vmem:[%s3156_s2] ss:$0 sm:$0xff] }
 0x198   :  { %v1141_v48 = vpop.f32.mrb[82].mxu0  ;;  %v2093_v52 = vpop.f32.mrb[95].mxu1 }
 0x199   :  { %v3049_v7 = vmax.f32 %v819_v38, %v1139_v16  ;;  %v2223_v43 = vpop.f32.mrb[83].mxu0  ;;  %v3051_v9 = vadd.f32 %v2093_v52, %v2092_v47 }
 0x19d   :  { %v2095_v6 = vpop.f32.mrb[96].mxu1 }
 0x19e   :  { %v1427_v50 = vpop.f32.mrb[84].mxu0  ;;  %v2096_v14 = vpop.f32.mrb[97].mxu1 }
 0x19f   :  { %v1428_v12 = vadd.f32 %v2079_v35, %v1427_v50  ;;  %v2230_v5 = vpop.f32.mrb[85].mxu0  ;;  %v3053_v19 = vadd.f32 %v2096_v14, %v2095_v6  ;;  %v2098_v18 = vpop.f32.mrb[98].mxu1 }
 0x1a0   :  { %v1430_v30 = vpop.f32.mrb[86].mxu0  ;;  %v2099_v23 = vpop.f32.mrb[99].mxu1 }
 0x1a1   :  { %v1481_v59 = vmax.f32 %v2989_v4, %v1428_v12  ;;  %v1431_v38 = vadd.f32 %v2082_v20, %v1430_v30  ;;  %v2231_v31 = vpop.f32.mrb[87].mxu0  ;;  %v3061_v2 = vadd.f32 %v2099_v23, %v2098_v18 }
 0x1a3   :  { %v1501_v57 = vadd.f32 %v3058_v36, %v1481_v59  ;;  %v1482_v63 = vmax.f32 %v2994_v24, %v1431_v38 }
 0x1a5   :  { %vm1514_vm2 = vcmp.ge.f32.partialorder %v1501_v57, 0.0  ;;  %v1527_v1 = vmul.f32 0.1, %v1501_v57  ;;  %v1502_v8 = vadd.f32 %v3058_v36, %v1482_v63  ;;  %v2101_v40 = vpop.f32.mrb[100].mxu1 }
 0x1a6   :  { %v1435_v58 = vpop.f32.mrb[88].mxu0  ;;  %v2102_v42 = vpop.f32.mrb[101].mxu1 }
 0x1a7   :  { %v1540_v35 = vsel %vm1514_vm2, %v1501_v57, %v1527_v1  ;;  %vm1515_vm4 = vcmp.ge.f32.partialorder %v1502_v8, 0.0  ;;  %v1528_v54 = vmul.f32 0.1, %v1502_v8  ;;  %v1436_v4 = vadd.f32 %v2085_v60, %v1435_v58  ;;  %v2234_v26 = vpop.f32.mrb[89].mxu0  ;;  %v2104_v32 = vpop.f32.mrb[102].mxu1 }
 0x1a8   :  { %v1847_v11 = vpack.c.bf16 %v1540_v35, %v1540_v35  ;;  %v1438_v25 = vpop.f32.mrb[90].mxu0  ;;  %v3066_v20 = vadd.f32 %v2102_v42, %v2101_v40  ;;  %v2105_v21 = vpop.f32.mrb[103].mxu1 }
 0x1a9   :  { %v1541_v24 = vsel %vm1515_vm4, %v1502_v8, %v1528_v54  ;;  %v1483_v22 = vmax.f32 %v2999_v0, %v1436_v4  ;;  %v1439_v3 = vadd.f32 %v2088_v46, %v1438_v25  ;;  %v2235_v33 = vpop.f32.mrb[91].mxu0  ;;  %v3069_v29 = vadd.f32 %v2105_v21, %v2104_v32 }
 0x1aa   :  { %1607 = vst.msk [vmem:[%s3157_s3] sm:$0xf] %vm1606_vm3, %v1847_v11  ;;  %v1848_v60 = vpack.c.bf16 %v1541_v24, %v1541_v24 }
 0x1ab   :  { %v1503_v55 = vadd.f32 %v3058_v36, %v1483_v22  ;;  %v1484_v56 = vmax.f32 %v3004_v13, %v1439_v3 }
 0x1ac   :  { %1608 = vst.msk [vmem:[%s3157_s3 + $0x4] sm:$0xf] %vm1606_vm3, %v1848_v60 }
 0x1ad   :  { %vm1516_vm5 = vcmp.ge.f32.partialorder %v1503_v55, 0.0  ;;  %v1529_v0 = vmul.f32 0.1, %v1503_v55  ;;  %v1504_v62 = vadd.f32 %v3058_v36, %v1484_v56  ;;  %v2107_v34 = vpop.f32.mrb[104].mxu1 }
 0x1ae   :  { %v1443_v44 = vpop.f32.mrb[92].mxu0  ;;  %v2108_v46 = vpop.f32.mrb[105].mxu1 }
 0x1af   :  { %v1542_v45 = vsel %vm1516_vm5, %v1503_v55, %v1529_v0  ;;  %vm1517_vm6 = vcmp.ge.f32.partialorder %v1504_v62, 0.0  ;;  %v1530_v49 = vmul.f32 0.1, %v1504_v62  ;;  %v1444_v61 = vadd.f32 %v2091_v41, %v1443_v44  ;;  %v2238_v16 = vpop.f32.mrb[93].mxu0  ;;  %v2110_v10 = vpop.f32.mrb[106].mxu1 }
 0x1b0   :  { %v1849_v47 = vpack.c.bf16 %v1542_v45, %v1542_v45  ;;  %v1446_v13 = vpop.f32.mrb[94].mxu0  ;;  %v3082_v48 = vadd.f32 %v2108_v46, %v2107_v34  ;;  %v2111_v52 = vpop.f32.mrb[107].mxu1 }
 0x1b1   :  { %v1543_v43 = vsel %vm1517_vm6, %v1504_v62, %v1530_v49  ;;  %v1485_v6 = vmax.f32 %v3009_v15, %v1444_v61  ;;  %v1447_v50 = vadd.f32 %v3051_v9, %v1446_v13  ;;  %v2239_v14 = vpop.f32.mrb[95].mxu0  ;;  %v3086_v12 = vadd.f32 %v2111_v52, %v2110_v10 }
 0x1b2   :  { %1609 = vst.msk [vmem:[%s3157_s3 + $0x8] sm:$0xf] %vm1606_vm3, %v1849_v47  ;;  %v1850_v41 = vpack.c.bf16 %v1543_v43, %v1543_v43 }
 0x1b3   :  { %v1505_v5 = vadd.f32 %v3058_v36, %v1485_v6  ;;  %v1486_v18 = vmax.f32 %v3014_v17, %v1447_v50 }
 0x1b4   :  { %1610 = vst.msk [vmem:[%s3157_s3 + $0xc] sm:$0xf] %vm1606_vm3, %v1850_v41 }
 0x1b5   :  { %vm1518_vm7 = vcmp.ge.f32.partialorder %v1505_v5, 0.0  ;;  %v1531_v15 = vmul.f32 0.1, %v1505_v5  ;;  %v1506_v9 = vadd.f32 %v3058_v36, %v1486_v18  ;;  %v2113_v30 = vpop.f32.mrb[108].mxu1 }
 0x1b6   :  { %v1451_v23 = vpop.f32.mrb[96].mxu0  ;;  %v2114_v59 = vpop.f32.mrb[109].mxu1 }
 0x1b7   :  { %v1544_v38 = vsel %vm1518_vm7, %v1505_v5, %v1531_v15  ;;  %vm1519_vm8 = vcmp.ge.f32.partialorder %v1506_v9, 0.0  ;;  %v1532_v31 = vmul.f32 0.1, %v1506_v9  ;;  %v1452_v57 = vadd.f32 %v3053_v19, %v1451_v23  ;;  %v2242_v63 = vpop.f32.mrb[97].mxu0  ;;  %v2116_v1 = vpop.f32.mrb[110].mxu1 }
 0x1b8   :  { %v1851_v17 = vpack.c.bf16 %v1544_v38, %v1544_v38  ;;  %v1454_v8 = vpop.f32.mrb[98].mxu0  ;;  %v2115_v40 = vadd.f32 %v2114_v59, %v2113_v30  ;;  %v2117_v58 = vpop.f32.mrb[111].mxu1 }
 0x1b9   :  { %v1545_v42 = vsel %vm1519_vm8, %v1506_v9, %v1532_v31  ;;  %v1487_v35 = vmax.f32 %v3019_v27, %v1452_v57  ;;  %v1455_v54 = vadd.f32 %v3061_v2, %v1454_v8  ;;  %v2243_v4 = vpop.f32.mrb[99].mxu0 }
 0x1ba   :  { %1611 = vst.msk [vmem:[%s3157_s3 + $0x10] sm:$0xf] %vm1606_vm3, %v1851_v17  ;;  %v1852_v26 = vpack.c.bf16 %v1545_v42, %v1545_v42 }
 0x1bb   :  { %v1507_v19 = vadd.f32 %v3058_v36, %v1487_v35  ;;  %v1488_v32 = vmax.f32 %v3024_v28, %v1455_v54 }
 0x1bc   :  { %1612 = vst.msk [vmem:[%s3157_s3 + $0x14] sm:$0xf] %vm1606_vm3, %v1852_v26 }
 0x1bd   :  { %vm1520_vm9 = vcmp.ge.f32.partialorder %v1507_v19, 0.0  ;;  %v1533_v27 = vmul.f32 0.1, %v1507_v19  ;;  %v1508_v2 = vadd.f32 %v3058_v36, %v1488_v32  ;;  %v1475_v11 = vpop.f32.mrb[112].mxu1 }
 0x1be   :  { %v1476_v25 = vadd.f32 %v2115_v40, %v1475_v11  ;;  %v1459_v21 = vpop.f32.mrb[100].mxu0  ;;  %v2254_v24 = vpop.f32.mrb[113].mxu1 }
 0x1bf   :  { %v1546_v22 = vsel %vm1520_vm9, %v1507_v19, %v1533_v27  ;;  %vm1521_vm10 = vcmp.ge.f32.partialorder %v1508_v2, 0.0  ;;  %v1534_v3 = vmul.f32 0.1, %v1508_v2  ;;  %v1460_v33 = vadd.f32 %v3066_v20, %v1459_v21  ;;  %v2246_v60 = vpop.f32.mrb[101].mxu0  ;;  %v1478_v28 = vpop.f32.mrb[114].mxu1 }
 0x1c0   :  { %v1853_v55 = vpack.c.bf16 %v1546_v22, %v1546_v22  ;;  %v1493_v56 = vmax.f32 %v3049_v7, %v1476_v25  ;;  %v1462_v0 = vpop.f32.mrb[102].mxu0  ;;  %v2255_v62 = vpop.f32.mrb[115].mxu1 }
 0x1c1   :  { %v1547_v34 = vsel %vm1521_vm10, %v1508_v2, %v1534_v3  ;;  %v1489_v44 = vmax.f32 %v3029_v37, %v1460_v33  ;;  %v1463_v46 = vadd.f32 %v3069_v29, %v1462_v0  ;;  %v2247_v45 = vpop.f32.mrb[103].mxu0 }
 0x1c2   :  { %1613 = vst.msk [vmem:[%s3157_s3 + $0x18] sm:$0xf] %vm1606_vm3, %v1853_v55  ;;  %v1854_v49 = vpack.c.bf16 %v1547_v34, %v1547_v34  ;;  %v1513_v20 = vadd.f32 %v3058_v36, %v1493_v56 }
 0x1c3   :  { %v1509_v61 = vadd.f32 %v3058_v36, %v1489_v44  ;;  %v1490_v7 = vmax.f32 %v3034_v39, %v1463_v46 }
 0x1c4   :  { %1614 = vst.msk [vmem:[%s3157_s3 + $0x1c] sm:$0xf] %vm1606_vm3, %v1854_v49  ;;  %vm1526_vm11 = vcmp.ge.f32.partialorder %v1513_v20, 0.0  ;;  %v1539_v37 = vmul.f32 0.1, %v1513_v20 }
 0x1c5   :  { %vm1522_vm12 = vcmp.ge.f32.partialorder %v1509_v61, 0.0  ;;  %v1535_v29 = vmul.f32 0.1, %v1509_v61  ;;  %v1510_v16 = vadd.f32 %v3058_v36, %v1490_v7 }
 0x1c6   :  { %v1552_v10 = vsel %vm1526_vm11, %v1513_v20, %v1539_v37  ;;  %v1467_v47 = vpop.f32.mrb[104].mxu0 }
 0x1c7   :  { %v1859_v13 = vpack.c.bf16 %v1552_v10, %v1552_v10  ;;  %v1548_v52 = vsel %vm1522_vm12, %v1509_v61, %v1535_v29  ;;  %vm1523_vm14 = vcmp.ge.f32.partialorder %v1510_v16, 0.0  ;;  %v1536_v43 = vmul.f32 0.1, %v1510_v16  ;;  %v2250_v6 = vpop.f32.mrb[105].mxu0 }
 0x1c8   :  { %v1855_v39 = vpack.c.bf16 %v1548_v52, %v1548_v52  ;;  %v1468_v50 = vadd.f32 %v3082_v48, %v1467_v47  ;;  %v1470_v14 = vpop.f32.mrb[106].mxu0 }
 0x1c9   :  { %1620 = vst.msk [vmem:[%s3157_s3 + $0x30] sm:$0x1] %vm1619_vm13, %v1859_v13  ;;  %v1549_v41 = vsel %vm1523_vm14, %v1510_v16, %v1536_v43  ;;  %v1471_v5 = vadd.f32 %v3086_v12, %v1470_v14  ;;  %v2251_v18 = vpop.f32.mrb[107].mxu0 }
 0x1ca   :  { %1615 = vst.msk [vmem:[%s3157_s3 + $0x20] sm:$0xf] %vm1606_vm3, %v1855_v39  ;;  %v1856_v15 = vpack.c.bf16 %v1549_v41, %v1549_v41  ;;  %v1491_v9 = vmax.f32 %v3039_v51, %v1468_v50 }
 0x1cb   :  { %v1492_v30 = vmax.f32 %v3044_v53, %v1471_v5 }
 0x1cc   :  { %1616 = vst.msk [vmem:[%s3157_s3 + $0x24] sm:$0xf] %vm1606_vm3, %v1856_v15  ;;  %v1511_v48 = vadd.f32 %v3058_v36, %v1491_v9 }
 0x1cd   :  { %v1512_v12 = vadd.f32 %v3058_v36, %v1492_v30 }
 0x1ce   :  { %vm1524_vm15 = vcmp.ge.f32.partialorder %v1511_v48, 0.0  ;;  %v1537_v23 = vmul.f32 0.1, %v1511_v48 }
 0x1cf   :  { %vm1525_vm0 = vcmp.ge.f32.partialorder %v1512_v12, 0.0  ;;  %v1538_v59 = vmul.f32 0.1, %v1512_v12 }
 0x1d0   :  { %v1550_v38 = vsel %vm1524_vm15, %v1511_v48, %v1537_v23 }
 0x1d1   :  { %v1857_v31 = vpack.c.bf16 %v1550_v38, %v1550_v38  ;;  %v1551_v57 = vsel %vm1525_vm0, %v1512_v12, %v1538_v59 }
 0x1d2   :  { %v1858_v63 = vpack.c.bf16 %v1551_v57, %v1551_v57 }
 0x1d3   :  { %1617 = vst.msk [vmem:[%s3157_s3 + $0x28] sm:$0xf] %vm1606_vm3, %v1857_v31 }
 0x1d4   :  { %1618 = vst.msk [vmem:[%s3157_s3 + $0x2c] sm:$0xf] %vm1606_vm3, %v1858_v63 }

// kernel: cnn_forward.6
= control target key start
LH: loop header
LB: loop body
LE: loop exit
PB: predicated region body
PF: predicated region fallthrough
CT: control target
= control target key end

     0   :  { %vm354_vm0 = vcmask 523264   ;;  %s2144_s1 = inlined_call_operand.vmem [shape: bf16[576,128], index: 1, kind: input, shape index: {}]   ;;  %s2145_s0 = inlined_call_operand.vmem [shape: bf16[4,18,576], index: 0, kind: input, shape index: {}]   ;;  %s2146_s2 = inlined_call_operand.vmem [shape: f32[1,128], index: 2, kind: input, shape index: {}]   ;;  %s2147_s3 = inlined_call_operand.vmem [shape: bf16[18,128], index: 3, kind: output, shape index: {}]  }
   0x1   :  { %v1685_v0 = vld [vmem:[%s2144_s1 + $0x40] sm:$0xff]   ;;  %v1708_v4 = vld [vmem:[%s2144_s1 + $0x48] sm:$0xff]   ;;  %v1732_v8 = vld [vmem:[%s2144_s1 + $0x50] sm:$0xff]  }
   0x2   :  { %v1690_v1 = vld [vmem:[%s2144_s1 + $0xc0] sm:$0xff]   ;;  %1282 = vmatprep.subr.bf16.mxu0 %v1685_v0  ;;  %v1714_v5 = vld [vmem:[%s2144_s1 + $0xc8] sm:$0xff]   ;;  %v1738_v9 = vld [vmem:[%s2144_s1 + $0xd0] sm:$0xff]  }
   0x3   :  { %v1696_v2 = vld [vmem:[%s2144_s1] sm:$0xff]   ;;  %1310 = vmatprep.subr.bf16.mxu1 %v1690_v1  ;;  %v1720_v6 = vld [vmem:[%s2144_s1 + $0x8] sm:$0xff]   ;;  %v1744_v10 = vld [vmem:[%s2144_s1 + $0x10] sm:$0xff]  }
   0x4   :  { %v1702_v3 = vld [vmem:[%s2144_s1 + $0x80] sm:$0xff]   ;;  %1283 = vmatpush3.bf16.msra.mxu0 %v1696_v2  ;;  %v1726_v7 = vld [vmem:[%s2144_s1 + $0x88] sm:$0xff]   ;;  %v1750_v11 = vld [vmem:[%s2144_s1 + $0x90] sm:$0xff]  }
   0x5   :  { %1311 = vmatpush3.bf16.msra.mxu1 %v1702_v3  ;;  %1284 = vmatprep.subr.bf16.mxu0 %v1708_v4  ;;  %v1756_v12 = vld [vmem:[%s2144_s1 + $0x58] sm:$0xff]   ;;  %v1780_v16 = vld [vmem:[%s2144_s1 + $0x60] sm:$0xff]   ;;  %v1804_v20 = vld [vmem:[%s2144_s1 + $0x68] sm:$0xff]  }
   0x6   :  { %1312 = vmatprep.subr.bf16.mxu1 %v1714_v5  ;;  %v1762_v13 = vld [vmem:[%s2144_s1 + $0xd8] sm:$0xff]   ;;  %v1786_v17 = vld [vmem:[%s2144_s1 + $0xe0] sm:$0xff]   ;;  %v1810_v21 = vld [vmem:[%s2144_s1 + $0xe8] sm:$0xff]  }
   0x7   :  { %v1768_v14 = vld [vmem:[%s2144_s1 + $0x18] sm:$0xff]   ;;  %v1792_v18 = vld [vmem:[%s2144_s1 + $0x20] sm:$0xff]   ;;  %v1816_v22 = vld [vmem:[%s2144_s1 + $0x28] sm:$0xff]  }
   0x8   :  { %1285 = vmatpush3.bf16.msra.mxu0 %v1720_v6  ;;  %v1774_v15 = vld [vmem:[%s2144_s1 + $0x98] sm:$0xff]   ;;  %v1798_v19 = vld [vmem:[%s2144_s1 + $0xa0] sm:$0xff]   ;;  %v1822_v23 = vld [vmem:[%s2144_s1 + $0xa8] sm:$0xff]  }
   0x9   :  { %1313 = vmatpush3.bf16.msra.mxu1 %v1726_v7  ;;  %1286 = vmatprep.subr.bf16.mxu0 %v1732_v8  ;;  %v1828_v24 = vld [vmem:[%s2144_s1 + $0x70] sm:$0xff]   ;;  %v1852_v28 = vld [vmem:[%s2144_s1 + $0x78] sm:$0xff]   ;;  %v1615_v35 = vld [vmem:[%s2145_s0 + $0xc] ss:$20 sps:$4 sm:$0xff]  }
   0xa   :  { %1314 = vmatprep.subr.bf16.mxu1 %v1738_v9  ;;  %v1834_v25 = vld [vmem:[%s2144_s1 + $0xf0] sm:$0xff]   ;;  %v1858_v29 = vld [vmem:[%s2144_s1 + $0xf8] sm:$0xff]   ;;  %v1890_v36 = vld [vmem:[%s2144_s1 + $0x100] sm:$0xff]   ;;  %441 = vmatprep.mubr.bf16.mxu1 %v1615_v35 }
   0xb   :  { %v1840_v26 = vld [vmem:[%s2144_s1 + $0x30] sm:$0xff]   ;;  %v1864_v30 = vld [vmem:[%s2144_s1 + $0x38] sm:$0xff]   ;;  %v1895_v37 = vld [vmem:[%s2144_s1 + $0x108] sm:$0xff]  }
   0xc   :  { %1287 = vmatpush3.bf16.msra.mxu0 %v1744_v10  ;;  %v1846_v27 = vld [vmem:[%s2144_s1 + $0xb0] sm:$0xff]   ;;  %v1870_v31 = vld [vmem:[%s2144_s1 + $0xb8] sm:$0xff]   ;;  %v93_v38 = vld [vmem:[%s2145_s0 + $0x28] sm:$0x11] }
   0xd   :  { %1315 = vmatpush3.bf16.msra.mxu1 %v1750_v11  ;;  %1288 = vmatprep.subr.bf16.mxu0 %v1756_v12  ;;  %v1610_v32 = vld [vmem:[%s2145_s0] ss:$20 sps:$4 sm:$0xff]   ;;  %v1612_v33 = vld [vmem:[%s2145_s0 + $0x4] ss:$20 sps:$4 sm:$0xff]   ;;  %v1613_v34 = vld [vmem:[%s2145_s0 + $0x8] ss:$20 sps:$4 sm:$0xff]   ;;  %v1165_v39 = vcombine.high %v93_v38, %v93_v38  ;;  %v1164_v43 = vcombine.low %v93_v38, %v93_v38 }
   0xe   :  { %1316 = vmatprep.subr.bf16.mxu1 %v1762_v13  ;;  %393 = vmatprep.mubr.bf16.mxu0 %v1612_v33  ;;  %v94_v40 = vld [vmem:[%s2145_s0 + $0x30] sm:$0x11]  ;;  %v1923_v46 = vld [vmem:[%s2144_s1 + $0x118] sm:$0xff]   ;;  %v1213_v51 = vld [vmem:[%s2145_s0 + $0x64] sm:$0x11] }
   0xf   :  { %v1167_v41 = vcombine.high %v94_v40, %v94_v40  ;;  %v1911_v42 = vld [vmem:[%s2144_s1 + $0x110] sm:$0xff]   ;;  %v1166_v44 = vcombine.low %v94_v40, %v94_v40  ;;  %v1625_v48 = vld [vmem:[%s2145_s0 + $0x38] ss:$0 sps:$4 sm:$0x11]   ;;  %v1633_v49 = vld [vmem:[%s2145_s0 + $0x48] ss:$20 sps:$4 sm:$0xff]   ;;  %v1222_v52 = vcombine.high %v1213_v51, %v1213_v51  ;;  %v1221_v53 = vcombine.low %v1213_v51, %v1213_v51 }
  0x10   :  { %1289 = vmatpush3.bf16.msra.mxu0 %v1768_v14  ;;  %v1624_v45 = vld [vmem:[%s2145_s0 + $0x10] ss:$20 sps:$4 sm:$0xff]   ;;  %v1628_v47 = vld [vmem:[%s2145_s0 + $0x40] ss:$20 sps:$4 sm:$0xff]   ;;  %v1638_v63 = vld [vmem:[%s2145_s0 + $0x78] ss:$20 sps:$4 sm:$0xff]  }
  0x11   :  { %1317 = vmatpush3.bf16.msra.mxu1 %v1774_v15  ;;  %1290 = vmatprep.subr.bf16.mxu0 %v1780_v16  ;;  %v1626_v50 = vld [vmem:[%s2145_s0 + $0x3c] ss:$20 sps:$4 sm:$0xff]   ;;  %v1634_v54 = vld [vmem:[%s2145_s0 + $0x4c] ss:$20 sps:$4 sm:$0xff]   ;;  %v1631_v55 = vld [vmem:[%s2145_s0 + $0x44] ss:$20 sps:$4 sm:$0xff]  }
  0x12   :  { %1318 = vmatprep.subr.bf16.mxu1 %v1786_v17  ;;  %v1635_v56 = vld [vmem:[%s2145_s0 + $0x74] ss:$0 sps:$4 sm:$0x11]   ;;  %v1214_v57 = vld [vmem:[%s2145_s0 + $0x6c] sm:$0x11] }
  0x13   :  { %v1224_v58 = vcombine.high %v1214_v57, %v1214_v57  ;;  %v1643_v59 = vld [vmem:[%s2145_s0 + $0x84] ss:$20 sps:$4 sm:$0xff]   ;;  %v1223_v60 = vcombine.low %v1214_v57, %v1214_v57  ;;  %v1640_v61 = vld [vmem:[%s2145_s0 + $0x7c] ss:$20 sps:$4 sm:$0xff]   ;;  %v1235_v33 = vld [vmem:[%s2145_s0 + $0xa8] sm:$0x11] }
  0x14   :  { %1291 = vmatpush3.bf16.msra.mxu0 %v1792_v18  ;;  %v1234_v62 = vld [vmem:[%s2145_s0 + $0xa0] sm:$0x11]  ;;  %v1245_v35 = vcombine.high %v1235_v33, %v1235_v33 }
  0x15   :  { %1319 = vmatpush3.bf16.msra.mxu1 %v1798_v19  ;;  %1292 = vmatprep.subr.bf16.mxu0 %v1804_v20  ;;  %v1242_v38 = vcombine.low %v1234_v62, %v1234_v62 }
  0x16   :  { %1320 = vmatprep.subr.bf16.mxu1 %v1810_v21 }
  0x18   :  { %1293 = vmatpush3.bf16.msra.mxu0 %v1816_v22 }
  0x19   :  { %1321 = vmatpush3.bf16.msra.mxu1 %v1822_v23  ;;  %1294 = vmatprep.subr.bf16.mxu0 %v1828_v24 }
  0x1a   :  { %1322 = vmatprep.subr.bf16.mxu1 %v1834_v25 }
  0x1c   :  { %1295 = vmatpush3.bf16.msra.mxu0 %v1840_v26 }
  0x1d   :  { %1323 = vmatpush3.bf16.msra.mxu1 %v1846_v27  ;;  %1296 = vmatprep.subr.bf16.mxu0 %v1852_v28 }
  0x1e   :  { %1324 = vmatprep.subr.bf16.mxu1 %v1858_v29 }
  0x20   :  { %1297 = vmatpush3.bf16.msra.mxu0 %v1864_v30 }
  0x21   :  { %1325 = vmatpush3.bf16.msra.mxu1 %v1870_v31  ;;  %1530 = vmatprep.subr.bf16.mxu0 %v1890_v36 }
  0x22   :  { %1344 = vmatprep.subr.bf16.mxu1 %v1685_v0 }
  0x23   :  { %394 = vmatmul.mubr.bf16.vlgmr.msra.gmra.mrb[0].mxu0 %v1610_v32  ;;  %v1641_v32 = vld [vmem:[%s2145_s0 + $0x80] ss:$20 sps:$4 sm:$0xff]  }
  0x24   :  { %442 = vmatmul.mubr.bf16.vlgmr.msra.gmra.mrb[0].mxu1 %v1613_v34  ;;  %1531 = vmatpush3.bf16.msra.mxu0 %v1890_v36  ;;  %v1243_v34 = vcombine.high %v1234_v62, %v1234_v62 }
  0x25   :  { %1345 = vmatpush3.bf16.msra.mxu1 %v1696_v2  ;;  %1532 = vmatprep.subr.bf16.mxu0 %v1895_v37 }
  0x26   :  { %1346 = vmatprep.subr.bf16.mxu1 %v1708_v4  ;;  %401 = vmatprep.mubr.bf16.mxu0 %v1165_v39  ;;  %v1244_v39 = vcombine.low %v1235_v33, %v1235_v33 }
  0x27   :  { %449 = vmatprep.mubr.bf16.mxu1 %v1167_v41 }
  0x28   :  { %1533 = vmatpush3.bf16.msra.mxu0 %v1895_v37 }
  0x29   :  { %1347 = vmatpush3.bf16.msra.mxu1 %v1720_v6  ;;  %1534 = vmatprep.subr.bf16.mxu0 %v1911_v42 }
  0x2a   :  { %1348 = vmatprep.subr.bf16.mxu1 %v1732_v8 }
  0x2b   :  { %402 = vmatmul.mubr.bf16.gmra.mrb[4].mxu0 %v1164_v43 }
  0x2c   :  { %450 = vmatmul.mubr.bf16.gmra.mrb[4].mxu1 %v1166_v44  ;;  %1538 = vmatprep.mubr.msk.bf16.mxu0 %vm354_vm0, %v1624_v45 }
  0x2d   :  { %1535 = vmatpush3.bf16.msra.mxu0 %v1911_v42  ;;  %1349 = vmatpush3.bf16.msra.mxu1 %v1744_v10 }
  0x2e   :  { %1536 = vmatprep.subr.bf16.mxu0 %v1923_v46  ;;  %1350 = vmatprep.subr.bf16.mxu1 %v1756_v12 }
  0x2f   :  { %595 = vmatprep.mubr.bf16.mxu1 %v1628_v47 }
  0x31   :  { %1537 = vmatpush3.bf16.msra.mxu0 %v1923_v46  ;;  %1351 = vmatpush3.bf16.msra.mxu1 %v1768_v14 }
  0x32   :  { %1352 = vmatprep.subr.bf16.mxu1 %v1780_v16  ;;  %1372 = vmatprep.subr.bf16.mxu0 %v1690_v1 }
  0x34   :  { %1539 = vmatmul.mubr.msk.bf16.vlgmr.msra.gmra.mrb[8].mxu0 %vm354_vm0, %v1625_v48 }
  0x35   :  { %1353 = vmatpush3.bf16.msra.mxu1 %v1792_v18  ;;  %1373 = vmatpush3.bf16.msra.mxu0 %v1702_v3 }
  0x36   :  { %1354 = vmatprep.subr.bf16.mxu1 %v1804_v20  ;;  %1374 = vmatprep.subr.bf16.mxu0 %v1714_v5 }
  0x37   :  { %643 = vmatprep.mubr.bf16.mxu0 %v1633_v49 }
  0x39   :  { %1355 = vmatpush3.bf16.msra.mxu1 %v1816_v22  ;;  %1375 = vmatpush3.bf16.msra.mxu0 %v1726_v7 }
  0x3a   :  { %1356 = vmatprep.subr.bf16.mxu1 %v1828_v24  ;;  %1376 = vmatprep.subr.bf16.mxu0 %v1738_v9 }
  0x3d   :  { %1357 = vmatpush3.bf16.msra.mxu1 %v1840_v26  ;;  %1377 = vmatpush3.bf16.msra.mxu0 %v1750_v11 }
  0x3e   :  { %1358 = vmatprep.subr.bf16.mxu1 %v1852_v28  ;;  %1378 = vmatprep.subr.bf16.mxu0 %v1762_v13 }
  0x41   :  { %1359 = vmatpush3.bf16.msra.mxu1 %v1864_v30  ;;  %1379 = vmatpush3.bf16.msra.mxu0 %v1774_v15 }
  0x42   :  { %1380 = vmatprep.subr.bf16.mxu0 %v1786_v17  ;;  %1542 = vmatprep.subr.bf16.mxu1 %v1890_v36 }
  0x44   :  { %596 = vmatmul.mubr.bf16.vlgmr.msra.gmra.mrb[8].mxu1 %v1626_v50 }
  0x45   :  { %1381 = vmatpush3.bf16.msra.mxu0 %v1798_v19  ;;  %1543 = vmatpush3.bf16.msra.mxu1 %v1890_v36 }
  0x46   :  { %1382 = vmatprep.subr.bf16.mxu0 %v1810_v21  ;;  %1544 = vmatprep.subr.bf16.mxu1 %v1895_v37 }
  0x47   :  { %603 = vmatprep.mubr.bf16.mxu1 %v1222_v52 }
  0x49   :  { %1383 = vmatpush3.bf16.msra.mxu0 %v1822_v23  ;;  %1545 = vmatpush3.bf16.msra.mxu1 %v1895_v37 }
  0x4a   :  { %1384 = vmatprep.subr.bf16.mxu0 %v1834_v25  ;;  %1546 = vmatprep.subr.bf16.mxu1 %v1911_v42 }
  0x4c   :  { %604 = vmatmul.mubr.bf16.gmra.mrb[12].mxu1 %v1221_v53 }
  0x4d   :  { %1385 = vmatpush3.bf16.msra.mxu0 %v1846_v27  ;;  %1547 = vmatpush3.bf16.msra.mxu1 %v1911_v42 }
  0x4e   :  { %1386 = vmatprep.subr.bf16.mxu0 %v1858_v29  ;;  %1548 = vmatprep.subr.bf16.mxu1 %v1923_v46 }
  0x4f   :  { %1550 = vmatprep.mubr.msk.bf16.mxu1 %vm354_vm0, %v1634_v54 }
  0x51   :  { %1387 = vmatpush3.bf16.msra.mxu0 %v1870_v31  ;;  %1549 = vmatpush3.bf16.msra.mxu1 %v1923_v46 }
  0x52   :  { %1406 = vmatprep.subr.bf16.mxu0 %v1685_v0  ;;  %1434 = vmatprep.subr.bf16.mxu1 %v1690_v1 }
  0x54   :  { %644 = vmatmul.mubr.bf16.vlgmr.msra.gmra.mrb[12].mxu0 %v1631_v55  ;;  %1551 = vmatmul.mubr.msk.bf16.vlgmr.msra.gmra.mrb[16].mxu1 %vm354_vm0, %v1635_v56 }
  0x55   :  { %1407 = vmatpush3.bf16.msra.mxu0 %v1696_v2  ;;  %1435 = vmatpush3.bf16.msra.mxu1 %v1702_v3 }
  0x56   :  { %1408 = vmatprep.subr.bf16.mxu0 %v1708_v4  ;;  %1436 = vmatprep.subr.bf16.mxu1 %v1714_v5 }
  0x57   :  { %651 = vmatprep.mubr.bf16.mxu0 %v1224_v58  ;;  %848 = vmatprep.mubr.bf16.mxu1 %v1643_v59 }
  0x59   :  { %1409 = vmatpush3.bf16.msra.mxu0 %v1720_v6  ;;  %1437 = vmatpush3.bf16.msra.mxu1 %v1726_v7 }
  0x5a   :  { %1410 = vmatprep.subr.bf16.mxu0 %v1732_v8  ;;  %1438 = vmatprep.subr.bf16.mxu1 %v1738_v9 }
  0x5c   :  { %652 = vmatmul.mubr.bf16.gmra.mrb[16].mxu0 %v1223_v60 }
  0x5d   :  { %1411 = vmatpush3.bf16.msra.mxu0 %v1744_v10  ;;  %1439 = vmatpush3.bf16.msra.mxu1 %v1750_v11 }
  0x5e   :  { %1412 = vmatprep.subr.bf16.mxu0 %v1756_v12  ;;  %1440 = vmatprep.subr.bf16.mxu1 %v1762_v13 }
  0x5f   :  { %800 = vmatprep.mubr.bf16.mxu0 %v1640_v61 }
  0x61   :  { %1413 = vmatpush3.bf16.msra.mxu0 %v1768_v14  ;;  %1441 = vmatpush3.bf16.msra.mxu1 %v1774_v15 }
  0x62   :  { %1414 = vmatprep.subr.bf16.mxu0 %v1780_v16  ;;  %1442 = vmatprep.subr.bf16.mxu1 %v1786_v17 }
  0x65   :  { %1415 = vmatpush3.bf16.msra.mxu0 %v1792_v18  ;;  %1443 = vmatpush3.bf16.msra.mxu1 %v1798_v19 }
  0x66   :  { %1416 = vmatprep.subr.bf16.mxu0 %v1804_v20  ;;  %1444 = vmatprep.subr.bf16.mxu1 %v1810_v21 }
  0x69   :  { %1417 = vmatpush3.bf16.msra.mxu0 %v1816_v22  ;;  %1445 = vmatpush3.bf16.msra.mxu1 %v1822_v23 }
  0x6a   :  { %1418 = vmatprep.subr.bf16.mxu0 %v1828_v24  ;;  %1446 = vmatprep.subr.bf16.mxu1 %v1834_v25 }
  0x6d   :  { %1419 = vmatpush3.bf16.msra.mxu0 %v1840_v26  ;;  %1447 = vmatpush3.bf16.msra.mxu1 %v1846_v27 }
  0x6e   :  { %1420 = vmatprep.subr.bf16.mxu0 %v1852_v28  ;;  %1448 = vmatprep.subr.bf16.mxu1 %v1858_v29 }
  0x71   :  { %1421 = vmatpush3.bf16.msra.mxu0 %v1864_v30  ;;  %1449 = vmatpush3.bf16.msra.mxu1 %v1870_v31 }
  0x72   :  { %1554 = vmatprep.subr.bf16.mxu0 %v1890_v36  ;;  %1468 = vmatprep.subr.bf16.mxu1 %v1685_v0  ;;  %v1648_v0 = vld [vmem:[%s2145_s0 + $0x88] ss:$20 sps:$4 sm:$0xff]  }
  0x74   :  { %801 = vmatmul.mubr.bf16.vlgmr.msra.gmra.mrb[20].mxu0 %v1638_v63  ;;  %849 = vmatmul.mubr.bf16.vlgmr.msra.gmra.mrb[20].mxu1 %v1641_v32 }
  0x75   :  { %1555 = vmatpush3.bf16.msra.mxu0 %v1890_v36  ;;  %1469 = vmatpush3.bf16.msra.mxu1 %v1696_v2  ;;  %v1652_v2 = vld [vmem:[%s2145_s0 + $0xb8] ss:$20 sps:$4 sm:$0xff]  }
  0x76   :  { %1556 = vmatprep.subr.bf16.mxu0 %v1895_v37  ;;  %808 = vmatprep.mubr.bf16.mxu0 %v1243_v34 }
  0x77   :  { %856 = vmatprep.mubr.bf16.mxu1 %v1245_v35  ;;  %1470 = vmatprep.subr.bf16.mxu1 %v1708_v4  ;;  %v1649_v4 = vld [vmem:[%s2145_s0 + $0xb0] ss:$0 sps:$4 sm:$0x11]  }
  0x79   :  { %1557 = vmatpush3.bf16.msra.mxu0 %v1895_v37  ;;  %1471 = vmatpush3.bf16.msra.mxu1 %v1720_v6  ;;  %v1657_v6 = vld [vmem:[%s2145_s0 + $0xc0] ss:$20 sps:$4 sm:$0xff]  }
  0x7a   :  { %1558 = vmatprep.subr.bf16.mxu0 %v1911_v42  ;;  %1472 = vmatprep.subr.bf16.mxu1 %v1732_v8  ;;  %v1658_v8 = vld [vmem:[%s2145_s0 + $0xc4] ss:$20 sps:$4 sm:$0xff]  }
  0x7c   :  { %809 = vmatmul.mubr.bf16.gmra.mrb[24].mxu0 %v1242_v38  ;;  %857 = vmatmul.mubr.bf16.gmra.mrb[24].mxu1 %v1244_v39 }
  0x7d   :  { %1559 = vmatpush3.bf16.msra.mxu0 %v1911_v42  ;;  %1473 = vmatpush3.bf16.msra.mxu1 %v1744_v10  ;;  %v1655_v10 = vld [vmem:[%s2145_s0 + $0xbc] ss:$20 sps:$4 sm:$0xff]  }
  0x7e   :  { %1560 = vmatprep.subr.bf16.mxu0 %v1923_v46  ;;  %1562 = vmatprep.mubr.msk.bf16.mxu0 %vm354_vm0, %v1648_v0 }
  0x7f   :  { %1474 = vmatprep.subr.bf16.mxu1 %v1756_v12  ;;  %1005 = vmatprep.mubr.bf16.mxu1 %v1652_v2 }
  0x81   :  { %1561 = vmatpush3.bf16.msra.mxu0 %v1923_v46  ;;  %1475 = vmatpush3.bf16.msra.mxu1 %v1768_v14 }
  0x82   :  { %1496 = vmatprep.subr.bf16.mxu0 %v1690_v1  ;;  %1476 = vmatprep.subr.bf16.mxu1 %v1780_v16  ;;  %v1650_v1 = vld [vmem:[%s2145_s0 + $0xb4] ss:$20 sps:$4 sm:$0xff]  }
  0x84   :  { %1563 = vmatmul.mubr.msk.bf16.vlgmr.msra.gmra.mrb[28].mxu0 %vm354_vm0, %v1649_v4 }
  0x85   :  { %1497 = vmatpush3.bf16.msra.mxu0 %v1702_v3  ;;  %1477 = vmatpush3.bf16.msra.mxu1 %v1792_v18  ;;  %v1255_v3 = vld [vmem:[%s2145_s0 + $0xdc] sm:$0x11] }
  0x86   :  { %1498 = vmatprep.subr.bf16.mxu0 %v1714_v5  ;;  %1478 = vmatprep.subr.bf16.mxu1 %v1804_v20  ;;  %v1264_v5 = vcombine.high %v1255_v3, %v1255_v3 }
  0x87   :  { %1053 = vmatprep.mubr.bf16.mxu0 %v1657_v6 }
  0x89   :  { %1499 = vmatpush3.bf16.msra.mxu0 %v1726_v7  ;;  %1479 = vmatpush3.bf16.msra.mxu1 %v1816_v22  ;;  %v1263_v7 = vcombine.low %v1255_v3, %v1255_v3 }
  0x8a   :  { %1500 = vmatprep.subr.bf16.mxu0 %v1738_v9  ;;  %1480 = vmatprep.subr.bf16.mxu1 %v1828_v24  ;;  %v1256_v9 = vld [vmem:[%s2145_s0 + $0xe4] sm:$0x11] }
  0x8b   :  { %v1266_v12 = vcombine.high %v1256_v9, %v1256_v9 }
  0x8d   :  { %1501 = vmatpush3.bf16.msra.mxu0 %v1750_v11  ;;  %1481 = vmatpush3.bf16.msra.mxu1 %v1840_v26  ;;  %v1659_v11 = vld [vmem:[%s2145_s0 + $0xec] ss:$0 sps:$4 sm:$0x11]  }
  0x8e   :  { %1502 = vmatprep.subr.bf16.mxu0 %v1762_v13  ;;  %1482 = vmatprep.subr.bf16.mxu1 %v1852_v28  ;;  %v1265_v13 = vcombine.low %v1256_v9, %v1256_v9 }
  0x91   :  { %1503 = vmatpush3.bf16.msra.mxu0 %v1774_v15  ;;  %1483 = vmatpush3.bf16.msra.mxu1 %v1864_v30 }
  0x92   :  { %1504 = vmatprep.subr.bf16.mxu0 %v1786_v17  ;;  %1566 = vmatprep.subr.bf16.mxu1 %v1890_v36 }
  0x94   :  { %1006 = vmatmul.mubr.bf16.vlgmr.msra.gmra.mrb[28].mxu1 %v1650_v1 }
  0x95   :  { %1505 = vmatpush3.bf16.msra.mxu0 %v1798_v19  ;;  %1567 = vmatpush3.bf16.msra.mxu1 %v1890_v36 }
  0x96   :  { %1506 = vmatprep.subr.bf16.mxu0 %v1810_v21  ;;  %1568 = vmatprep.subr.bf16.mxu1 %v1895_v37 }
  0x97   :  { %1013 = vmatprep.mubr.bf16.mxu1 %v1264_v5 }
  0x99   :  { %1507 = vmatpush3.bf16.msra.mxu0 %v1822_v23  ;;  %1569 = vmatpush3.bf16.msra.mxu1 %v1895_v37 }
  0x9a   :  { %1508 = vmatprep.subr.bf16.mxu0 %v1834_v25  ;;  %1570 = vmatprep.subr.bf16.mxu1 %v1911_v42 }
  0x9c   :  { %1014 = vmatmul.mubr.bf16.gmra.mrb[32].mxu1 %v1263_v7 }
  0x9d   :  { %1509 = vmatpush3.bf16.msra.mxu0 %v1846_v27  ;;  %1571 = vmatpush3.bf16.msra.mxu1 %v1911_v42 }
  0x9e   :  { %1510 = vmatprep.subr.bf16.mxu0 %v1858_v29  ;;  %1572 = vmatprep.subr.bf16.mxu1 %v1923_v46 }
  0x9f   :  { %1574 = vmatprep.mubr.msk.bf16.mxu1 %vm354_vm0, %v1658_v8 }
  0xa1   :  { %1511 = vmatpush3.bf16.msra.mxu0 %v1870_v31  ;;  %1573 = vmatpush3.bf16.msra.mxu1 %v1923_v46 }
  0xa4   :  { %1054 = vmatmul.mubr.bf16.vlgmr.msra.gmra.mrb[32].mxu0 %v1655_v10  ;;  %1575 = vmatmul.mubr.msk.bf16.vlgmr.msra.gmra.mrb[36].mxu1 %vm354_vm0, %v1659_v11 }
  0xa5   :  { %1061 = vmatprep.mubr.bf16.mxu0 %v1266_v12 }
  0xac   :  { %1062 = vmatmul.mubr.bf16.gmra.mrb[36].mxu0 %v1265_v13 }
  0xf6   :  { %v1298_v14 = vpop.f32.mrb[0].mxu0 }
  0xf7   :  { %v1326_v15 = vpop.f32.mrb[0].mxu1  ;;  %v1299_v16 = vpop.f32.mrb[1].mxu0 }
  0xf8   :  { %v1300_v17 = vadd.f32 %v1299_v16, %v1298_v14  ;;  %v1327_v18 = vpop.f32.mrb[1].mxu1  ;;  %v1301_v19 = vpop.f32.mrb[2].mxu0 }
  0xf9   :  { %v1328_v20 = vadd.f32 %v1327_v18, %v1326_v15  ;;  %v1329_v21 = vpop.f32.mrb[2].mxu1  ;;  %v1302_v22 = vpop.f32.mrb[3].mxu0 }
  0xfa   :  { %v1303_v23 = vadd.f32 %v1302_v22, %v1301_v19  ;;  %v1330_v24 = vpop.f32.mrb[3].mxu1 }
  0xfb   :  { %v1331_v25 = vadd.f32 %v1330_v24, %v1329_v21  ;;  %v444_v26 = vadd.f32 %v1328_v20, %v1300_v17 }
  0xfd   :  { %v447_v27 = vadd.f32 %v1331_v25, %v1303_v23 }
  0xfe   :  { %v1304_v28 = vpop.f32.mrb[4].mxu0 }
  0xff   :  { %v1332_v29 = vpop.f32.mrb[4].mxu1  ;;  %v1305_v30 = vpop.f32.mrb[5].mxu0 }
 0x100   :  { %v1306_v31 = vadd.f32 %v1305_v30, %v1304_v28  ;;  %v1333_v36 = vpop.f32.mrb[5].mxu1  ;;  %v1307_v37 = vpop.f32.mrb[6].mxu0 }
 0x101   :  { %v1334_v40 = vadd.f32 %v1333_v36, %v1332_v29  ;;  %v1308_v41 = vpop.f32.mrb[7].mxu0  ;;  %v1335_v42 = vpop.f32.mrb[6].mxu1 }
 0x102   :  { %v1336_v43 = vpop.f32.mrb[7].mxu1 }
 0x103   :  { %v452_v44 = vadd.f32 %v1334_v40, %v1306_v31 }
 0x107   :  { %v1540_v45 = vpop.f32.mrb[8].mxu0 }
 0x108   :  { %v2126_v46 = vadd.f32 %v1540_v45, %v452_v44  ;;  %v491_v47 = vpop.f32.mrb[9].mxu0 }
 0x109   :  { %v2128_v48 = vadd.f32 %v491_v47, %v444_v26  ;;  %v1541_v49 = vpop.f32.mrb[10].mxu0 }
 0x10a   :  { %v494_v50 = vpop.f32.mrb[11].mxu0 }
 0x10b   :  { %v2130_v51 = vadd.f32 %v494_v50, %v447_v27 }
 0x117   :  { %v1360_v52 = vpop.f32.mrb[8].mxu1 }
 0x118   :  { %v1361_v53 = vpop.f32.mrb[9].mxu1 }
 0x119   :  { %v1362_v54 = vadd.f32 %v1361_v53, %v1360_v52  ;;  %v1363_v55 = vpop.f32.mrb[10].mxu1 }
 0x11a   :  { %v1364_v56 = vpop.f32.mrb[11].mxu1 }
 0x11b   :  { %v1365_v57 = vadd.f32 %v1364_v56, %v1363_v55 }
 0x11f   :  { %v1366_v58 = vpop.f32.mrb[12].mxu1 }
 0x120   :  { %v1367_v59 = vpop.f32.mrb[13].mxu1 }
 0x121   :  { %v1368_v60 = vadd.f32 %v1367_v59, %v1366_v58  ;;  %v1369_v61 = vpop.f32.mrb[14].mxu1 }
 0x122   :  { %v1370_v62 = vpop.f32.mrb[15].mxu1 }
 0x127   :  { %v1388_v63 = vpop.f32.mrb[12].mxu0  ;;  %v1552_v32 = vpop.f32.mrb[16].mxu1 }
 0x128   :  { %v1389_v33 = vpop.f32.mrb[13].mxu0  ;;  %v693_v34 = vpop.f32.mrb[17].mxu1 }
 0x129   :  { %v1390_v35 = vadd.f32 %v1389_v33, %v1388_v63  ;;  %v1391_v38 = vpop.f32.mrb[14].mxu0  ;;  %v1553_v39 = vpop.f32.mrb[18].mxu1 }
 0x12a   :  { %v1392_v0 = vpop.f32.mrb[15].mxu0  ;;  %v696_v2 = vpop.f32.mrb[19].mxu1 }
 0x12b   :  { %v1393_v4 = vadd.f32 %v1392_v0, %v1391_v38  ;;  %v646_v6 = vadd.f32 %v1390_v35, %v1362_v54 }
 0x12d   :  { %v694_v1 = vadd.f32 %v693_v34, %v646_v6  ;;  %v649_v3 = vadd.f32 %v1393_v4, %v1365_v57 }
 0x12f   :  { %v707_v5 = vmax.f32 %v2128_v48, %v694_v1  ;;  %v697_v7 = vadd.f32 %v696_v2, %v649_v3  ;;  %v1394_v8 = vpop.f32.mrb[16].mxu0 }
 0x130   :  { %v1395_v9 = vpop.f32.mrb[17].mxu0 }
 0x131   :  { %v708_v10 = vmax.f32 %v2130_v51, %v697_v7  ;;  %v1396_v11 = vadd.f32 %v1395_v9, %v1394_v8  ;;  %v1397_v12 = vpop.f32.mrb[18].mxu0 }
 0x132   :  { %v1398_v13 = vpop.f32.mrb[19].mxu0  ;;  %v1270_v12 = vld [vmem:[%s2146_s2] ss:$0 sm:$0xff] }
 0x133   :  { %v654_v14 = vadd.f32 %v1396_v11, %v1368_v60 }
 0x135   :  { %v702_v15 = vadd.f32 %v1552_v32, %v654_v14 }
 0x137   :  { %v709_v16 = vmax.f32 %v2126_v46, %v702_v15 }
 0x147   :  { %v1422_v17 = vpop.f32.mrb[20].mxu0  ;;  %v1450_v18 = vpop.f32.mrb[20].mxu1 }
 0x148   :  { %v1423_v19 = vpop.f32.mrb[21].mxu0  ;;  %v1451_v20 = vpop.f32.mrb[21].mxu1 }
 0x149   :  { %v1424_v21 = vadd.f32 %v1423_v19, %v1422_v17  ;;  %v1452_v22 = vadd.f32 %v1451_v20, %v1450_v18  ;;  %v1425_v23 = vpop.f32.mrb[22].mxu0  ;;  %v1453_v24 = vpop.f32.mrb[22].mxu1 }
 0x14a   :  { %v1426_v25 = vpop.f32.mrb[23].mxu0  ;;  %v1454_v26 = vpop.f32.mrb[23].mxu1 }
 0x14b   :  { %v1427_v27 = vadd.f32 %v1426_v25, %v1425_v23  ;;  %v1455_v28 = vadd.f32 %v1454_v26, %v1453_v24  ;;  %v851_v29 = vadd.f32 %v1452_v22, %v1424_v21 }
 0x14d   :  { %v854_v30 = vadd.f32 %v1455_v28, %v1427_v27 }
 0x14f   :  { %v1428_v31 = vpop.f32.mrb[24].mxu0  ;;  %v1456_v36 = vpop.f32.mrb[24].mxu1 }
 0x150   :  { %v1429_v37 = vpop.f32.mrb[25].mxu0  ;;  %v1457_v40 = vpop.f32.mrb[25].mxu1 }
 0x151   :  { %v1430_v41 = vadd.f32 %v1429_v37, %v1428_v31  ;;  %v1458_v42 = vadd.f32 %v1457_v40, %v1456_v36  ;;  %v1431_v43 = vpop.f32.mrb[26].mxu0  ;;  %v1459_v44 = vpop.f32.mrb[26].mxu1 }
 0x152   :  { %v1432_v45 = vpop.f32.mrb[27].mxu0  ;;  %v1460_v46 = vpop.f32.mrb[27].mxu1 }
 0x153   :  { %v859_v47 = vadd.f32 %v1458_v42, %v1430_v41 }
 0x157   :  { %v1564_v48 = vpop.f32.mrb[28].mxu0 }
 0x158   :  { %v907_v49 = vadd.f32 %v1564_v48, %v859_v47  ;;  %v898_v50 = vpop.f32.mrb[29].mxu0 }
 0x159   :  { %v899_v51 = vadd.f32 %v898_v50, %v851_v29  ;;  %v1565_v52 = vpop.f32.mrb[30].mxu0 }
 0x15a   :  { %v914_v53 = vmax.f32 %v709_v16, %v907_v49  ;;  %v901_v54 = vpop.f32.mrb[31].mxu0 }
 0x15b   :  { %v912_v55 = vmax.f32 %v707_v5, %v899_v51  ;;  %v902_v56 = vadd.f32 %v901_v54, %v854_v30 }
 0x15d   :  { %v913_v57 = vmax.f32 %v708_v10, %v902_v56 }
 0x167   :  { %v1484_v58 = vpop.f32.mrb[28].mxu1 }
 0x168   :  { %v1485_v59 = vpop.f32.mrb[29].mxu1 }
 0x169   :  { %v1486_v60 = vadd.f32 %v1485_v59, %v1484_v58  ;;  %v1487_v61 = vpop.f32.mrb[30].mxu1 }
 0x16a   :  { %v1488_v62 = vpop.f32.mrb[31].mxu1 }
 0x16b   :  { %v1489_v63 = vadd.f32 %v1488_v62, %v1487_v61 }
 0x16f   :  { %v1490_v32 = vpop.f32.mrb[32].mxu1 }
 0x170   :  { %v1491_v33 = vpop.f32.mrb[33].mxu1 }
 0x171   :  { %v1492_v34 = vadd.f32 %v1491_v33, %v1490_v32  ;;  %v1493_v35 = vpop.f32.mrb[34].mxu1 }
 0x172   :  { %v1494_v38 = vpop.f32.mrb[35].mxu1 }
 0x177   :  { %v1512_v39 = vpop.f32.mrb[32].mxu0  ;;  %v1576_v0 = vpop.f32.mrb[36].mxu1 }
 0x178   :  { %v1513_v2 = vpop.f32.mrb[33].mxu0  ;;  %v1103_v4 = vpop.f32.mrb[37].mxu1 }
 0x179   :  { %v1514_v6 = vadd.f32 %v1513_v2, %v1512_v39  ;;  %v1515_v1 = vpop.f32.mrb[34].mxu0  ;;  %v1577_v3 = vpop.f32.mrb[38].mxu1 }
 0x17a   :  { %v1516_v5 = vpop.f32.mrb[35].mxu0  ;;  %v1106_v7 = vpop.f32.mrb[39].mxu1 }
 0x17b   :  { %v1517_v8 = vadd.f32 %v1516_v5, %v1515_v1  ;;  %v1056_v9 = vadd.f32 %v1514_v6, %v1486_v60 }
 0x17d   :  { %v1104_v10 = vadd.f32 %v1103_v4, %v1056_v9  ;;  %v1059_v11 = vadd.f32 %v1517_v8, %v1489_v63 }
 0x17f   :  { %v1117_v13 = vmax.f32 %v912_v55, %v1104_v10  ;;  %v1107_v14 = vadd.f32 %v1106_v7, %v1059_v11  ;;  %v1518_v15 = vpop.f32.mrb[36].mxu0 }
 0x180   :  { %v1519_v16 = vpop.f32.mrb[37].mxu0 }
 0x181   :  { %v1127_v17 = vadd.f32 %v1270_v12, %v1117_v13  ;;  %v1118_v18 = vmax.f32 %v913_v57, %v1107_v14  ;;  %v1520_v19 = vadd.f32 %v1519_v16, %v1518_v15  ;;  %v1521_v20 = vpop.f32.mrb[38].mxu0 }
 0x182   :  { %v1522_v21 = vpop.f32.mrb[39].mxu0 }
 0x183   :  { %v1133_v22 = vmul.f32 0.1, %v1127_v17  ;;  %v1128_v23 = vadd.f32 %v1270_v12, %v1118_v18  ;;  %v1064_v24 = vadd.f32 %v1520_v19, %v1492_v34  ;;  %vm1130_vm1 = vcmp.ge.f32.partialorder %v1127_v17, 0.0 }
 0x185   :  { %vm1131_vm2 = vcmp.ge.f32.partialorder %v1128_v23, 0.0  ;;  %v1134_v25 = vmul.f32 0.1, %v1128_v23  ;;  %v1112_v26 = vadd.f32 %v1576_v0, %v1064_v24  ;;  %v1136_v27 = vsel %vm1130_vm1, %v1127_v17, %v1133_v22 }
 0x187   :  { %v1137_v28 = vsel %vm1131_vm2, %v1128_v23, %v1134_v25  ;;  %v1119_v29 = vmax.f32 %v914_v53, %v1112_v26 }
 0x188   :  { %v1280_v30 = vpack.c.bf16 %v1137_v28, %v1136_v27 }
 0x189   :  { %v1129_v31 = vadd.f32 %v1270_v12, %v1119_v29 }
 0x18a   :  { %1281 = vst [vmem:[%s2147_s3] sm:$0xff] %v1280_v30  }
 0x18b   :  { %vm1132_vm3 = vcmp.ge.f32.partialorder %v1129_v31, 0.0  ;;  %v1135_v36 = vmul.f32 0.1, %v1129_v31 }
 0x18d   :  { %v1138_v37 = vsel %vm1132_vm3, %v1129_v31, %v1135_v36 }
 0x18e   :  { %v1276_v40 = vpack.c.bf16 %v1138_v37, %v1138_v37 }
 0x190   :  { %1154 = vst [vmem:[%s2147_s3 + $0x8] sm:$0x1] %v1276_v40 }

// kernel: cnn_forward.7
= control target key start
LH: loop header
LB: loop body
LE: loop exit
PB: predicated region body
PF: predicated region fallthrough
CT: control target
= control target key end

     0   :  { %v181_v27 = vlaneseq  ;;  %v1349_v35 = vmov 1966171168   ;;  %vm1351_vm0 = vmmov 0   ;;  %s1661_s0 = inlined_call_operand.vmem [shape: bf16[2,1152], index: 0, kind: input, shape index: {}]   ;;  %s1662_s1 = inlined_call_operand.vmem [shape: bf16[1152,128], index: 1, kind: input, shape index: {}]   ;;  %s1663_s2 = inlined_call_operand.vmem [shape: f32[1,128], index: 2, kind: input, shape index: {}]   ;;  %s1664_s3 = inlined_call_operand.vmem [shape: bf16[128,128], index: 3, kind: input, shape index: {}]   ;;  %s1665_s4 = inlined_call_operand.vmem [shape: f32[1,128], index: 4, kind: input, shape index: {}]   ;;  %s1666_s5 = inlined_call_operand.hbm [shape: f32[2,128], index: 5, kind: output, shape index: {}]  }
   0x1   :  { %v1244_v0 = vld [vmem:[%s1662_s1 + $0x40] sm:$0xff]   ;;  %v1248_v4 = vld [vmem:[%s1662_s1 + $0x48] sm:$0xff]   ;;  %v1252_v8 = vld [vmem:[%s1662_s1 + $0x50] sm:$0xff]   ;;  %v179_v36 = vunpack.c.l.s4 %v1349_v35 }
   0x2   :  { %v1245_v1 = vld [vmem:[%s1662_s1] sm:$0xff]   ;;  %1094 = vmatprep.subr.bf16.mxu0 %v1244_v0  ;;  %v1249_v5 = vld [vmem:[%s1662_s1 + $0x8] sm:$0xff]   ;;  %v1253_v9 = vld [vmem:[%s1662_s1 + $0x10] sm:$0xff]   ;;  %v182_v32 = vshrl.u32 %v181_v27, 7 }
   0x3   :  { %v1246_v2 = vld [vmem:[%s1662_s1 + $0xc0] sm:$0xff]   ;;  %1095 = vmatpush3.bf16.msra.mxu0 %v1245_v1  ;;  %v1250_v6 = vld [vmem:[%s1662_s1 + $0xc8] sm:$0xff]   ;;  %v1254_v10 = vld [vmem:[%s1662_s1 + $0xd0] sm:$0xff]   ;;  %v180_v39 = vunpack.c.0.s8 %v179_v36 }
   0x4   :  { %v1247_v3 = vld [vmem:[%s1662_s1 + $0x80] sm:$0xff]   ;;  %1116 = vmatprep.subr.bf16.mxu1 %v1246_v2  ;;  %1096 = vmatprep.subr.bf16.mxu0 %v1248_v4  ;;  %v1251_v7 = vld [vmem:[%s1662_s1 + $0x88] sm:$0xff]   ;;  %v1255_v11 = vld [vmem:[%s1662_s1 + $0x90] sm:$0xff]  }
   0x5   :  { %1117 = vmatpush3.bf16.msra.mxu1 %v1247_v3  ;;  %v1256_v12 = vld [vmem:[%s1662_s1 + $0x58] sm:$0xff]   ;;  %v1260_v16 = vld [vmem:[%s1662_s1 + $0x60] sm:$0xff]   ;;  %v1264_v20 = vld [vmem:[%s1662_s1 + $0x68] sm:$0xff]   ;;  %v1488_v41 = vsub.s32 %v180_v39, %v182_v32 }
   0x6   :  { %1118 = vmatprep.subr.bf16.mxu1 %v1250_v6  ;;  %v1257_v13 = vld [vmem:[%s1662_s1 + $0x18] sm:$0xff]   ;;  %v1261_v17 = vld [vmem:[%s1662_s1 + $0x20] sm:$0xff]   ;;  %v1265_v21 = vld [vmem:[%s1662_s1 + $0x28] sm:$0xff]  }
   0x7   :  { %1097 = vmatpush3.bf16.msra.mxu0 %v1249_v5  ;;  %v1258_v14 = vld [vmem:[%s1662_s1 + $0xd8] sm:$0xff]   ;;  %v1262_v18 = vld [vmem:[%s1662_s1 + $0xe0] sm:$0xff]   ;;  %v1266_v22 = vld [vmem:[%s1662_s1 + $0xe8] sm:$0xff]  }
   0x8   :  { %1098 = vmatprep.subr.bf16.mxu0 %v1252_v8  ;;  %v1259_v15 = vld [vmem:[%s1662_s1 + $0x98] sm:$0xff]   ;;  %v1263_v19 = vld [vmem:[%s1662_s1 + $0xa0] sm:$0xff]   ;;  %v1267_v23 = vld [vmem:[%s1662_s1 + $0xa8] sm:$0xff]  }
   0x9   :  { %1119 = vmatpush3.bf16.msra.mxu1 %v1251_v7  ;;  %v1268_v24 = vld [vmem:[%s1662_s1 + $0x70] sm:$0xff]   ;;  %v1272_v29 = vld [vmem:[%s1662_s1 + $0x78] sm:$0xff]   ;;  %v22_v33 = vld [vmem:[%s1661_s0] sm:$0xff] }
   0xa   :  { %1120 = vmatprep.subr.bf16.mxu1 %v1254_v10  ;;  %v1269_v25 = vld [vmem:[%s1662_s1 + $0x30] sm:$0xff]   ;;  %v1273_v30 = vld [vmem:[%s1662_s1 + $0x38] sm:$0xff]   ;;  %v1277_v37 = vld [vmem:[%s1662_s1 + $0x140] sm:$0xff]   ;;  %v177_v38 = vcombine.high %v22_v33, %v22_v33  ;;  %v184_v42 = vrot.slane %v22_v33, %v1488_v41 }
   0xb   :  { %1099 = vmatpush3.bf16.msra.mxu0 %v1253_v9  ;;  %v1270_v26 = vld [vmem:[%s1662_s1 + $0xf0] sm:$0xff]   ;;  %v1274_v31 = vld [vmem:[%s1662_s1 + $0xf8] sm:$0xff]   ;;  %v1279_v40 = vld [vmem:[%s1662_s1 + $0x1c0] sm:$0xff]  }
   0xc   :  { %1100 = vmatprep.subr.bf16.mxu0 %v1256_v12  ;;  %v1271_v28 = vld [vmem:[%s1662_s1 + $0xb0] sm:$0xff]   ;;  %v1276_v34 = vld [vmem:[%s1662_s1 + $0xb8] sm:$0xff]   ;;  %v1492_v43 = vrot.slane %v177_v38, %v1488_v41  ;;  %v192_v44 = vcombine.high %v184_v42, %v184_v42  ;;  %v200_v45 = vrot.slane %v184_v42, %v1488_v41  ;;  %v1278_v48 = vld [vmem:[%s1662_s1 + $0x100] sm:$0xff]  }
   0xd   :  { %1121 = vmatpush3.bf16.msra.mxu1 %v1255_v11  ;;  %v1281_v51 = vld [vmem:[%s1662_s1 + $0x148] sm:$0xff]   ;;  %v1280_v53 = vld [vmem:[%s1662_s1 + $0x180] sm:$0xff]   ;;  %v1285_v57 = vld [vmem:[%s1662_s1 + $0x150] sm:$0xff]  }
   0xe   :  { %1122 = vmatprep.subr.bf16.mxu1 %v1258_v14  ;;  %v193_v46 = vcombine.high %v1492_v43, %v1492_v43  ;;  %v214_v47 = vrot.slane %v192_v44, %v1488_v41  ;;  %v222_v50 = vcombine.high %v200_v45, %v200_v45  ;;  %v1283_v54 = vld [vmem:[%s1662_s1 + $0x1c8] sm:$0xff]   ;;  %v1287_v59 = vld [vmem:[%s1662_s1 + $0x1d0] sm:$0xff]   ;;  %v1289_v61 = vld [vmem:[%s1662_s1 + $0x158] sm:$0xff]  }
   0xf   :  { %1101 = vmatpush3.bf16.msra.mxu0 %v1257_v13  ;;  %v1282_v56 = vld [vmem:[%s1662_s1 + $0x108] sm:$0xff]   ;;  %v1286_v60 = vld [vmem:[%s1662_s1 + $0x110] sm:$0xff]   ;;  %v1291_v63 = vld [vmem:[%s1662_s1 + $0x1d8] sm:$0xff]  }
  0x10   :  { %1102 = vmatprep.subr.bf16.mxu0 %v1260_v16  ;;  %v221_v49 = vrot.slane %v193_v46, %v1488_v41  ;;  %713 = vmatprep.mubr.bf16.mxu0 %v214_v47  ;;  %v224_v52 = vcombine.high %v214_v47, %v214_v47  ;;  %v1284_v58 = vld [vmem:[%s1662_s1 + $0x188] sm:$0xff]   ;;  %v1288_v62 = vld [vmem:[%s1662_s1 + $0x190] sm:$0xff]   ;;  %v1290_v0 = vld [vmem:[%s1662_s1 + $0x118] sm:$0xff]  }
  0x11   :  { %1123 = vmatpush3.bf16.msra.mxu1 %v1259_v15  ;;  %v1293_v1 = vld [vmem:[%s1662_s1 + $0x160] sm:$0xff]   ;;  %v1292_v2 = vld [vmem:[%s1662_s1 + $0x198] sm:$0xff]   ;;  %v1297_v5 = vld [vmem:[%s1662_s1 + $0x168] sm:$0xff]  }
  0x12   :  { %1124 = vmatprep.subr.bf16.mxu1 %v1262_v18  ;;  %v225_v55 = vcombine.high %v221_v49, %v221_v49  ;;  %753 = vmatprep.mubr.bf16.mxu1 %v224_v52  ;;  %v1295_v3 = vld [vmem:[%s1662_s1 + $0x1e0] sm:$0xff]   ;;  %v1299_v7 = vld [vmem:[%s1662_s1 + $0x1e8] sm:$0xff]   ;;  %v1301_v9 = vld [vmem:[%s1662_s1 + $0x170] sm:$0xff]  }
  0x13   :  { %1103 = vmatpush3.bf16.msra.mxu0 %v1261_v17  ;;  %v1294_v4 = vld [vmem:[%s1662_s1 + $0x120] sm:$0xff]   ;;  %v1298_v8 = vld [vmem:[%s1662_s1 + $0x128] sm:$0xff]   ;;  %v1303_v11 = vld [vmem:[%s1662_s1 + $0x1f0] sm:$0xff]   ;;  %v207_v17 = vrot.slane %v1492_v43, %v1488_v41 }
  0x14   :  { %1104 = vmatprep.subr.bf16.mxu0 %v1264_v20  ;;  %v1296_v6 = vld [vmem:[%s1662_s1 + $0x1a0] sm:$0xff]   ;;  %v1300_v10 = vld [vmem:[%s1662_s1 + $0x1a8] sm:$0xff]   ;;  %v1302_v12 = vld [vmem:[%s1662_s1 + $0x130] sm:$0xff]   ;;  %v1350_v20 = vmov 0.0  }
  0x15   :  { %1125 = vmatpush3.bf16.msra.mxu1 %v1263_v19  ;;  %v1305_v13 = vld [vmem:[%s1662_s1 + $0x178] sm:$0xff]   ;;  %v1304_v14 = vld [vmem:[%s1662_s1 + $0x1b0] sm:$0xff]   ;;  %v1309_v19 = vld [vmem:[%s1662_s1 + $0x200] sm:$0xff]  }
  0x16   :  { %1126 = vmatprep.subr.bf16.mxu1 %v1266_v22  ;;  %v1307_v15 = vld [vmem:[%s1662_s1 + $0x1f8] sm:$0xff]   ;;  %v1310_v22 = vld [vmem:[%s1662_s1 + $0x208] sm:$0xff]  }
  0x17   :  { %1105 = vmatpush3.bf16.msra.mxu0 %v1265_v21  ;;  %v1306_v16 = vld [vmem:[%s1662_s1 + $0x138] sm:$0xff]   ;;  %v223_v21 = vcombine.high %v207_v17, %v207_v17 }
  0x18   :  { %1106 = vmatprep.subr.bf16.mxu0 %v1268_v24  ;;  %v1308_v18 = vld [vmem:[%s1662_s1 + $0x1b8] sm:$0xff]  }
  0x19   :  { %1127 = vmatpush3.bf16.msra.mxu1 %v1267_v23 }
  0x1a   :  { %1128 = vmatprep.subr.bf16.mxu1 %v1270_v26 }
  0x1b   :  { %1107 = vmatpush3.bf16.msra.mxu0 %v1269_v25 }
  0x1c   :  { %1108 = vmatprep.subr.bf16.mxu0 %v1272_v29 }
  0x1d   :  { %1129 = vmatpush3.bf16.msra.mxu1 %v1271_v28 }
  0x1e   :  { %1130 = vmatprep.subr.bf16.mxu1 %v1274_v31 }
  0x1f   :  { %1109 = vmatpush3.bf16.msra.mxu0 %v1273_v30 }
  0x20   :  { %1138 = vmatprep.subr.bf16.mxu0 %v1277_v37 }
  0x21   :  { %1131 = vmatpush3.bf16.msra.mxu1 %v1276_v34 }
  0x22   :  { %1160 = vmatprep.subr.bf16.mxu1 %v1279_v40  ;;  %714 = vmatmul.mubr.bf16.vlgmr.msra.gmra.mrb[0].mxu0 %v200_v45 }
  0x23   :  { %1139 = vmatpush3.bf16.msra.mxu0 %v1278_v48  ;;  %793 = vmatprep.mubr.bf16.mxu0 %v221_v49 }
  0x24   :  { %754 = vmatmul.mubr.bf16.vlgmr.msra.gmra.mrb[0].mxu1 %v222_v50  ;;  %1140 = vmatprep.subr.bf16.mxu0 %v1281_v51 }
  0x25   :  { %1161 = vmatpush3.bf16.msra.mxu1 %v1280_v53  ;;  %833 = vmatprep.mubr.bf16.mxu1 %v225_v55 }
  0x26   :  { %1162 = vmatprep.subr.bf16.mxu1 %v1283_v54 }
  0x27   :  { %1141 = vmatpush3.bf16.msra.mxu0 %v1282_v56 }
  0x28   :  { %1142 = vmatprep.subr.bf16.mxu0 %v1285_v57 }
  0x29   :  { %1163 = vmatpush3.bf16.msra.mxu1 %v1284_v58 }
  0x2a   :  { %1164 = vmatprep.subr.bf16.mxu1 %v1287_v59 }
  0x2b   :  { %1143 = vmatpush3.bf16.msra.mxu0 %v1286_v60 }
  0x2c   :  { %1144 = vmatprep.subr.bf16.mxu0 %v1289_v61 }
  0x2d   :  { %1165 = vmatpush3.bf16.msra.mxu1 %v1288_v62 }
  0x2e   :  { %1166 = vmatprep.subr.bf16.mxu1 %v1291_v63 }
  0x2f   :  { %1145 = vmatpush3.bf16.msra.mxu0 %v1290_v0 }
  0x30   :  { %1146 = vmatprep.subr.bf16.mxu0 %v1293_v1 }
  0x31   :  { %1167 = vmatpush3.bf16.msra.mxu1 %v1292_v2 }
  0x32   :  { %1168 = vmatprep.subr.bf16.mxu1 %v1295_v3 }
  0x33   :  { %1147 = vmatpush3.bf16.msra.mxu0 %v1294_v4 }
  0x34   :  { %1148 = vmatprep.subr.bf16.mxu0 %v1297_v5 }
  0x35   :  { %1169 = vmatpush3.bf16.msra.mxu1 %v1296_v6 }
  0x36   :  { %1170 = vmatprep.subr.bf16.mxu1 %v1299_v7 }
  0x37   :  { %1149 = vmatpush3.bf16.msra.mxu0 %v1298_v8 }
  0x38   :  { %1150 = vmatprep.subr.bf16.mxu0 %v1301_v9 }
  0x39   :  { %1171 = vmatpush3.bf16.msra.mxu1 %v1300_v10 }
  0x3a   :  { %1172 = vmatprep.subr.bf16.mxu1 %v1303_v11 }
  0x3b   :  { %1151 = vmatpush3.bf16.msra.mxu0 %v1302_v12 }
  0x3c   :  { %1152 = vmatprep.subr.bf16.mxu0 %v1305_v13 }
  0x3d   :  { %1173 = vmatpush3.bf16.msra.mxu1 %v1304_v14 }
  0x3e   :  { %1174 = vmatprep.subr.bf16.mxu1 %v1307_v15 }
  0x3f   :  { %1153 = vmatpush3.bf16.msra.mxu0 %v1306_v16 }
  0x40   :  { %1200 = vmatprep.subr.bf16.mxu0 %v1350_v20 }
  0x41   :  { %1175 = vmatpush3.bf16.msra.mxu1 %v1308_v18 }
  0x42   :  { %794 = vmatmul.mubr.bf16.vlgmr.msra.gmra.mrb[4].mxu0 %v207_v17  ;;  %1220 = vmatprep.subr.bf16.mxu1 %v1350_v20 }
  0x43   :  { %1201 = vmatpush3.bf16.msra.mxu0 %v1309_v19  ;;  %1216 = vmatprep.mubr.msk.bf16.mxu0 %vm1351_vm0, %v1350_v20 }
  0x44   :  { %10 = vsyncpa [#allocation3], 0  ;;  %834 = vmatmul.mubr.bf16.vlgmr.msra.gmra.mrb[4].mxu1 %v223_v21  ;;  %1202 = vmatprep.subr.bf16.mxu0 %v1350_v20  ;;  %v1311_v23 = vld [vmem:[%s1662_s1 + $0x210] sm:$0xff]   ;;  %v1312_v24 = vld [vmem:[%s1662_s1 + $0x218] sm:$0xff]   ;;  %s1352_s7 = smov [#allocation2]  }
  0x45   :  { %1236 = vmatprep.mubr.msk.bf16.mxu1 %vm1351_vm0, %v1350_v20  ;;  %v1313_v25 = vld [vmem:[%s1662_s1 + $0x220] sm:$0xff]   ;;  %v1314_v26 = vld [vmem:[%s1662_s1 + $0x228] sm:$0xff]   ;;  %v1315_v27 = vld [vmem:[%s1662_s1 + $0x230] sm:$0xff]   ;;  %s1003_s8 = sshll.u32 %s1352_s7, 4  ;;  %s1004_s8 = int_to_ptr.vmem [resolvable:$true] %s1003_s8 }
  0x46   :  { %v1316_v28 = vld [vmem:[%s1662_s1 + $0x238] sm:$0xff]   ;;  %v1012_v29 = vld.sshfl [vmem:[%s1661_s0 + $0x8] sm:$0x1 pattern:$0x75316420]  ;;  %v1317_v31 = vld [vmem:[%s1664_s3] sm:$0xff]   ;;  %p1330_p1 = scmp.lt.s32.totalorder %s1004_s8, %s1004_s8 }
  0x47   :  { %1203 = vmatpush3.bf16.msra.mxu0 %v1310_v22  ;;  %v239_v30 = vrot.slane %v1012_v29, %v1488_v41  ;;  %1221 = vmatpush3.bf16.msra.mxu1 %v1317_v31  ;;  %v1318_v32 = vld [vmem:[%s1664_s3 + $0x8] sm:$0xff]   ;;  %v1319_v33 = vld [vmem:[%s1664_s3 + $0x10] sm:$0xff]   ;;  %v1320_v34 = vld [vmem:[%s1664_s3 + $0x18] sm:$0xff]   ;;  %s1325_s9 = scalar_lea.vmem %s1004_s8, 32 }
  0x48   :  { %1204 = vmatprep.subr.bf16.mxu0 %v1350_v20  ;;  %1222 = vmatprep.subr.bf16.mxu1 %v1350_v20  ;;  %v1321_v35 = vld [vmem:[%s1664_s3 + $0x20] sm:$0xff]   ;;  %v1322_v36 = vld [vmem:[%s1664_s3 + $0x28] sm:$0xff]   ;;  %v1323_v37 = vld [vmem:[%s1664_s3 + $0x30] sm:$0xff]   ;;  %p1326_p0 = scmp.ne.s32.totalorder %s1004_s8, %s1325_s9  ;;  %p1331_p2 = scmp.lt.s32.totalorder %s1325_s9, %s1325_s9 }
  0x49   :  { %v1324_v38 = vld [vmem:[%s1664_s3 + $0x38] sm:$0xff]   ;;  %v1011_v40 = vld [vmem:[%s1663_s2] ss:$0 sm:$0xff] }
  0x4a   :  { %v1085_v8 = vld [vmem:[%s1665_s4] ss:$0 sm:$0xff]  ;;  %p1332_p3 = por %p1331_p2, %p1330_p1 }
  0x4b   :  { %1205 = vmatpush3.bf16.msra.mxu0 %v1311_v23  ;;  %1223 = vmatpush3.bf16.msra.mxu1 %v1318_v32 }
  0x4c   :  { %1206 = vmatprep.subr.bf16.mxu0 %v1350_v20  ;;  %1224 = vmatprep.subr.bf16.mxu1 %v1350_v20  ;;  %p1333_p4 = pnand %p1332_p3, %p1326_p0 }
  0x4f   :  { %1207 = vmatpush3.bf16.msra.mxu0 %v1312_v24  ;;  %1225 = vmatpush3.bf16.msra.mxu1 %v1319_v33 }
  0x50   :  { %1208 = vmatprep.subr.bf16.mxu0 %v1350_v20  ;;  %1226 = vmatprep.subr.bf16.mxu1 %v1350_v20 }
  0x53   :  { %1209 = vmatpush3.bf16.msra.mxu0 %v1313_v25  ;;  %1227 = vmatpush3.bf16.msra.mxu1 %v1320_v34 }
  0x54   :  { %1210 = vmatprep.subr.bf16.mxu0 %v1350_v20  ;;  %1228 = vmatprep.subr.bf16.mxu1 %v1350_v20 }
  0x57   :  { %1211 = vmatpush3.bf16.msra.mxu0 %v1314_v26  ;;  %1229 = vmatpush3.bf16.msra.mxu1 %v1321_v35 }
  0x58   :  { %1212 = vmatprep.subr.bf16.mxu0 %v1350_v20  ;;  %1230 = vmatprep.subr.bf16.mxu1 %v1350_v20 }
  0x5b   :  { %1213 = vmatpush3.bf16.msra.mxu0 %v1315_v27  ;;  %1231 = vmatpush3.bf16.msra.mxu1 %v1322_v36 }
  0x5c   :  { %1214 = vmatprep.subr.bf16.mxu0 %v1350_v20  ;;  %1232 = vmatprep.subr.bf16.mxu1 %v1350_v20 }
  0x5f   :  { %1215 = vmatpush3.bf16.msra.mxu0 %v1316_v28  ;;  %1233 = vmatpush3.bf16.msra.mxu1 %v1323_v37 }
  0x60   :  { %1234 = vmatprep.subr.bf16.mxu1 %v1350_v20 }
  0x62   :  { %1217 = vmatmul.mubr.bf16.vlgmr.msra.gmra.mrb[8].mxu0 %v239_v30 }
  0x63   :  { %1235 = vmatpush3.bf16.msra.mxu1 %v1324_v38 }
  0xf5   :  { %v1110_v39 = vpop.f32.mrb[0].mxu0 }
  0xf6   :  { %v1111_v41 = vpop.f32.mrb[1].mxu0 }
  0xf7   :  { %v1112_v42 = vadd.f32 %v1111_v41, %v1110_v39  ;;  %v1113_v43 = vpop.f32.mrb[2].mxu0  ;;  %v1132_v44 = vpop.f32.mrb[0].mxu1 }
  0xf8   :  { %v1114_v45 = vpop.f32.mrb[3].mxu0  ;;  %v1133_v46 = vpop.f32.mrb[1].mxu1 }
  0xf9   :  { %v716_v47 = vadd.f32 %v1112_v42, %v1011_v40  ;;  %v1134_v48 = vadd.f32 %v1133_v46, %v1132_v44  ;;  %v1135_v49 = vpop.f32.mrb[2].mxu1 }
  0xfa   :  { %v1136_v50 = vpop.f32.mrb[3].mxu1 }
  0xfb   :  { %v756_v51 = vadd.f32 %v1134_v48, %v716_v47 }
 0x115   :  { %v1154_v52 = vpop.f32.mrb[4].mxu0 }
 0x116   :  { %v1155_v53 = vpop.f32.mrb[5].mxu0 }
 0x117   :  { %v1156_v54 = vadd.f32 %v1155_v53, %v1154_v52  ;;  %v1157_v55 = vpop.f32.mrb[6].mxu0  ;;  %v1176_v56 = vpop.f32.mrb[4].mxu1 }
 0x118   :  { %v1158_v57 = vpop.f32.mrb[7].mxu0  ;;  %v1177_v58 = vpop.f32.mrb[5].mxu1 }
 0x119   :  { %v796_v59 = vadd.f32 %v1156_v54, %v756_v51  ;;  %v1178_v60 = vadd.f32 %v1177_v58, %v1176_v56  ;;  %v1179_v61 = vpop.f32.mrb[6].mxu1 }
 0x11a   :  { %v1180_v62 = vpop.f32.mrb[7].mxu1 }
 0x11b   :  { %v836_v63 = vadd.f32 %v1178_v60, %v796_v59 }
 0x135   :  { %v875_v0 = vpop.f32.mrb[8].mxu0 }
 0x136   :  { %v876_v1 = vadd.f32 %v875_v0, %v836_v63  ;;  %v1218_v2 = vpop.f32.mrb[9].mxu0 }
 0x137   :  { %v878_v3 = vpop.f32.mrb[10].mxu0 }
 0x138   :  { %vm881_vm1 = vcmp.ge.f32.partialorder %v876_v1, 0.0  ;;  %v882_v4 = vmul.f32 0.1, %v876_v1  ;;  %v1219_v5 = vpop.f32.mrb[11].mxu0 }
 0x13a   :  { %v883_v6 = vsel %vm881_vm1, %v876_v1, %v882_v4 }
 0x13b   :  { %v884_v7 = vpack.c.bf16 %v883_v6, %v883_v6 }
 0x13d   :  { %1237 = vmatmul.mubr.bf16.vlgmr.msra.gmra.mrb[8].mxu1 %v884_v7 }
 0x210   :  { %v990_v9 = vpop.f32.mrb[8].mxu1 }
 0x211   :  { %v991_v10 = vadd.f32 %v1085_v8, %v990_v9  ;;  %v1238_v11 = vpop.f32.mrb[9].mxu1 }
 0x212   :  { %v993_v12 = vpop.f32.mrb[10].mxu1 }
 0x213   :  { %996 = vst [vmem:[#allocation2] sm:$0x3] %v991_v10  ;;  %v1239_v13 = vpop.f32.mrb[11].mxu1 }
 0x214   :  { %1336 = shalt.err (!%p1333_p4)
}
 0x215   :  { %s1337_s4 = scalar_lea.hbm %s1666_s5, 32 }
 0x216   :  { %p1338_p5 = scmp.ne.s32.totalorder %s1666_s5, %s1337_s4  ;;  %p1341_p6 = scmp.lt.u32.totalorder %s1337_s4, %s1666_s5 }
 0x218   :  { %p1343_p7 = pnand %p1341_p6, %p1338_p5 }
 0x21a   :  { %1346 = shalt.err (!%p1343_p7)
}
 0x21b   :  { %1006 = dma.vmem_to_hbm [thread:$0]  %s1004_s8, 32, %s1666_s5, [#allocation3]  }
 0x21c   :  { %1347 = dma.done.wait [#allocation3], 32  }
 0x21d   :  { %1348 = vsyncadd [#allocation3], 4294967264 }
 0x21e   :  { %1010 = vsyncpa [#allocation3], 1 }

</bundles_post_ra>
